<compile_context>
chip_gen: v5e
topology: v5e:2x2
jax: 0.10.0
libtpu: 0.0.40
codegen_flags: <defaults>
</compile_context>

<pallas_src>
import functools

import jax
import jax.numpy as jnp
import numpy as np
from jax import lax
from jax.experimental import pallas as pl
from jax.experimental.pallas import tpu as pltpu

EPS = 1e-5
EXPANSION = 4


def _default_vmem_limit():
    # Per-generation scoped-VMEM budget (v5e/v6e: 128 MiB physical, v7x: 64 MiB).
    try:
        cap = int(pltpu.get_tpu_info().vmem_capacity_bytes)
    except Exception:
        cap = 64 * 1024 * 1024
    return max(32 * 1024 * 1024, min(int(cap * 0.45), 100 * 1024 * 1024))


VMEM_LIMIT = _default_vmem_limit()


def _cparams(sem):
    return pltpu.CompilerParams(dimension_semantics=sem,
                                vmem_limit_bytes=VMEM_LIMIT)


def _row_tile(M):
    # 512-row tiles reach ~85% of HBM roofline (v6e measurements); keep >=2 grid
    # steps at small M so both cores get work.
    if M >= 1024:
        return 512
    if M >= 512:
        return 256
    return M


def _fold_bn(gamma, beta, mean, var):
    scale = gamma * lax.rsqrt(var + EPS)
    bias = beta - mean * scale
    return scale, bias


def _finish_stats(partials, count):
    s = jnp.sum(partials, axis=0)
    mean = s[0] / count
    # clamp: E[x^2] - mean^2 can cancel slightly negative at large M/C.
    var = jnp.maximum(s[1] / count - mean * mean, 0.0)
    return mean, var


# --------------------------- bn1 statistics kernel ---------------------------

def _stats_kernel(x_ref, st_ref, *, true_rows, tm, need_mask):
    x = x_ref[...].astype(jnp.float32)
    if need_mask:
        row = pl.program_id(0) * tm + lax.broadcasted_iota(jnp.int32, (tm, 1), 0)
        x = jnp.where(row < true_rows, x, 0.0)
    st_ref[0] = jnp.concatenate(
        [jnp.sum(x, axis=0, keepdims=True),
         jnp.sum(x * x, axis=0, keepdims=True)], axis=0)


def channel_stats(x2d, tm):
    """Per-channel (mean, biased var) of a flat [M, C] array via per-block partials."""
    M, C = x2d.shape
    G = pl.cdiv(M, tm)
    kern = functools.partial(_stats_kernel, true_rows=M, tm=tm,
                             need_mask=(M % tm != 0))
    st = pl.pallas_call(
        kern,
        out_shape=jax.ShapeDtypeStruct((G, 2, C), jnp.float32),
        grid=(G,),
        in_specs=[pl.BlockSpec((tm, C), lambda i: (i, 0))],
        out_specs=pl.BlockSpec((1, 2, C), lambda i: (i, 0, 0)),
        compiler_params=_cparams(("parallel",)),
    )(x2d)
    return _finish_stats(st, M)


# ----------- conv1: bn1+relu+1x1 (+fused 1x1 shortcut) + bn2 stats -----------

def _conv1_kernel(*refs, true_rows, tm, need_mask, planes, fuse_proj):
    if fuse_proj:
        x_ref, s_ref, b_ref, w_ref, y1_ref, sc_ref, st_ref = refs
    else:
        x_ref, s_ref, b_ref, w_ref, y1_ref, st_ref = refs
    a = jnp.maximum(x_ref[...].astype(jnp.float32) * s_ref[...] + b_ref[...], 0.0)
    if need_mask:  # zero ragged-tail rows so the fused bn2 stats stay exact
        row = pl.program_id(0) * tm + lax.broadcasted_iota(jnp.int32, (tm, 1), 0)
        a = jnp.where(row < true_rows, a, 0.0)
    r = jnp.dot(a.astype(jnp.bfloat16), w_ref[...], preferred_element_type=jnp.float32)
    y1 = r[:, :planes] if fuse_proj else r
    y1_ref[...] = y1.astype(jnp.bfloat16)
    if fuse_proj:
        sc_ref[...] = r[:, planes:].astype(jnp.bfloat16)
    st_ref[0] = jnp.concatenate(
        [jnp.sum(y1, axis=0, keepdims=True),
         jnp.sum(y1 * y1, axis=0, keepdims=True)], axis=0)


def conv1_fused(x2d, scale, bias, w1, wsc, tm):
    """bn1+relu + 1x1 conv. When wsc is given, the 1x1 projection shortcut is fused
    as one wide matmul (w1 ++ wsc along output channels). Emits bf16 y1 (+sc) plus
    per-block bn2 sum/sumsq partials."""
    M, Cin = x2d.shape
    planes = w1.shape[1]
    fuse_proj = wsc is not None
    w = jnp.concatenate([w1, wsc], axis=1) if fuse_proj else w1
    G = pl.cdiv(M, tm)
    kern = functools.partial(_conv1_kernel, true_rows=M, tm=tm,
                             need_mask=(M % tm != 0), planes=planes,
                             fuse_proj=fuse_proj)
    # TODO(synk): mark constant-index weight/scale specs pipeline_mode=pl.Buffered(1)
    # (single buffering) once verified on the target jax version, to halve weight VMEM.
    in_specs = [pl.BlockSpec((tm, Cin), lambda i: (i, 0)),
                pl.BlockSpec((1, Cin), lambda i: (0, 0)),
                pl.BlockSpec((1, Cin), lambda i: (0, 0)),
                pl.BlockSpec(w.shape, lambda i: (0, 0))]
    out_shape = [jax.ShapeDtypeStruct((M, planes), jnp.bfloat16)]
    out_specs = [pl.BlockSpec((tm, planes), lambda i: (i, 0))]
    if fuse_proj:
        out_c = wsc.shape[1]
        out_shape.append(jax.ShapeDtypeStruct((M, out_c), jnp.bfloat16))
        out_specs.append(pl.BlockSpec((tm, out_c), lambda i: (i, 0)))
    out_shape.append(jax.ShapeDtypeStruct((G, 2, planes), jnp.float32))
    out_specs.append(pl.BlockSpec((1, 2, planes), lambda i: (i, 0, 0)))

    outs = pl.pallas_call(
        kern,
        out_shape=tuple(out_shape),
        grid=(G,),
        in_specs=in_specs,
        out_specs=tuple(out_specs),
        compiler_params=_cparams(("parallel",)),
    )(x2d, scale.reshape(1, Cin), bias.reshape(1, Cin), w)
    if fuse_proj:
        y1, sc, st = outs
        return y1, sc, st
    y1, st = outs
    return y1, None, st


# ---------- conv2: bn2+relu+3x3 conv (im2col big-K matmul) + bn3 stats ---------

def _conv2_kernel(y_ref, yt_ref, yb_ref, s_ref, b_ref, w_ref, o_ref, st_ref, *,
                  W, th, stride):
    Cp = y_ref.shape[-1]
    g = pl.program_id(1)
    G = pl.num_programs(1)
    TW = th * W
    s = s_ref[...]
    b = b_ref[...]

    def bnrelu(v):
        return jnp.maximum(v.astype(jnp.float32) * s + b, 0.0)

    center = bnrelu(y_ref[...].reshape(TW, Cp))
    # one-row halos (index_map clamps at the image border; zero them there = conv padding)
    top = jnp.where(g > 0, bnrelu(yt_ref[...].reshape(W, Cp)), 0.0)
    bot = jnp.where(g < G - 1, bnrelu(yb_ref[...].reshape(W, Cp)), 0.0)
    act = jnp.concatenate([top, center, bot], axis=0)            # ((th+2)*W, Cp) f32

    # Width-edge handling with no per-tap masks: kw=0 taps read a copy with column
    # W-1 zeroed, kw=2 taps a copy with column 0 zeroed (2 selects total).
    col = lax.broadcasted_iota(jnp.int32, ((th + 2) * W, 1), 0) % W
    a_c = act
    a_l = jnp.where(col != (W - 1), act, 0.0)
    a_r = jnp.where(col != 0, act, 0.0)
    z = jnp.zeros((1, Cp), jnp.float32)
    bases = (jnp.concatenate([z, a_l, z], axis=0),
             jnp.concatenate([z, a_c, z], axis=0),
             jnp.concatenate([z, a_r, z], axis=0))

    # im2col patch (TW, 9*Cp) -> single big-K MXU matmul.
    taps = []
    for kh in range(3):
        for kw in range(3):
            off = W + 1 + (kh - 1) * W + (kw - 1)
            taps.append(bases[kw][off:off + TW, :])
    patch = jnp.concatenate(taps, axis=1).astype(jnp.bfloat16)   # (TW, 9*Cp)
    y2 = jnp.dot(patch, w_ref[...], preferred_element_type=jnp.float32)  # (TW, Cout)

    Cout = y2.shape[-1]
    o_ref[...] = y2.reshape(1, th, W, Cout).astype(jnp.bfloat16)

    if stride == 1:
        sel = y2
    else:
        p = lax.broadcasted_iota(jnp.int32, (TW, 1), 0)
        keep = (((g * th + p // W) % stride) == 0) & (((p % W) % stride) == 0)
        sel = jnp.where(keep, y2, 0.0)
    st_ref[0] = jnp.concatenate(
        [jnp.sum(sel, axis=0, keepdims=True),
         jnp.sum(sel * sel, axis=0, keepdims=True)], axis=0)


def _spatial_tile(H):
    for d in range(min(H, 8), 0, -1):
        if H % d == 0:
            return d
    return H


def conv2_fused(y1_4d, scale, bias, w2mat, stride):
    """bn2+relu + 3x3 conv (padding=1, dense stride-1 output) with fused bn3 stats.
    Grid = (N, H//th); 1-row halos come from clamped index_maps on the same array."""
    N, H, W, Cp = y1_4d.shape
    Cout = w2mat.shape[-1]
    th = _spatial_tile(H)
    G = H // th
    kern = functools.partial(_conv2_kernel, W=W, th=th, stride=stride)
    y2, st = pl.pallas_call(
        kern,
        out_shape=(jax.ShapeDtypeStruct((N, H, W, Cout), jnp.bfloat16),
                   jax.ShapeDtypeStruct((N * G, 2, Cout), jnp.float32)),
        grid=(N, G),
        in_specs=[
            pl.BlockSpec((1, th, W, Cp), lambda n, g: (n, g, 0, 0)),
            pl.BlockSpec((1, 1, W, Cp),
                         lambda n, g: (n, jnp.maximum(g * th - 1, 0), 0, 0)),
            pl.BlockSpec((1, 1, W, Cp),
                         lambda n, g: (n, jnp.minimum(g * th + th, H - 1), 0, 0)),
            pl.BlockSpec((1, Cp), lambda n, g: (0, 0)),
            pl.BlockSpec((1, Cp), lambda n, g: (0, 0)),
            pl.BlockSpec(w2mat.shape, lambda n, g: (0, 0)),
        ],
        out_specs=(pl.BlockSpec((1, th, W, Cout), lambda n, g: (n, g, 0, 0)),
                   pl.BlockSpec((1, 2, Cout), lambda n, g: (n * G + g, 0, 0))),
        compiler_params=_cparams(("parallel", "parallel")),
    )(y1_4d, y1_4d, y1_4d, scale.reshape(1, Cp), bias.reshape(1, Cp), w2mat)
    return y2, st


# --------------- conv3: bn3+relu+1x1 conv + residual add -----------------------

def _conv3_kernel(*refs, iden):
    if iden:
        y_ref, s_ref, b_ref, w_ref, x_ref, s1_ref, b1_ref, o_ref = refs
    else:
        y_ref, s_ref, b_ref, w_ref, r_ref, o_ref = refs
    a = jnp.maximum(y_ref[...].astype(jnp.float32) * s_ref[...] + b_ref[...], 0.0)
    out = jnp.dot(a.astype(jnp.bfloat16), w_ref[...], preferred_element_type=jnp.float32)
    if iden:
        # identity shortcut relu(bn1(x)) recomputed here (never written to HBM)
        res = jnp.maximum(x_ref[...].astype(jnp.float32) * s1_ref[...] + b1_ref[...], 0.0)
    else:
        res = r_ref[...].astype(jnp.float32)
    o_ref[...] = out + res


def conv3_fused(y2_flat, scale, bias, w3, residual, tm, iden, s1=None, b1=None):
    M, K = y2_flat.shape
    Cout = w3.shape[1]
    G = pl.cdiv(M, tm)
    in_specs = [pl.BlockSpec((tm, K), lambda i: (i, 0)),
                pl.BlockSpec((1, K), lambda i: (0, 0)),
                pl.BlockSpec((1, K), lambda i: (0, 0)),
                pl.BlockSpec(w3.shape, lambda i: (0, 0))]
    inputs = [y2_flat, scale.reshape(1, K), bias.reshape(1, K), w3]
    if iden:
        Cin = residual.shape[1]
        in_specs += [pl.BlockSpec((tm, Cin), lambda i: (i, 0)),
                     pl.BlockSpec((1, Cin), lambda i: (0, 0)),
                     pl.BlockSpec((1, Cin), lambda i: (0, 0))]
        inputs += [residual, s1.reshape(1, Cin), b1.reshape(1, Cin)]
    else:
        in_specs.append(pl.BlockSpec((tm, Cout), lambda i: (i, 0)))
        inputs.append(residual)
    return pl.pallas_call(
        functools.partial(_conv3_kernel, iden=iden),
        out_shape=jax.ShapeDtypeStruct((M, Cout), jnp.float32),
        grid=(G,),
        in_specs=in_specs,
        out_specs=pl.BlockSpec((tm, Cout), lambda i: (i, 0)),
        compiler_params=_cparams(("parallel",)),
    )(*inputs)


# ---------------- strided projection shortcut (only used when stride > 1) ------

def _bnrelu_matmul_kernel(x_ref, s_ref, b_ref, w_ref, o_ref):
    a = jnp.maximum(x_ref[...].astype(jnp.float32) * s_ref[...] + b_ref[...], 0.0)
    o_ref[...] = jnp.dot(a.astype(jnp.bfloat16), w_ref[...],
                         preferred_element_type=jnp.float32).astype(jnp.bfloat16)


def bnrelu_matmul(x2d, scale, bias, w, tm):
    M, K = x2d.shape
    Cout = w.shape[1]
    return pl.pallas_call(
        _bnrelu_matmul_kernel,
        out_shape=jax.ShapeDtypeStruct((M, Cout), jnp.bfloat16),
        grid=(pl.cdiv(M, tm),),
        in_specs=[pl.BlockSpec((tm, K), lambda i: (i, 0)),
                  pl.BlockSpec((1, K), lambda i: (0, 0)),
                  pl.BlockSpec((1, K), lambda i: (0, 0)),
                  pl.BlockSpec(w.shape, lambda i: (0, 0))],
        out_specs=pl.BlockSpec((tm, Cout), lambda i: (i, 0)),
        compiler_params=_cparams(("parallel",)),
    )(x2d, scale.reshape(1, K), bias.reshape(1, K), w)


# --------------------------------- forward -----------------------------------

def preact_bottleneck(x_nchw, p, stride=1):
    """Pallas implementation of PreActBottleneck.forward (training-mode BN)."""
    N, Cin, H, W = x_nchw.shape
    planes = p["conv1_w"].shape[1]
    out_c = EXPANSION * planes
    Ho = (H - 1) // stride + 1
    Wo = (W - 1) // stride + 1
    M = N * H * W
    Mo = N * Ho * Wo
    tm = _row_tile(M)
    tmo = _row_tile(Mo)
    has_proj = (stride != 1) or (Cin != out_c)

    # TODO(synk): fuse the NCHW<->NHWC transposes into the stats / conv3 kernels to
    # save two full HBM round trips of x and out.
    x_nhwc = jnp.transpose(x_nchw, (0, 2, 3, 1)).astype(jnp.float32)
    x2d = x_nhwc.reshape(M, Cin)

    # bn1 statistics (only standalone stats pass; bn2/bn3 stats are fused side outputs)
    m1, v1 = channel_stats(x2d, tm)
    s1, b1 = _fold_bn(p["bn1_g"], p["bn1_b"], m1, v1)

    # bn1+relu+conv1 (+ fused projection shortcut when it is stride 1) + bn2 stats
    wsc = p["shortcut_w"] if (has_proj and stride == 1) else None
    y1, sc, st1 = conv1_fused(x2d, s1, b1, p["conv1_w"], wsc, tm)
    m2, v2 = _finish_stats(st1, M)
    s2, b2 = _fold_bn(p["bn2_g"], p["bn2_b"], m2, v2)

    if has_proj and stride != 1:
        # TODO(synk): fold the strided shortcut read into conv1 via an Element index_map.
        xs = x_nhwc[:, ::stride, ::stride, :].reshape(Mo, Cin)
        sc = bnrelu_matmul(xs, s1, b1, p["shortcut_w"], tmo)

    # bn2+relu+3x3 conv (single big-K im2col matmul per spatial tile) + bn3 stats
    y1_4d = y1.reshape(N, H, W, planes)
    y2_4d, st2 = conv2_fused(y1_4d, s2, b2, p["conv2_w"], stride)
    m3, v3 = _finish_stats(st2, Mo)
    s3, b3 = _fold_bn(p["bn3_g"], p["bn3_b"], m3, v3)

    if stride == 1:
        y2 = y2_4d.reshape(Mo, planes)
    else:
        # TODO(synk): compute only the kept rows inside conv2 instead of dense-then-subsample.
        y2 = y2_4d[:, ::stride, ::stride, :].reshape(Mo, planes)

    # bn3+relu+conv3 + residual add (projection: stored bf16; identity: recomputed)
    if has_proj:
        out2d = conv3_fused(y2, s3, b3, p["conv3_w"], sc, tmo, iden=False)
    else:
        out2d = conv3_fused(y2, s3, b3, p["conv3_w"], x2d, tmo, iden=True,
                            s1=s1, b1=b1)

    out = out2d.reshape(N, Ho, Wo, out_c)
    return jnp.transpose(out, (0, 3, 1, 2))            # back to NCHW


# --------------------------- pure-JAX reference -------------------------------

def _reference(x, tp, stride):
    def bn(y, g, b):
        mean = y.mean(axis=(0, 2, 3), keepdims=True)
        var = y.var(axis=(0, 2, 3), keepdims=True)     # biased, like torch BN train
        return ((y - mean) / jnp.sqrt(var + EPS)
                * g.reshape(1, -1, 1, 1) + b.reshape(1, -1, 1, 1))

    def conv(y, w_oihw, s=1, pad=0):
        return jax.lax.conv_general_dilated(
            y, w_oihw, (s, s), [(pad, pad), (pad, pad)],
            dimension_numbers=("NCHW", "OIHW", "NCHW"))

    out = jax.nn.relu(bn(x, tp["bn1_g"], tp["bn1_b"]))
    shortcut = conv(out, tp["shortcut_w"], s=stride) if "shortcut_w" in tp else out
    out = conv(out, tp["conv1_w"])
    out = conv(jax.nn.relu(bn(out, tp["bn2_g"], tp["bn2_b"])), tp["conv2_w"],
               s=stride, pad=1)
    out = conv(jax.nn.relu(bn(out, tp["bn3_g"], tp["bn3_b"])), tp["conv3_w"])
    return out + shortcut


# --------------------------- param layout conversion ---------------------------

def convert_params(tp):
    """PyTorch OIHW f32 weights -> kernel layouts (bf16 MXU operands)."""
    planes = tp["conv1_w"].shape[0]
    kp = {
        "conv1_w": jnp.transpose(tp["conv1_w"][:, :, 0, 0], (1, 0)).astype(jnp.bfloat16),
        "conv2_w": jnp.transpose(tp["conv2_w"], (2, 3, 1, 0))
                      .reshape(9 * planes, planes).astype(jnp.bfloat16),
        "conv3_w": jnp.transpose(tp["conv3_w"][:, :, 0, 0], (1, 0)).astype(jnp.bfloat16),
        "bn1_g": tp["bn1_g"], "bn1_b": tp["bn1_b"],
        "bn2_g": tp["bn2_g"], "bn2_b": tp["bn2_b"],
        "bn3_g": tp["bn3_g"], "bn3_b": tp["bn3_b"],
    }
    if "shortcut_w" in tp:
        kp["shortcut_w"] = jnp.transpose(tp["shortcut_w"][:, :, 0, 0], (1, 0)).astype(jnp.bfloat16)
    return kp


def _make_params(key, in_planes, planes, need_shortcut):
    ks = jax.random.split(key, 10)
    out_c = EXPANSION * planes
    tp = {
        "conv1_w": jax.random.normal(ks[0], (planes, in_planes, 1, 1), jnp.float32) * 0.1,
        "conv2_w": jax.random.normal(ks[1], (planes, planes, 3, 3), jnp.float32) * 0.1,
        "conv3_w": jax.random.normal(ks[2], (out_c, planes, 1, 1), jnp.float32) * 0.1,
        "bn1_g": 1.0 + 0.1 * jax.random.normal(ks[4], (in_planes,), jnp.float32),
        "bn1_b": 0.1 * jax.random.normal(ks[5], (in_planes,), jnp.float32),
        "bn2_g": 1.0 + 0.1 * jax.random.normal(ks[6], (planes,), jnp.float32),
        "bn2_b": 0.1 * jax.random.normal(ks[7], (planes,), jnp.float32),
        "bn3_g": 1.0 + 0.1 * jax.random.normal(ks[8], (planes,), jnp.float32),
        "bn3_b": 0.1 * jax.random.normal(ks[9], (planes,), jnp.float32),
    }
    if need_shortcut:
        tp["shortcut_w"] = jax.random.normal(ks[3], (out_c, in_planes, 1, 1),
                                             jnp.float32) * 0.1
    return tp


# ------------------------------------ main ------------------------------------

if __name__ == "__main__":
    # NOTE: channel counts of 4 leave the 128-wide lane dim ~3% occupied; these
    # shapes are for correctness only — performance is meaningful at channels >= 64.
    key = jax.random.PRNGKey(0)
    k_p, k_x, k_p2, k_x2 = jax.random.split(key, 4)

    # Case 1 (primary): projection shortcut, stride 1.
    N, in_planes, planes, H, W, stride = 2, 4, 4, 16, 16, 1
    out_c = EXPANSION * planes
    tp = _make_params(k_p, in_planes, planes,
                      need_shortcut=(stride != 1 or in_planes != out_c))
    x = jax.random.normal(k_x, (N, in_planes, H, W), jnp.float32)

    fwd = jax.jit(functools.partial(preact_bottleneck, stride=stride))
    out = jax.block_until_ready(fwd(x, convert_params(tp)))
    ref = jax.block_until_ready(_reference(x, tp, stride))
    assert out.shape == (N, out_c, H // stride, W // stride), out.shape
    # Tolerance reflects bf16 MXU operands / bf16 intermediates vs the f32 reference.
    np.testing.assert_allclose(np.asarray(out), np.asarray(ref), rtol=3e-2, atol=3e-2)

    # Case 2: identity shortcut (in_planes == expansion*planes), stride 1.
    in_planes2, planes2 = 16, 4
    tp2 = _make_params(k_p2, in_planes2, planes2, need_shortcut=False)
    x2 = jax.random.normal(k_x2, (N, in_planes2, H, W), jnp.float32)
    fwd2 = jax.jit(functools.partial(preact_bottleneck, stride=1))
    out2 = jax.block_until_ready(fwd2(x2, convert_params(tp2)))
    ref2 = jax.block_until_ready(_reference(x2, tp2, 1))
    np.testing.assert_allclose(np.asarray(out2), np.asarray(ref2), rtol=3e-2, atol=3e-2)

    print("KERNEL_OK")
</pallas_src>

<mosaic_0001>
module attributes {stable_mosaic.version = 11 : i64} {
  func.func @_stats_kernel(%arg0: i32, %arg1: memref<256x4xf32, #tpu.memory_space<vmem>>, %arg2: memref<1x2x4xf32, #tpu.memory_space<vmem>>) attributes {dimension_semantics = [#tpu.dimension_semantics<parallel>], iteration_bounds = array<i64: 2>, scalar_prefetch = 0 : i64, scratch_operands = 0 : i64, tpu.core_type = #tpu.core_type<tc>, window_params = [{transform_indices = @transform_0, window_bounds = array<i64: 256, 4>}, {transform_indices = @transform_1, window_bounds = array<i64: 1, 2, 4>}]} {
    %c0 = arith.constant 0 : index
    %c0_0 = arith.constant 0 : index
    %0 = vector.load %arg1[%c0, %c0_0] : memref<256x4xf32, #tpu.memory_space<vmem>>, vector<256x4xf32>
    %cst = arith.constant dense<0.000000e+00> : vector<4xf32>
    %1 = vector.multi_reduction <add>, %0, %cst [0] : vector<256x4xf32> to vector<4xf32>
    %2 = vector.shape_cast %1 : vector<4xf32> to vector<1x4xf32>
    %3 = arith.mulf %0, %0 : vector<256x4xf32>
    %cst_1 = arith.constant dense<0.000000e+00> : vector<4xf32>
    %4 = vector.multi_reduction <add>, %3, %cst_1 [0] : vector<256x4xf32> to vector<4xf32>
    %5 = vector.shape_cast %4 : vector<4xf32> to vector<1x4xf32>
    %6 = tpu.concatenate %2, %5 in 0 : vector<1x4xf32>, vector<1x4xf32> -> vector<2x4xf32>
    %c0_2 = arith.constant 0 : index
    %c0_3 = arith.constant 0 : index
    %c0_4 = arith.constant 0 : index
    %7 = vector.load %arg2[%c0_2, %c0_3, %c0_4] : memref<1x2x4xf32, #tpu.memory_space<vmem>>, vector<1x2x4xf32>
    %8 = vector.shape_cast %7 : vector<1x2x4xf32> to vector<2x4xf32>
    %9 = vector.shape_cast %6 : vector<2x4xf32> to vector<1x2x4xf32>
    tpu.vector_store %arg2[%c0_2, %c0_3, %c0_4], %9 {strides = array<i32>} : memref<1x2x4xf32, #tpu.memory_space<vmem>>, vector<1x2x4xf32>,
    return
  }
  func.func @transform_0(%arg0: i32) -> (i32, i32) {
    %c0_i32 = arith.constant 0 : i32
    %c0_i32_0 = arith.constant 0 : i32
    return %arg0, %c0_i32 : i32, i32
  }
  func.func @transform_1(%arg0: i32) -> (i32, i32, i32) {
    %c0_i32 = arith.constant 0 : i32
    %c0_i32_0 = arith.constant 0 : i32
    %c0_i32_1 = arith.constant 0 : i32
    return %arg0, %c0_i32, %c0_i32_0 : i32, i32, i32
  }
}

module attributes {stable_mosaic.version = 11 : i64} {
  func.func @_conv1_kernel(%arg0: i32, %arg1: memref<256x4xf32, #tpu.memory_space<vmem>>, %arg2: memref<1x4xf32, #tpu.memory_space<vmem>>, %arg3: memref<1x4xf32, #tpu.memory_space<vmem>>, %arg4: memref<4x20xbf16, #tpu.memory_space<vmem>>, %arg5: memref<256x4xbf16, #tpu.memory_space<vmem>>, %arg6: memref<256x16xbf16, #tpu.memory_space<vmem>>, %arg7: memref<1x2x4xf32, #tpu.memory_space<vmem>>) attributes {dimension_semantics = [#tpu.dimension_semantics<parallel>], iteration_bounds = array<i64: 2>, scalar_prefetch = 0 : i64, scratch_operands = 0 : i64, tpu.core_type = #tpu.core_type<tc>, window_params = [{transform_indices = @transform_0, window_bounds = array<i64: 256, 4>}, {pipeline_mode = #tpu.pipeline_mode<synchronous>, transform_indices = @transform_1, window_bounds = array<i64: 1, 4>}, {pipeline_mode = #tpu.pipeline_mode<synchronous>, transform_indices = @transform_2, window_bounds = array<i64: 1, 4>}, {pipeline_mode = #tpu.pipeline_mode<synchronous>, transform_indices = @transform_3, window_bounds = array<i64: 4, 20>}, {transform_indices = @transform_4, window_bounds = array<i64: 256, 4>}, {transform_indices = @transform_5, window_bounds = array<i64: 256, 16>}, {transform_indices = @transform_6, window_bounds = array<i64: 1, 2, 4>}]} {
    %c0 = arith.constant 0 : index
    %c0_0 = arith.constant 0 : index
    %0 = vector.load %arg1[%c0, %c0_0] : memref<256x4xf32, #tpu.memory_space<vmem>>, vector<256x4xf32>
    %c0_1 = arith.constant 0 : index
    %c0_2 = arith.constant 0 : index
    %1 = vector.load %arg2[%c0_1, %c0_2] : memref<1x4xf32, #tpu.memory_space<vmem>>, vector<1x4xf32>
    %2 = vector.broadcast %1 : vector<1x4xf32> to vector<256x4xf32>
    %3 = arith.mulf %0, %2 : vector<256x4xf32>
    %c0_3 = arith.constant 0 : index
    %c0_4 = arith.constant 0 : index
    %4 = vector.load %arg3[%c0_3, %c0_4] : memref<1x4xf32, #tpu.memory_space<vmem>>, vector<1x4xf32>
    %5 = vector.broadcast %4 : vector<1x4xf32> to vector<256x4xf32>
    %6 = arith.addf %3, %5 : vector<256x4xf32>
    %cst = arith.constant 0.000000e+00 : f32
    %7 = vector.broadcast %cst : f32 to vector<256x4xf32>
    %8 = arith.maximumf %6, %7 : vector<256x4xf32>
    %9 = arith.truncf %8 : vector<256x4xf32> to vector<256x4xbf16>
    %c0_5 = arith.constant 0 : index
    %c0_6 = arith.constant 0 : index
    %10 = vector.load %arg4[%c0_5, %c0_6] : memref<4x20xbf16, #tpu.memory_space<vmem>>, vector<4x20xbf16>
    %cst_7 = arith.constant dense<0.000000e+00> : vector<256x20xf32>
    %11 = tpu.matmul %9, %10, %cst_7 {dimension_numbers = #tpu.dot_dimension_numbers<[1], [0], [0], [1], [0, 0, 1, 1], [], []>} : vector<256x4xbf16>, vector<4x20xbf16>, vector<256x20xf32> -> vector<256x20xf32>
    %12 = vector.extract_strided_slice %11 {offsets = [0, 0], sizes = [256, 4], strides = [1, 1]} : vector<256x20xf32> to vector<256x4xf32>
    %13 = arith.truncf %12 : vector<256x4xf32> to vector<256x4xbf16>
    %c0_8 = arith.constant 0 : index
    %c0_9 = arith.constant 0 : index
    %14 = vector.load %arg5[%c0_8, %c0_9] : memref<256x4xbf16, #tpu.memory_space<vmem>>, vector<256x4xbf16>
    tpu.vector_store %arg5[%c0_8, %c0_9], %13 {strides = array<i32>} : memref<256x4xbf16, #tpu.memory_space<vmem>>, vector<256x4xbf16>,
    %15 = vector.extract_strided_slice %11 {offsets = [0, 4], sizes = [256, 16], strides = [1, 1]} : vector<256x20xf32> to vector<256x16xf32>
    %16 = arith.truncf %15 : vector<256x16xf32> to vector<256x16xbf16>
    %c0_10 = arith.constant 0 : index
    %c0_11 = arith.constant 0 : index
    %17 = vector.load %arg6[%c0_10, %c0_11] : memref<256x16xbf16, #tpu.memory_space<vmem>>, vector<256x16xbf16>
    tpu.vector_store %arg6[%c0_10, %c0_11], %16 {strides = array<i32>} : memref<256x16xbf16, #tpu.memory_space<vmem>>, vector<256x16xbf16>,
    %cst_12 = arith.constant dense<0.000000e+00> : vector<4xf32>
    %18 = vector.multi_reduction <add>, %12, %cst_12 [0] : vector<256x4xf32> to vector<4xf32>
    %19 = vector.shape_cast %18 : vector<4xf32> to vector<1x4xf32>
    %20 = arith.mulf %12, %12 : vector<256x4xf32>
    %cst_13 = arith.constant dense<0.000000e+00> : vector<4xf32>
    %21 = vector.multi_reduction <add>, %20, %cst_13 [0] : vector<256x4xf32> to vector<4xf32>
    %22 = vector.shape_cast %21 : vector<4xf32> to vector<1x4xf32>
    %23 = tpu.concatenate %19, %22 in 0 : vector<1x4xf32>, vector<1x4xf32> -> vector<2x4xf32>
    %c0_14 = arith.constant 0 : index
    %c0_15 = arith.constant 0 : index
    %c0_16 = arith.constant 0 : index
    %24 = vector.load %arg7[%c0_14, %c0_15, %c0_16] : memref<1x2x4xf32, #tpu.memory_space<vmem>>, vector<1x2x4xf32>
    %25 = vector.shape_cast %24 : vector<1x2x4xf32> to vector<2x4xf32>
    %26 = vector.shape_cast %23 : vector<2x4xf32> to vector<1x2x4xf32>
    tpu.vector_store %arg7[%c0_14, %c0_15, %c0_16], %26 {strides = array<i32>} : memref<1x2x4xf32, #tpu.memory_space<vmem>>, vector<1x2x4xf32>,
    return
  }
  func.func @transform_0(%arg0: i32) -> (i32, i32) {
    %c0_i32 = arith.constant 0 : i32
    %c0_i32_0 = arith.constant 0 : i32
    return %arg0, %c0_i32 : i32, i32
  }
  func.func @transform_1(%arg0: i32) -> (i32, i32) {
    %c0_i32 = arith.constant 0 : i32
    %c0_i32_0 = arith.constant 0 : i32
    %c0_i32_1 = arith.constant 0 : i32
    return %c0_i32, %c0_i32_0 : i32, i32
  }
  func.func @transform_2(%arg0: i32) -> (i32, i32) {
    %c0_i32 = arith.constant 0 : i32
    %c0_i32_0 = arith.constant 0 : i32
    %c0_i32_1 = arith.constant 0 : i32
    return %c0_i32, %c0_i32_0 : i32, i32
  }
  func.func @transform_3(%arg0: i32) -> (i32, i32) {
    %c0_i32 = arith.constant 0 : i32
    %c0_i32_0 = arith.constant 0 : i32
    %c0_i32_1 = arith.constant 0 : i32
    return %c0_i32, %c0_i32_0 : i32, i32
  }
  func.func @transform_4(%arg0: i32) -> (i32, i32) {
    %c0_i32 = arith.constant 0 : i32
    %c0_i32_0 = arith.constant 0 : i32
    return %arg0, %c0_i32 : i32, i32
  }
  func.func @transform_5(%arg0: i32) -> (i32, i32) {
    %c0_i32 = arith.constant 0 : i32
    %c0_i32_0 = arith.constant 0 : i32
    return %arg0, %c0_i32 : i32, i32
  }
  func.func @transform_6(%arg0: i32) -> (i32, i32, i32) {
    %c0_i32 = arith.constant 0 : i32
    %c0_i32_0 = arith.constant 0 : i32
    %c0_i32_1 = arith.constant 0 : i32
    return %arg0, %c0_i32, %c0_i32_0 : i32, i32, i32
  }
}

module attributes {stable_mosaic.version = 11 : i64} {
  func.func @_conv2_kernel(%arg0: i32, %arg1: i32, %arg2: memref<1x8x16x4xbf16, #tpu.memory_space<vmem>>, %arg3: memref<1x1x16x4xbf16, #tpu.memory_space<vmem>>, %arg4: memref<1x1x16x4xbf16, #tpu.memory_space<vmem>>, %arg5: memref<1x4xf32, #tpu.memory_space<vmem>>, %arg6: memref<1x4xf32, #tpu.memory_space<vmem>>, %arg7: memref<36x4xbf16, #tpu.memory_space<vmem>>, %arg8: memref<1x8x16x4xbf16, #tpu.memory_space<vmem>>, %arg9: memref<1x2x4xf32, #tpu.memory_space<vmem>>) attributes {dimension_semantics = [#tpu.dimension_semantics<parallel>, #tpu.dimension_semantics<parallel>], iteration_bounds = array<i64: 2, 2>, scalar_prefetch = 0 : i64, scratch_operands = 0 : i64, tpu.core_type = #tpu.core_type<tc>, window_params = [{transform_indices = @transform_0, window_bounds = array<i64: 1, 8, 16, 4>}, {transform_indices = @transform_1, window_bounds = array<i64: 1, 1, 16, 4>}, {transform_indices = @transform_2, window_bounds = array<i64: 1, 1, 16, 4>}, {pipeline_mode = #tpu.pipeline_mode<synchronous>, transform_indices = @transform_3, window_bounds = array<i64: 1, 4>}, {pipeline_mode = #tpu.pipeline_mode<synchronous>, transform_indices = @transform_4, window_bounds = array<i64: 1, 4>}, {pipeline_mode = #tpu.pipeline_mode<synchronous>, transform_indices = @transform_5, window_bounds = array<i64: 36, 4>}, {transform_indices = @transform_6, window_bounds = array<i64: 1, 8, 16, 4>}, {transform_indices = @transform_7, window_bounds = array<i64: 1, 2, 4>}]} {
    %c0 = arith.constant 0 : index
    %c0_0 = arith.constant 0 : index
    %0 = vector.load %arg5[%c0, %c0_0] : memref<1x4xf32, #tpu.memory_space<vmem>>, vector<1x4xf32>
    %c0_1 = arith.constant 0 : index
    %c0_2 = arith.constant 0 : index
    %1 = vector.load %arg6[%c0_1, %c0_2] : memref<1x4xf32, #tpu.memory_space<vmem>>, vector<1x4xf32>
    %c0_3 = arith.constant 0 : index
    %c0_4 = arith.constant 0 : index
    %c0_5 = arith.constant 0 : index
    %c0_6 = arith.constant 0 : index
    %2 = vector.load %arg2[%c0_3, %c0_4, %c0_5, %c0_6] : memref<1x8x16x4xbf16, #tpu.memory_space<vmem>>, vector<1x8x16x4xbf16>
    %3 = vector.shape_cast %2 : vector<1x8x16x4xbf16> to vector<128x4xbf16>
    %4 = arith.extf %3 : vector<128x4xbf16> to vector<128x4xf32>
    %5 = vector.broadcast %0 : vector<1x4xf32> to vector<128x4xf32>
    %6 = arith.mulf %4, %5 : vector<128x4xf32>
    %7 = vector.broadcast %1 : vector<1x4xf32> to vector<128x4xf32>
    %8 = arith.addf %6, %7 : vector<128x4xf32>
    %cst = arith.constant 0.000000e+00 : f32
    %9 = vector.broadcast %cst : f32 to vector<128x4xf32>
    %10 = arith.maximumf %8, %9 : vector<128x4xf32>
    %c0_i32 = arith.constant 0 : i32
    %11 = arith.cmpi sgt, %arg1, %c0_i32 : i32
    %c0_7 = arith.constant 0 : index
    %c0_8 = arith.constant 0 : index
    %c0_9 = arith.constant 0 : index
    %c0_10 = arith.constant 0 : index
    %12 = vector.load %arg3[%c0_7, %c0_8, %c0_9, %c0_10] : memref<1x1x16x4xbf16, #tpu.memory_space<vmem>>, vector<1x1x16x4xbf16>
    %13 = vector.shape_cast %12 : vector<1x1x16x4xbf16> to vector<16x4xbf16>
    %14 = arith.extf %13 : vector<16x4xbf16> to vector<16x4xf32>
    %15 = vector.broadcast %0 : vector<1x4xf32> to vector<16x4xf32>
    %16 = arith.mulf %14, %15 : vector<16x4xf32>
    %17 = vector.broadcast %1 : vector<1x4xf32> to vector<16x4xf32>
    %18 = arith.addf %16, %17 : vector<16x4xf32>
    %cst_11 = arith.constant 0.000000e+00 : f32
    %19 = vector.broadcast %cst_11 : f32 to vector<16x4xf32>
    %20 = arith.maximumf %18, %19 : vector<16x4xf32>
    %cst_12 = arith.constant 0.000000e+00 : f32
    %21 = vector.broadcast %cst_12 : f32 to vector<16x4xf32>
    %22 = arith.select %11, %20, %21 : vector<16x4xf32>
    %c1_i32 = arith.constant 1 : i32
    %23 = arith.cmpi slt, %arg1, %c1_i32 : i32
    %c0_13 = arith.constant 0 : index
    %c0_14 = arith.constant 0 : index
    %c0_15 = arith.constant 0 : index
    %c0_16 = arith.constant 0 : index
    %24 = vector.load %arg4[%c0_13, %c0_14, %c0_15, %c0_16] : memref<1x1x16x4xbf16, #tpu.memory_space<vmem>>, vector<1x1x16x4xbf16>
    %25 = vector.shape_cast %24 : vector<1x1x16x4xbf16> to vector<16x4xbf16>
    %26 = arith.extf %25 : vector<16x4xbf16> to vector<16x4xf32>
    %27 = vector.broadcast %0 : vector<1x4xf32> to vector<16x4xf32>
    %28 = arith.mulf %26, %27 : vector<16x4xf32>
    %29 = vector.broadcast %1 : vector<1x4xf32> to vector<16x4xf32>
    %30 = arith.addf %28, %29 : vector<16x4xf32>
    %cst_17 = arith.constant 0.000000e+00 : f32
    %31 = vector.broadcast %cst_17 : f32 to vector<16x4xf32>
    %32 = arith.maximumf %30, %31 : vector<16x4xf32>
    %cst_18 = arith.constant 0.000000e+00 : f32
    %33 = vector.broadcast %cst_18 : f32 to vector<16x4xf32>
    %34 = arith.select %23, %32, %33 : vector<16x4xf32>
    %35 = tpu.concatenate %22, %10, %34 in 0 : vector<16x4xf32>, vector<128x4xf32>, vector<16x4xf32> -> vector<160x4xf32>
    %36 = tpu.iota {dimensions = array<i32: 0>} : vector<160x1xi32>
    %c16_i32 = arith.constant 16 : i32
    %c0_i32_19 = arith.constant 0 : i32
    %37 = arith.cmpi eq, %c16_i32, %c0_i32_19 : i32
    %c1_i32_20 = arith.constant 1 : i32
    %38 = arith.select %37, %c1_i32_20, %c16_i32 : i32
    %39 = vector.broadcast %38 : i32 to vector<160x1xi32>
    %40 = arith.remsi %36, %39 : vector<160x1xi32>
    %c0_i32_21 = arith.constant 0 : i32
    %41 = vector.broadcast %c0_i32_21 : i32 to vector<160x1xi32>
    %42 = arith.cmpi ne, %40, %41 : vector<160x1xi32>
    %c0_i32_22 = arith.constant 0 : i32
    %43 = vector.broadcast %c0_i32_22 : i32 to vector<160x1xi32>
    %44 = arith.cmpi slt, %40, %43 : vector<160x1xi32>
    %c0_i32_23 = arith.constant 0 : i32
    %45 = arith.cmpi slt, %38, %c0_i32_23 : i32
    %46 = vector.broadcast %45 : i1 to vector<160x1xi1>
    %47 = vector.broadcast %46 : vector<160x1xi1> to vector<160x1xi1>
    %48 = arith.xori %44, %47 : vector<160x1xi1>
    %49 = arith.andi %48, %42 : vector<160x1xi1>
    %50 = vector.broadcast %38 : i32 to vector<160x1xi32>
    %51 = arith.addi %40, %50 : vector<160x1xi32>
    %52 = arith.select %49, %51, %40 : vector<160x1xi1>, vector<160x1xi32>
    %c15_i32 = arith.constant 15 : i32
    %53 = vector.broadcast %c15_i32 : i32 to vector<160x1xi32>
    %54 = arith.cmpi ne, %52, %53 : vector<160x1xi32>
    %cst_24 = arith.constant 0.000000e+00 : f32
    %55 = vector.shape_cast %54 : vector<160x1xi1> to vector<160x1xi1>
    %56 = vector.broadcast %55 : vector<160x1xi1> to vector<160x4xi1>
    %57 = vector.broadcast %cst_24 : f32 to vector<160x4xf32>
    %58 = arith.select %56, %35, %57 : vector<160x4xi1>, vector<160x4xf32>
    %c0_i32_25 = arith.constant 0 : i32
    %59 = vector.broadcast %c0_i32_25 : i32 to vector<160x1xi32>
    %60 = arith.cmpi ne, %52, %59 : vector<160x1xi32>
    %cst_26 = arith.constant 0.000000e+00 : f32
    %61 = vector.shape_cast %60 : vector<160x1xi1> to vector<160x1xi1>
    %62 = vector.broadcast %61 : vector<160x1xi1> to vector<160x4xi1>
    %63 = vector.broadcast %cst_26 : f32 to vector<160x4xf32>
    %64 = arith.select %62, %35, %63 : vector<160x4xi1>, vector<160x4xf32>
    %cst_27 = arith.constant 0.000000e+00 : f32
    %65 = vector.broadcast %cst_27 : f32 to vector<1x4xf32>
    %66 = tpu.concatenate %65, %58, %65 in 0 : vector<1x4xf32>, vector<160x4xf32>, vector<1x4xf32> -> vector<162x4xf32>
    %67 = tpu.concatenate %65, %35, %65 in 0 : vector<1x4xf32>, vector<160x4xf32>, vector<1x4xf32> -> vector<162x4xf32>
    %68 = tpu.concatenate %65, %64, %65 in 0 : vector<1x4xf32>, vector<160x4xf32>, vector<1x4xf32> -> vector<162x4xf32>
    %69 = vector.extract_strided_slice %66 {offsets = [0, 0], sizes = [128, 4], strides = [1, 1]} : vector<162x4xf32> to vector<128x4xf32>
    %70 = vector.extract_strided_slice %67 {offsets = [1, 0], sizes = [128, 4], strides = [1, 1]} : vector<162x4xf32> to vector<128x4xf32>
    %71 = vector.extract_strided_slice %68 {offsets = [2, 0], sizes = [128, 4], strides = [1, 1]} : vector<162x4xf32> to vector<128x4xf32>
    %72 = vector.extract_strided_slice %66 {offsets = [16, 0], sizes = [128, 4], strides = [1, 1]} : vector<162x4xf32> to vector<128x4xf32>
    %73 = vector.extract_strided_slice %67 {offsets = [17, 0], sizes = [128, 4], strides = [1, 1]} : vector<162x4xf32> to vector<128x4xf32>
    %74 = vector.extract_strided_slice %68 {offsets = [18, 0], sizes = [128, 4], strides = [1, 1]} : vector<162x4xf32> to vector<128x4xf32>
    %75 = vector.extract_strided_slice %66 {offsets = [32, 0], sizes = [128, 4], strides = [1, 1]} : vector<162x4xf32> to vector<128x4xf32>
    %76 = vector.extract_strided_slice %67 {offsets = [33, 0], sizes = [128, 4], strides = [1, 1]} : vector<162x4xf32> to vector<128x4xf32>
    %77 = vector.extract_strided_slice %68 {offsets = [34, 0], sizes = [128, 4], strides = [1, 1]} : vector<162x4xf32> to vector<128x4xf32>
    %78 = tpu.concatenate %69, %70, %71, %72, %73, %74, %75, %76, %77 in 1 : vector<128x4xf32>, vector<128x4xf32>, vector<128x4xf32>, vector<128x4xf32>, vector<128x4xf32>, vector<128x4xf32>, vector<128x4xf32>, vector<128x4xf32>, vector<128x4xf32> -> vector<128x36xf32>
    %79 = arith.truncf %78 : vector<128x36xf32> to vector<128x36xbf16>
    %c0_28 = arith.constant 0 : index
    %c0_29 = arith.constant 0 : index
    %80 = vector.load %arg7[%c0_28, %c0_29] : memref<36x4xbf16, #tpu.memory_space<vmem>>, vector<36x4xbf16>
    %cst_30 = arith.constant dense<0.000000e+00> : vector<128x4xf32>
    %81 = tpu.matmul %79, %80, %cst_30 {dimension_numbers = #tpu.dot_dimension_numbers<[1], [0], [0], [1], [0, 0, 1, 1], [], []>} : vector<128x36xbf16>, vector<36x4xbf16>, vector<128x4xf32> -> vector<128x4xf32>
    %82 = vector.shape_cast %81 : vector<128x4xf32> to vector<1x8x16x4xf32>
    %83 = arith.truncf %82 : vector<1x8x16x4xf32> to vector<1x8x16x4xbf16>
    %c0_31 = arith.constant 0 : index
    %c0_32 = arith.constant 0 : index
    %c0_33 = arith.constant 0 : index
    %c0_34 = arith.constant 0 : index
    %84 = vector.load %arg8[%c0_31, %c0_32, %c0_33, %c0_34] : memref<1x8x16x4xbf16, #tpu.memory_space<vmem>>, vector<1x8x16x4xbf16>
    tpu.vector_store %arg8[%c0_31, %c0_32, %c0_33, %c0_34], %83 {strides = array<i32>} : memref<1x8x16x4xbf16, #tpu.memory_space<vmem>>, vector<1x8x16x4xbf16>,
    %cst_35 = arith.constant dense<0.000000e+00> : vector<4xf32>
    %85 = vector.multi_reduction <add>, %81, %cst_35 [0] : vector<128x4xf32> to vector<4xf32>
    %86 = vector.shape_cast %85 : vector<4xf32> to vector<1x4xf32>
    %87 = arith.mulf %81, %81 : vector<128x4xf32>
    %cst_36 = arith.constant dense<0.000000e+00> : vector<4xf32>
    %88 = vector.multi_reduction <add>, %87, %cst_36 [0] : vector<128x4xf32> to vector<4xf32>
    %89 = vector.shape_cast %88 : vector<4xf32> to vector<1x4xf32>
    %90 = tpu.concatenate %86, %89 in 0 : vector<1x4xf32>, vector<1x4xf32> -> vector<2x4xf32>
    %c0_37 = arith.constant 0 : index
    %c0_38 = arith.constant 0 : index
    %c0_39 = arith.constant 0 : index
    %91 = vector.load %arg9[%c0_37, %c0_38, %c0_39] : memref<1x2x4xf32, #tpu.memory_space<vmem>>, vector<1x2x4xf32>
    %92 = vector.shape_cast %91 : vector<1x2x4xf32> to vector<2x4xf32>
    %93 = vector.shape_cast %90 : vector<2x4xf32> to vector<1x2x4xf32>
    tpu.vector_store %arg9[%c0_37, %c0_38, %c0_39], %93 {strides = array<i32>} : memref<1x2x4xf32, #tpu.memory_space<vmem>>, vector<1x2x4xf32>,
    return
  }
  func.func @transform_0(%arg0: i32, %arg1: i32) -> (i32, i32, i32, i32) {
    %c0_i32 = arith.constant 0 : i32
    %c0_i32_0 = arith.constant 0 : i32
    %c0_i32_1 = arith.constant 0 : i32
    return %arg0, %arg1, %c0_i32, %c0_i32_0 : i32, i32, i32, i32
  }
  func.func @transform_1(%arg0: i32, %arg1: i32) -> (i32, i32, i32, i32) {
    %c8_i32 = arith.constant 8 : i32
    %0 = arith.muli %arg1, %c8_i32 : i32
    %c1_i32 = arith.constant 1 : i32
    %1 = arith.subi %0, %c1_i32 : i32
    %c0_i32 = arith.constant 0 : i32
    %2 = arith.maxsi %1, %c0_i32 : i32
    %c0_i32_0 = arith.constant 0 : i32
    %c0_i32_1 = arith.constant 0 : i32
    %c0_i32_2 = arith.constant 0 : i32
    return %arg0, %2, %c0_i32_0, %c0_i32_1 : i32, i32, i32, i32
  }
  func.func @transform_2(%arg0: i32, %arg1: i32) -> (i32, i32, i32, i32) {
    %c8_i32 = arith.constant 8 : i32
    %0 = arith.muli %arg1, %c8_i32 : i32
    %c8_i32_0 = arith.constant 8 : i32
    %1 = arith.addi %0, %c8_i32_0 : i32
    %c15_i32 = arith.constant 15 : i32
    %2 = arith.minsi %1, %c15_i32 : i32
    %c0_i32 = arith.constant 0 : i32
    %c0_i32_1 = arith.constant 0 : i32
    %c0_i32_2 = arith.constant 0 : i32
    return %arg0, %2, %c0_i32, %c0_i32_1 : i32, i32, i32, i32
  }
  func.func @transform_3(%arg0: i32, %arg1: i32) -> (i32, i32) {
    %c0_i32 = arith.constant 0 : i32
    %c0_i32_0 = arith.constant 0 : i32
    %c0_i32_1 = arith.constant 0 : i32
    return %c0_i32, %c0_i32_0 : i32, i32
  }
  func.func @transform_4(%arg0: i32, %arg1: i32) -> (i32, i32) {
    %c0_i32 = arith.constant 0 : i32
    %c0_i32_0 = arith.constant 0 : i32
    %c0_i32_1 = arith.constant 0 : i32
    return %c0_i32, %c0_i32_0 : i32, i32
  }
  func.func @transform_5(%arg0: i32, %arg1: i32) -> (i32, i32) {
    %c0_i32 = arith.constant 0 : i32
    %c0_i32_0 = arith.constant 0 : i32
    %c0_i32_1 = arith.constant 0 : i32
    return %c0_i32, %c0_i32_0 : i32, i32
  }
  func.func @transform_6(%arg0: i32, %arg1: i32) -> (i32, i32, i32, i32) {
    %c0_i32 = arith.constant 0 : i32
    %c0_i32_0 = arith.constant 0 : i32
    %c0_i32_1 = arith.constant 0 : i32
    return %arg0, %arg1, %c0_i32, %c0_i32_0 : i32, i32, i32, i32
  }
  func.func @transform_7(%arg0: i32, %arg1: i32) -> (i32, i32, i32) {
    %c2_i32 = arith.constant 2 : i32
    %0 = arith.muli %arg0, %c2_i32 : i32
    %1 = arith.addi %0, %arg1 : i32
    %c0_i32 = arith.constant 0 : i32
    %c0_i32_0 = arith.constant 0 : i32
    %c0_i32_1 = arith.constant 0 : i32
    return %1, %c0_i32, %c0_i32_0 : i32, i32, i32
  }
}

module attributes {stable_mosaic.version = 11 : i64} {
  func.func @_conv3_kernel(%arg0: i32, %arg1: memref<256x4xbf16, #tpu.memory_space<vmem>>, %arg2: memref<1x4xf32, #tpu.memory_space<vmem>>, %arg3: memref<1x4xf32, #tpu.memory_space<vmem>>, %arg4: memref<4x16xbf16, #tpu.memory_space<vmem>>, %arg5: memref<256x16xbf16, #tpu.memory_space<vmem>>, %arg6: memref<256x16xf32, #tpu.memory_space<vmem>>) attributes {dimension_semantics = [#tpu.dimension_semantics<parallel>], iteration_bounds = array<i64: 2>, scalar_prefetch = 0 : i64, scratch_operands = 0 : i64, tpu.core_type = #tpu.core_type<tc>, window_params = [{transform_indices = @transform_0, window_bounds = array<i64: 256, 4>}, {pipeline_mode = #tpu.pipeline_mode<synchronous>, transform_indices = @transform_1, window_bounds = array<i64: 1, 4>}, {pipeline_mode = #tpu.pipeline_mode<synchronous>, transform_indices = @transform_2, window_bounds = array<i64: 1, 4>}, {pipeline_mode = #tpu.pipeline_mode<synchronous>, transform_indices = @transform_3, window_bounds = array<i64: 4, 16>}, {transform_indices = @transform_4, window_bounds = array<i64: 256, 16>}, {transform_indices = @transform_5, window_bounds = array<i64: 256, 16>}]} {
    %c0 = arith.constant 0 : index
    %c0_0 = arith.constant 0 : index
    %0 = vector.load %arg1[%c0, %c0_0] : memref<256x4xbf16, #tpu.memory_space<vmem>>, vector<256x4xbf16>
    %1 = arith.extf %0 : vector<256x4xbf16> to vector<256x4xf32>
    %c0_1 = arith.constant 0 : index
    %c0_2 = arith.constant 0 : index
    %2 = vector.load %arg2[%c0_1, %c0_2] : memref<1x4xf32, #tpu.memory_space<vmem>>, vector<1x4xf32>
    %3 = vector.broadcast %2 : vector<1x4xf32> to vector<256x4xf32>
    %4 = arith.mulf %1, %3 : vector<256x4xf32>
    %c0_3 = arith.constant 0 : index
    %c0_4 = arith.constant 0 : index
    %5 = vector.load %arg3[%c0_3, %c0_4] : memref<1x4xf32, #tpu.memory_space<vmem>>, vector<1x4xf32>
    %6 = vector.broadcast %5 : vector<1x4xf32> to vector<256x4xf32>
    %7 = arith.addf %4, %6 : vector<256x4xf32>
    %cst = arith.constant 0.000000e+00 : f32
    %8 = vector.broadcast %cst : f32 to vector<256x4xf32>
    %9 = arith.maximumf %7, %8 : vector<256x4xf32>
    %10 = arith.truncf %9 : vector<256x4xf32> to vector<256x4xbf16>
    %c0_5 = arith.constant 0 : index
    %c0_6 = arith.constant 0 : index
    %11 = vector.load %arg4[%c0_5, %c0_6] : memref<4x16xbf16, #tpu.memory_space<vmem>>, vector<4x16xbf16>
    %cst_7 = arith.constant dense<0.000000e+00> : vector<256x16xf32>
    %12 = tpu.matmul %10, %11, %cst_7 {dimension_numbers = #tpu.dot_dimension_numbers<[1], [0], [0], [1], [0, 0, 1, 1], [], []>} : vector<256x4xbf16>, vector<4x16xbf16>, vector<256x16xf32> -> vector<256x16xf32>
    %c0_8 = arith.constant 0 : index
    %c0_9 = arith.constant 0 : index
    %13 = vector.load %arg5[%c0_8, %c0_9] : memref<256x16xbf16, #tpu.memory_space<vmem>>, vector<256x16xbf16>
    %14 = arith.extf %13 : vector<256x16xbf16> to vector<256x16xf32>
    %15 = arith.addf %12, %14 : vector<256x16xf32>
    %c0_10 = arith.constant 0 : index
    %c0_11 = arith.constant 0 : index
    %16 = vector.load %arg6[%c0_10, %c0_11] : memref<256x16xf32, #tpu.memory_space<vmem>>, vector<256x16xf32>
    tpu.vector_store %arg6[%c0_10, %c0_11], %15 {strides = array<i32>} : memref<256x16xf32, #tpu.memory_space<vmem>>, vector<256x16xf32>,
    return
  }
  func.func @transform_0(%arg0: i32) -> (i32, i32) {
    %c0_i32 = arith.constant 0 : i32
    %c0_i32_0 = arith.constant 0 : i32
    return %arg0, %c0_i32 : i32, i32
  }
  func.func @transform_1(%arg0: i32) -> (i32, i32) {
    %c0_i32 = arith.constant 0 : i32
    %c0_i32_0 = arith.constant 0 : i32
    %c0_i32_1 = arith.constant 0 : i32
    return %c0_i32, %c0_i32_0 : i32, i32
  }
  func.func @transform_2(%arg0: i32) -> (i32, i32) {
    %c0_i32 = arith.constant 0 : i32
    %c0_i32_0 = arith.constant 0 : i32
    %c0_i32_1 = arith.constant 0 : i32
    return %c0_i32, %c0_i32_0 : i32, i32
  }
  func.func @transform_3(%arg0: i32) -> (i32, i32) {
    %c0_i32 = arith.constant 0 : i32
    %c0_i32_0 = arith.constant 0 : i32
    %c0_i32_1 = arith.constant 0 : i32
    return %c0_i32, %c0_i32_0 : i32, i32
  }
  func.func @transform_4(%arg0: i32) -> (i32, i32) {
    %c0_i32 = arith.constant 0 : i32
    %c0_i32_0 = arith.constant 0 : i32
    return %arg0, %c0_i32 : i32, i32
  }
  func.func @transform_5(%arg0: i32) -> (i32, i32) {
    %c0_i32 = arith.constant 0 : i32
    %c0_i32_0 = arith.constant 0 : i32
    return %arg0, %c0_i32 : i32, i32
  }
}

</mosaic_0001>

<bundles_post_ra>
// kernel: preact_bottleneck.4
= control target key start
LH: loop header
LB: loop body
LE: loop exit
PB: predicated region body
PF: predicated region fallthrough
CT: control target
= control target key end

     0   :  { %s413_s6 = smov 0   ;;  %s533_s0 = inlined_call_operand.vmem [shape: f32[512,4], index: 0, kind: input, shape index: {}]   ;;  %s534_s1 = inlined_call_operand.vmem [shape: f32[2,2,4], index: 1, kind: output, shape index: {}]  }
   0x1 LB: > { %s419_s7 = sadd.s32 4294967295, %s401_s6   ;;  %p381_p0 = scmp.ge.s32.totalorder %s401_s6, 1  ;;  %s401_s6 = sphi %s413_s6, %s11_s6  }
   0x2   : > { %p88_p1 = scmp.lt.s32.totalorder %s401_s6, 3 }
   0x4   : > { %p89_p2 = pnand %p381_p0, %p88_p1 }
   0x5   : > { %s382_s8 = sshll.u32 (!%p89_p2), %s419_s7, 5  ;;  %p113_p4 = scmp.lt.s32.totalorder (!%p89_p2), %s419_s7, 1 }
   0x6   : > { %92 = sbr.rel (%p89_p2) target bundleno = 96 (0x60), region = 24  ;;  %p108_p3 = scmp.lt.s32.totalorder (!%p89_p2), %s382_s8, 63 }
   0xb   : > { %s536_s8 = smov (!%p108_p3, %s382_s8), 63  ;;  %vm149_vm0 = vcmask 31744   ;;  %s538_s7 = smov (!%p113_p4, %s419_s7), 1  ;;  %vm320_vm1 = vcmask 1040384   ;;  %vm322_vm2 = vcmask 25600  }
   0xc   : > { %s383_s9 = sshll.u32 %s536_s8, 3  ;;  %s384_s13 = sshll.u32 %s538_s7, 1 }
   0xd   : > { %s427_s12 = scalar_lea.vmem %s533_s0, %s383_s9  ;;  %s116_s16 = scalar_lea.vmem %s534_s1, %s384_s13 }
   0xe   : > { %v117_v0 = vld [vmem:[%s427_s12] sm:$0xff]  ;;  %v118_v1 = vld [vmem:[%s427_s12 + $0x8] sm:$0xff]  ;;  %v119_v2 = vld [vmem:[%s427_s12 + $0x10] sm:$0xff] }
   0xf   : > { %v150_v3 = vsel %vm149_vm0, %v117_v0, 0.0  ;;  %v151_v4 = vsel %vm149_vm0, %v118_v1, 0.0  ;;  %v153_v5 = vsel %vm149_vm0, %v119_v2, 0.0  ;;  %v120_v6 = vld [vmem:[%s427_s12 + $0x18] sm:$0xff]  ;;  %v121_v9 = vld [vmem:[%s427_s12 + $0x20] sm:$0xff]  ;;  %v122_v12 = vld [vmem:[%s427_s12 + $0x28] sm:$0xff]  ;;  %v219_v20 = vmul.f32 %v117_v0, %v117_v0 }
  0x10   : > { %v152_v7 = vadd.f32 %v151_v4, %v150_v3  ;;  %v155_v8 = vsel %vm149_vm0, %v120_v6, 0.0  ;;  %v157_v11 = vsel %vm149_vm0, %v121_v9, 0.0  ;;  %v159_v14 = vsel %vm149_vm0, %v122_v12, 0.0  ;;  %v123_v15 = vld [vmem:[%s427_s12 + $0x30] sm:$0xff]  ;;  %v124_v18 = vld [vmem:[%s427_s12 + $0x38] sm:$0xff]  ;;  %v125_v24 = vld [vmem:[%s427_s12 + $0x40] sm:$0xff] }
  0x11   : > { %v161_v17 = vsel %vm149_vm0, %v123_v15, 0.0  ;;  %v163_v21 = vsel %vm149_vm0, %v124_v18, 0.0  ;;  %v220_v22 = vmul.f32 %v118_v1, %v118_v1  ;;  %v221_v23 = vmul.f32 %v119_v2, %v119_v2  ;;  %v126_v28 = vld [vmem:[%s427_s12 + $0x48] sm:$0xff]  ;;  %v127_v35 = vld [vmem:[%s427_s12 + $0x50] sm:$0xff]  ;;  %v128_v41 = vld [vmem:[%s427_s12 + $0x58] sm:$0xff] }
  0x12   : > { %v154_v10 = vadd.f32 %v153_v5, %v152_v7  ;;  %v165_v26 = vsel %vm149_vm0, %v125_v24, 0.0  ;;  %v222_v27 = vmul.f32 %v120_v6, %v120_v6  ;;  %v251_v30 = vsel %vm149_vm0, %v219_v20, 0.0  ;;  %v129_v47 = vld [vmem:[%s427_s12 + $0x60] sm:$0xff]  ;;  %v130_v53 = vld [vmem:[%s427_s12 + $0x68] sm:$0xff]  ;;  %v131_v59 = vld [vmem:[%s427_s12 + $0x70] sm:$0xff] }
  0x13   : > { %v167_v31 = vsel %vm149_vm0, %v126_v28, 0.0  ;;  %v223_v32 = vmul.f32 %v121_v9, %v121_v9  ;;  %v252_v33 = vsel %vm149_vm0, %v220_v22, 0.0  ;;  %v254_v34 = vsel %vm149_vm0, %v221_v23, 0.0  ;;  %v132_v1 = vld [vmem:[%s427_s12 + $0x78] sm:$0xff]  ;;  %v133_v7 = vld [vmem:[%s427_s12 + $0x80] sm:$0xff] }
  0x14   : > { %v156_v13 = vadd.f32 %v155_v8, %v154_v10  ;;  %v253_v37 = vadd.f32 %v252_v33, %v251_v30  ;;  %v169_v38 = vsel %vm149_vm0, %v127_v35, 0.0  ;;  %v224_v39 = vmul.f32 %v122_v12, %v122_v12 }
  0x15   : > { %v256_v40 = vsel %vm149_vm0, %v222_v27, 0.0  ;;  %v171_v44 = vsel %vm149_vm0, %v128_v41, 0.0  ;;  %v225_v45 = vmul.f32 %v123_v15, %v123_v15  ;;  %v258_v46 = vsel %vm149_vm0, %v223_v32, 0.0 }
  0x16   : > { %v158_v16 = vadd.f32 %v157_v11, %v156_v13  ;;  %v255_v43 = vadd.f32 %v254_v34, %v253_v37  ;;  %v173_v50 = vsel %vm149_vm0, %v129_v47, 0.0  ;;  %v226_v51 = vmul.f32 %v124_v18, %v124_v18  ;;  %v134_v13 = vld [vmem:[%s427_s12 + $0x88] sm:$0xff] }
  0x17   : > { %v260_v52 = vsel %vm149_vm0, %v224_v39, 0.0  ;;  %v175_v56 = vsel %vm149_vm0, %v130_v53, 0.0  ;;  %v227_v57 = vmul.f32 %v125_v24, %v125_v24  ;;  %v262_v58 = vsel %vm149_vm0, %v225_v45, 0.0  ;;  %v138_v37 = vld [vmem:[%s427_s12 + $0xa8] sm:$0xff] }
  0x18   : > { %v160_v19 = vadd.f32 %v159_v14, %v158_v16  ;;  %v257_v49 = vadd.f32 %v256_v40, %v255_v43  ;;  %v177_v62 = vsel %vm149_vm0, %v131_v59, 0.0  ;;  %v228_v63 = vmul.f32 %v126_v28, %v126_v28  ;;  %v139_v43 = vld [vmem:[%s427_s12 + $0xb0] sm:$0xff] }
  0x19   : > { %v264_v0 = vsel %vm149_vm0, %v226_v51, 0.0  ;;  %v179_v4 = vsel %vm149_vm0, %v132_v1, 0.0  ;;  %v229_v5 = vmul.f32 %v127_v35, %v127_v35  ;;  %v266_v6 = vsel %vm149_vm0, %v227_v57, 0.0 }
  0x1a   : > { %v162_v25 = vadd.f32 %v161_v17, %v160_v19  ;;  %v259_v55 = vadd.f32 %v258_v46, %v257_v49  ;;  %v181_v10 = vsel %vm149_vm0, %v133_v7, 0.0  ;;  %v230_v11 = vmul.f32 %v128_v41, %v128_v41  ;;  %v135_v19 = vld [vmem:[%s427_s12 + $0x90] sm:$0xff]  ;;  %v140_v49 = vld [vmem:[%s427_s12 + $0xb8] sm:$0xff] }
  0x1b   : > { %v268_v12 = vsel %vm149_vm0, %v228_v63, 0.0  ;;  %v183_v16 = vsel %vm149_vm0, %v134_v13, 0.0  ;;  %v231_v17 = vmul.f32 %v129_v47, %v129_v47  ;;  %v270_v18 = vsel %vm149_vm0, %v229_v5, 0.0 }
  0x1c   : > { %v164_v29 = vadd.f32 %v163_v21, %v162_v25  ;;  %v261_v61 = vadd.f32 %v260_v52, %v259_v55  ;;  %v185_v22 = vsel %vm149_vm0, %v135_v19, 0.0  ;;  %v232_v23 = vmul.f32 %v130_v53, %v130_v53  ;;  %v136_v25 = vld [vmem:[%s427_s12 + $0x98] sm:$0xff]  ;;  %v141_v55 = vld [vmem:[%s427_s12 + $0xc0] sm:$0xff] }
  0x1d   : > { %v272_v24 = vsel %vm149_vm0, %v230_v11, 0.0  ;;  %v187_v28 = vsel %vm149_vm0, %v136_v25, 0.0  ;;  %v274_v30 = vsel %vm149_vm0, %v231_v17, 0.0  ;;  %v234_v35 = vmul.f32 %v132_v1, %v132_v1 }
  0x1e   : > { %v166_v36 = vadd.f32 %v165_v26, %v164_v29  ;;  %v263_v3 = vadd.f32 %v262_v58, %v261_v61  ;;  %v233_v29 = vmul.f32 %v131_v59, %v131_v59  ;;  %v191_v40 = vsel %vm149_vm0, %v138_v37, 0.0  ;;  %v142_v61 = vld [vmem:[%s427_s12 + $0xc8] sm:$0xff] }
  0x1f   : > { %v235_v41 = vmul.f32 %v133_v7, %v133_v7  ;;  %v193_v46 = vsel %vm149_vm0, %v139_v43, 0.0  ;;  %v236_v47 = vmul.f32 %v134_v13, %v134_v13  ;;  %v195_v52 = vsel %vm149_vm0, %v140_v49, 0.0 }
  0x20   : > { %v168_v42 = vadd.f32 %v167_v31, %v166_v36  ;;  %v265_v9 = vadd.f32 %v264_v0, %v263_v3  ;;  %v137_v31 = vld [vmem:[%s427_s12 + $0xa0] sm:$0xff]  ;;  %v276_v36 = vsel %vm149_vm0, %v232_v23, 0.0  ;;  %v237_v53 = vmul.f32 %v135_v19, %v135_v19  ;;  %v143_v3 = vld [vmem:[%s427_s12 + $0xd0] sm:$0xff] }
  0x21   : > { %v189_v34 = vsel %vm149_vm0, %v137_v31, 0.0  ;;  %v197_v58 = vsel %vm149_vm0, %v141_v55, 0.0  ;;  %v238_v59 = vmul.f32 %v136_v25, %v136_v25  ;;  %v199_v0 = vsel %vm149_vm0, %v142_v61, 0.0 }
  0x22   : > { %v170_v48 = vadd.f32 %v169_v38, %v168_v42  ;;  %v267_v15 = vadd.f32 %v266_v6, %v265_v9  ;;  %v278_v42 = vsel %vm149_vm0, %v233_v29, 0.0  ;;  %v239_v1 = vmul.f32 %v137_v31, %v137_v31  ;;  %v144_v9 = vld [vmem:[%s427_s12 + $0xd8] sm:$0xff] }
  0x23   : > { %v201_v6 = vsel %vm149_vm0, %v143_v3, 0.0  ;;  %v240_v7 = vmul.f32 %v138_v37, %v138_v37  ;;  %v241_v13 = vmul.f32 %v139_v43, %v139_v43  ;;  %v242_v19 = vmul.f32 %v140_v49, %v140_v49 }
  0x24   : > { %v172_v54 = vadd.f32 %v171_v44, %v170_v48  ;;  %v269_v21 = vadd.f32 %v268_v12, %v267_v15  ;;  %v280_v48 = vsel %vm149_vm0, %v234_v35, 0.0  ;;  %v203_v12 = vsel %vm149_vm0, %v144_v9, 0.0  ;;  %v145_v15 = vld [vmem:[%s427_s12 + $0xe0] sm:$0xff] }
  0x25   : > { %v243_v25 = vmul.f32 %v141_v55, %v141_v55  ;;  %v244_v31 = vmul.f32 %v142_v61, %v142_v61  ;;  %v245_v37 = vmul.f32 %v143_v3, %v143_v3 }
  0x26   : > { %v174_v60 = vadd.f32 %v173_v50, %v172_v54  ;;  %v271_v27 = vadd.f32 %v270_v18, %v269_v21  ;;  %v282_v54 = vsel %vm149_vm0, %v235_v41, 0.0  ;;  %v205_v18 = vsel %vm149_vm0, %v145_v15, 0.0  ;;  %v146_v21 = vld [vmem:[%s427_s12 + $0xe8] sm:$0xff] }
  0x27   : > { %v246_v41 = vmul.f32 %v144_v9, %v144_v9 }
  0x28   : > { %v176_v2 = vadd.f32 %v175_v56, %v174_v60  ;;  %v273_v33 = vadd.f32 %v272_v24, %v271_v27  ;;  %v284_v60 = vsel %vm149_vm0, %v236_v47, 0.0  ;;  %v207_v24 = vsel %vm149_vm0, %v146_v21, 0.0  ;;  %v147_v27 = vld [vmem:[%s427_s12 + $0xf0] sm:$0xff] }
  0x29   : > { %v304_v49 = vsel %vm149_vm0, %v246_v41, 0.0 }
  0x2a   : > { %v178_v8 = vadd.f32 %v177_v62, %v176_v2  ;;  %v275_v39 = vadd.f32 %v274_v30, %v273_v33  ;;  %v286_v2 = vsel %vm149_vm0, %v237_v53, 0.0  ;;  %v209_v30 = vsel %vm149_vm0, %v147_v27, 0.0  ;;  %v148_v33 = vld [vmem:[%s427_s12 + $0xf8] sm:$0xff] }
  0x2b   : > { %v250_v55 = vmul.f32 %v148_v33, %v148_v33 }
  0x2c   : > { %v180_v14 = vadd.f32 %v179_v4, %v178_v8  ;;  %v277_v45 = vadd.f32 %v276_v36, %v275_v39  ;;  %v288_v8 = vsel %vm149_vm0, %v238_v59, 0.0  ;;  %v211_v36 = vsel %vm149_vm0, %v148_v33, 0.0 }
  0x2d   : > { %v312_v61 = vsel %vm149_vm0, %v250_v55, 0.0 }
  0x2e   : > { %v182_v20 = vadd.f32 %v181_v10, %v180_v14  ;;  %v279_v51 = vadd.f32 %v278_v42, %v277_v45  ;;  %v290_v14 = vsel %vm149_vm0, %v239_v1, 0.0  ;;  %v300_v42 = vsel %vm149_vm0, %v244_v31, 0.0 }
  0x2f   : > { %v247_v45 = vmul.f32 %v145_v15, %v145_v15 }
  0x30   : > { %v184_v26 = vadd.f32 %v183_v16, %v182_v20  ;;  %v281_v57 = vadd.f32 %v280_v48, %v279_v51  ;;  %v292_v20 = vsel %vm149_vm0, %v240_v7, 0.0  ;;  %v248_v48 = vmul.f32 %v146_v21, %v146_v21 }
  0x31   : > { %v306_v53 = vsel %vm149_vm0, %v247_v45, 0.0 }
  0x32   : > { %v186_v32 = vadd.f32 %v185_v22, %v184_v26  ;;  %v283_v63 = vadd.f32 %v282_v54, %v281_v57  ;;  %v294_v26 = vsel %vm149_vm0, %v241_v13, 0.0 }
  0x34   : > { %v188_v38 = vadd.f32 %v187_v28, %v186_v32  ;;  %v285_v5 = vadd.f32 %v284_v60, %v283_v63  ;;  %v296_v32 = vsel %vm149_vm0, %v242_v19, 0.0 }
  0x36   : > { %v190_v44 = vadd.f32 %v189_v34, %v188_v38  ;;  %v287_v11 = vadd.f32 %v286_v2, %v285_v5  ;;  %v298_v38 = vsel %vm149_vm0, %v243_v25, 0.0 }
  0x38   : > { %v192_v50 = vadd.f32 %v191_v40, %v190_v44  ;;  %v289_v17 = vadd.f32 %v288_v8, %v287_v11 }
  0x3a   : > { %v194_v56 = vadd.f32 %v193_v46, %v192_v50  ;;  %v291_v23 = vadd.f32 %v290_v14, %v289_v17  ;;  %v302_v46 = vsel %vm149_vm0, %v245_v37, 0.0 }
  0x3c   : > { %v196_v62 = vadd.f32 %v195_v52, %v194_v56  ;;  %v293_v29 = vadd.f32 %v292_v20, %v291_v23  ;;  %v249_v52 = vmul.f32 %v147_v27, %v147_v27  ;;  %v308_v56 = vsel %vm149_vm0, %v248_v48, 0.0 }
  0x3e   : > { %v198_v4 = vadd.f32 %v197_v58, %v196_v62  ;;  %v295_v35 = vadd.f32 %v294_v26, %v293_v29  ;;  %v310_v59 = vsel %vm149_vm0, %v249_v52, 0.0 }
  0x40   : > { %v200_v10 = vadd.f32 %v199_v0, %v198_v4  ;;  %v297_v40 = vadd.f32 %v296_v32, %v295_v35 }
  0x42   : > { %v202_v16 = vadd.f32 %v201_v6, %v200_v10  ;;  %v299_v44 = vadd.f32 %v298_v38, %v297_v40 }
  0x44   : > { %v204_v22 = vadd.f32 %v203_v12, %v202_v16  ;;  %v301_v47 = vadd.f32 %v300_v42, %v299_v44 }
  0x46   : > { %v206_v28 = vadd.f32 %v205_v18, %v204_v22  ;;  %v303_v51 = vadd.f32 %v302_v46, %v301_v47 }
  0x48   : > { %v208_v34 = vadd.f32 %v207_v24, %v206_v28  ;;  %v305_v54 = vadd.f32 %v304_v49, %v303_v51 }
  0x4a   : > { %v210_v39 = vadd.f32 %v209_v30, %v208_v34  ;;  %v307_v58 = vadd.f32 %v306_v53, %v305_v54 }
  0x4c   : > { %v212_v43 = vadd.f32 %v211_v36, %v210_v39  ;;  %v309_v60 = vadd.f32 %v308_v56, %v307_v58 }
  0x4e   : > { %v213_v50 = vrot.slane %v212_v43, 4  ;;  %v311_v63 = vadd.f32 %v310_v59, %v309_v60 }
  0x50   : > { %v214_v57 = vadd.f32 %v213_v50, %v212_v43  ;;  %v313_v0 = vadd.f32 %v312_v61, %v311_v63 }
  0x52   : > { %v215_v62 = vrot.slane %v214_v57, 2  ;;  %v314_v2 = vrot.slane %v313_v0, 4 }
  0x54   : > { %v216_v1 = vadd.f32 %v215_v62, %v214_v57  ;;  %v315_v3 = vadd.f32 %v314_v2, %v313_v0 }
  0x56   : > { %v217_v4 = vrot.slane %v216_v1, 1  ;;  %v316_v5 = vrot.slane %v315_v3, 2 }
  0x58   : > { %v317_v6 = vadd.f32 %v316_v5, %v315_v3  ;;  %v218_v7 = vadd.f32 %v217_v4, %v216_v1 }
  0x5a   : > { %v318_v8 = vrot.slane %v317_v6, 1 }
  0x5c   : > { %v319_v9 = vadd.f32 %v318_v8, %v317_v6 }
  0x5e   : > { %v321_v10 = vsel %vm320_vm1, %v218_v7, %v319_v9 }
  0x5f   : > { %323 = vst.msk [vmem:[%s116_s16] sm:$0x3] %vm322_vm2, %v321_v10 }
  0x60 PF: > { %s11_s6 = sadd.s32 1, %s401_s6  }
  0x61   : > { %p8_p5 = scmp.ge.s32.totalorder %s11_s6, 4  }
  0x63   :  { %10 = sbr.rel (!%p8_p5) target bundleno = 1 (0x1), region = 54 }

// kernel: preact_bottleneck.7
= control target key start
LH: loop header
LB: loop body
LE: loop exit
PB: predicated region body
PF: predicated region fallthrough
CT: control target
= control target key end

     0   :  { %s981_s18 = smov 0   ;;  %s1204_s0 = inlined_call_operand.vmem [shape: bf16[512,4], index: 0, kind: input, shape index: {}]   ;;  %s1205_s1 = inlined_call_operand.vmem [shape: f32[1,4], index: 1, kind: input, shape index: {}]   ;;  %s1206_s2 = inlined_call_operand.vmem [shape: f32[1,4], index: 2, kind: input, shape index: {}]   ;;  %s1207_s3 = inlined_call_operand.vmem [shape: bf16[4,16], index: 3, kind: input, shape index: {}]   ;;  %s1208_s4 = inlined_call_operand.vmem [shape: bf16[512,16], index: 4, kind: input, shape index: {}]   ;;  %s1209_s5 = inlined_call_operand.vmem [shape: f32[512,16], index: 5, kind: output, shape index: {}]  }
   0x1 LB: > { %s743_s19 = sadd.s32 4294967295, %s949_s18   ;;  %p747_p0 = scmp.ge.s32.totalorder %s949_s18, 1  ;;  %s949_s18 = sphi %s981_s18, %s15_s18  }
   0x2   : > { %p199_p1 = scmp.lt.s32.totalorder %s949_s18, 3 }
   0x4   : > { %p200_p2 = pnand %p747_p0, %p199_p1 }
   0x5   : > { %s748_s22 = sshll.u32 (!%p200_p2), %s743_s19, 5 }
   0x6   : > { %203 = sbr.rel (%p200_p2) target bundleno = 219 (0xdb), region = 40  ;;  %p233_p3 = scmp.lt.s32.totalorder (!%p200_p2), %s748_s22, 63 }
   0xb   : > { %v435_v0 = vld [vmem:[%s1207_s3] sm:$0x3]  ;;  %vm549_vm0 = vcmask 1041408   ;;  %s1211_s22 = smov (!%p233_p3, %s748_s22), 63  ;;  %vm500_vm1 = vcmask 31744   ;;  %vm642_vm2 = vcmask 130048  }
   0xc   : > { %v551_v1 = vsel %vm549_vm0, %v435_v0, 0  ;;  %s749_s23 = sshll.u32 %s1211_s22, 2  ;;  %v1005_v2 = vld [vmem:[%s1205_s1] ss:$0 sm:$0xff]  ;;  %s753_s9 = sshll.u32 %s1211_s22, 3 }
   0xd   : > { %560 = vmatpush.bf16.msra.mxu0 %v551_v1  ;;  %930 = vmatpush.bf16.msra.mxu1 %v551_v1  ;;  %s1000_s26 = scalar_lea.vmem %s1204_s0, %s749_s23  ;;  %v1013_v8 = vld [vmem:[%s1206_s2] ss:$0 sm:$0xff]  ;;  %s1113_s8 = scalar_lea.vmem %s1208_s4, %s749_s23 }
   0xe   : > { %931 = vmatpush.bf16.msra.mxu2 %v551_v1  ;;  %932 = vmatpush.bf16.msra.mxu3 %v551_v1  ;;  %v773_v3 = vld [vmem:[%s1000_s26] sm:$0xff]   ;;  %v900_v32 = vld [vmem:[%s1000_s26 + $0x8] sm:$0xff]   ;;  %s1121_s12 = scalar_lea.vmem %s1209_s5, %s753_s9 }
   0xf   : > { %v903_v4 = vld [vmem:[%s1000_s26 + $0x20] sm:$0xff]   ;;  %v774_v6 = vunpack.c.l.bf16 %v773_v3  ;;  %v775_v7 = vunpack.c.h.bf16 %v773_v3  ;;  %v904_v37 = vld [vmem:[%s1000_s26 + $0x28] sm:$0xff]   ;;  %v778_v45 = vunpack.c.l.bf16 %v900_v32  ;;  %v779_v46 = vunpack.c.h.bf16 %v900_v32 }
  0x10   : > { %v907_v5 = vld [vmem:[%s1000_s26 + $0x40] sm:$0xff]   ;;  %v790_v9 = vunpack.c.l.bf16 %v903_v4  ;;  %v791_v10 = vunpack.c.h.bf16 %v903_v4  ;;  %v908_v42 = vld [vmem:[%s1000_s26 + $0x48] sm:$0xff]   ;;  %v794_v50 = vunpack.c.l.bf16 %v904_v37  ;;  %v795_v51 = vunpack.c.h.bf16 %v904_v37 }
  0x11   : > { %v911_v11 = vld [vmem:[%s1000_s26 + $0x60] sm:$0xff]   ;;  %v806_v12 = vunpack.c.l.bf16 %v907_v5  ;;  %v807_v13 = vunpack.c.h.bf16 %v907_v5  ;;  %v319_v16 = vmul.f32 %v1005_v2, %v774_v6  ;;  %v320_v17 = vmul.f32 %v1005_v2, %v775_v7  ;;  %v912_v47 = vld [vmem:[%s1000_s26 + $0x68] sm:$0xff]  }
  0x12   : > { %v822_v14 = vunpack.c.l.bf16 %v911_v11  ;;  %v823_v15 = vunpack.c.h.bf16 %v911_v11  ;;  %v327_v18 = vmul.f32 %v1005_v2, %v790_v9  ;;  %v328_v19 = vmul.f32 %v1005_v2, %v791_v10 }
  0x13   : > { %v335_v20 = vmul.f32 %v1005_v2, %v806_v12  ;;  %v336_v21 = vmul.f32 %v1005_v2, %v807_v13  ;;  %v355_v24 = vadd.f32 %v1013_v8, %v319_v16  ;;  %v356_v25 = vadd.f32 %v1013_v8, %v320_v17 }
  0x14   : > { %v343_v22 = vmul.f32 %v1005_v2, %v822_v14  ;;  %v344_v23 = vmul.f32 %v1005_v2, %v823_v15  ;;  %v363_v26 = vadd.f32 %v1013_v8, %v327_v18  ;;  %v364_v27 = vadd.f32 %v1013_v8, %v328_v19  ;;  %v901_v14 = vld [vmem:[%s1000_s26 + $0x10] sm:$0xff]  }
  0x15   : > { %v371_v28 = vadd.f32 %v1013_v8, %v335_v20  ;;  %v372_v29 = vadd.f32 %v1013_v8, %v336_v21  ;;  %v387_v33 = vmax.f32 %v355_v24, 0.0  ;;  %v388_v34 = vmax.f32 %v356_v25, 0.0  ;;  %v905_v15 = vld [vmem:[%s1000_s26 + $0x30] sm:$0xff]  }
  0x16   : > { %v379_v30 = vadd.f32 %v1013_v8, %v343_v22  ;;  %v380_v31 = vadd.f32 %v1013_v8, %v344_v23  ;;  %v395_v35 = vmax.f32 %v363_v26, 0.0  ;;  %v396_v36 = vmax.f32 %v364_v27, 0.0  ;;  %v909_v20 = vld [vmem:[%s1000_s26 + $0x50] sm:$0xff]  }
  0x17   : > { %v403_v38 = vmax.f32 %v371_v28, 0.0  ;;  %v404_v39 = vmax.f32 %v372_v29, 0.0  ;;  %v419_v43 = vpack.c.bf16 %v388_v34, %v387_v33  ;;  %v321_v52 = vmul.f32 %v1005_v2, %v778_v45  ;;  %v913_v21 = vld [vmem:[%s1000_s26 + $0x70] sm:$0xff]  }
  0x18   : > { %v411_v40 = vmax.f32 %v379_v30, 0.0  ;;  %v412_v41 = vmax.f32 %v380_v31, 0.0  ;;  %v423_v44 = vpack.c.bf16 %v396_v36, %v395_v35  ;;  %v322_v53 = vmul.f32 %v1005_v2, %v779_v46 }
  0x19   : > { %v427_v48 = vpack.c.bf16 %v404_v39, %v403_v38  ;;  %754 = vmatmul.msk.bf16.vlgmr.msra.gmra.mxu0 %vm500_vm1, %v419_v43  ;;  %v810_v54 = vunpack.c.l.bf16 %v908_v42  ;;  %v811_v55 = vunpack.c.h.bf16 %v908_v42  ;;  %v329_v56 = vmul.f32 %v1005_v2, %v794_v50 }
  0x1a   : > { %v431_v49 = vpack.c.bf16 %v412_v41, %v411_v40  ;;  %758 = vmatmul.msk.bf16.vlgmr.msra.gmra.mxu1 %vm500_vm1, %v423_v44  ;;  %v330_v57 = vmul.f32 %v1005_v2, %v795_v51  ;;  %v826_v58 = vunpack.c.l.bf16 %v912_v47  ;;  %v827_v59 = vunpack.c.h.bf16 %v912_v47 }
  0x1b   : > { %762 = vmatmul.msk.bf16.vlgmr.msra.gmra.mxu2 %vm500_vm1, %v427_v48  ;;  %v337_v60 = vmul.f32 %v1005_v2, %v810_v54  ;;  %v338_v61 = vmul.f32 %v1005_v2, %v811_v55  ;;  %v357_v0 = vadd.f32 %v1013_v8, %v321_v52  ;;  %v358_v1 = vadd.f32 %v1013_v8, %v322_v53 }
  0x1c   : > { %766 = vmatmul.msk.bf16.vlgmr.msra.gmra.mxu3 %vm500_vm1, %v431_v49  ;;  %v345_v62 = vmul.f32 %v1005_v2, %v826_v58  ;;  %v346_v63 = vmul.f32 %v1005_v2, %v827_v59  ;;  %v365_v3 = vadd.f32 %v1013_v8, %v329_v56  ;;  %v366_v4 = vadd.f32 %v1013_v8, %v330_v57  ;;  %v902_v56 = vld [vmem:[%s1000_s26 + $0x18] sm:$0xff]  }
  0x1d   : > { %v373_v5 = vadd.f32 %v1013_v8, %v337_v60  ;;  %v374_v6 = vadd.f32 %v1013_v8, %v338_v61  ;;  %v389_v10 = vmax.f32 %v357_v0, 0.0  ;;  %v390_v11 = vmax.f32 %v358_v1, 0.0  ;;  %v906_v59 = vld [vmem:[%s1000_s26 + $0x38] sm:$0xff]  }
  0x1e   : > { %v381_v7 = vadd.f32 %v1013_v8, %v345_v62  ;;  %v382_v9 = vadd.f32 %v1013_v8, %v346_v63  ;;  %v397_v12 = vmax.f32 %v365_v3, 0.0  ;;  %v398_v13 = vmax.f32 %v366_v4, 0.0  ;;  %v910_v60 = vld [vmem:[%s1000_s26 + $0x58] sm:$0xff]  }
  0x1f   : > { %v405_v16 = vmax.f32 %v373_v5, 0.0  ;;  %v406_v17 = vmax.f32 %v374_v6, 0.0  ;;  %v782_v22 = vunpack.c.l.bf16 %v901_v14  ;;  %v783_v23 = vunpack.c.h.bf16 %v901_v14  ;;  %v914_v61 = vld [vmem:[%s1000_s26 + $0x78] sm:$0xff]  }
  0x20   : > { %v413_v18 = vmax.f32 %v381_v7, 0.0  ;;  %v414_v19 = vmax.f32 %v382_v9, 0.0  ;;  %v798_v24 = vunpack.c.l.bf16 %v905_v15  ;;  %v799_v25 = vunpack.c.h.bf16 %v905_v15 }
  0x21   : > { %v420_v26 = vpack.c.bf16 %v390_v11, %v389_v10  ;;  %v424_v27 = vpack.c.bf16 %v398_v13, %v397_v12  ;;  %v814_v28 = vunpack.c.l.bf16 %v909_v20  ;;  %v815_v29 = vunpack.c.h.bf16 %v909_v20 }
  0x22   : > { %v428_v30 = vpack.c.bf16 %v406_v17, %v405_v16  ;;  %v432_v31 = vpack.c.bf16 %v414_v19, %v413_v18  ;;  %v830_v32 = vunpack.c.l.bf16 %v913_v21  ;;  %v831_v33 = vunpack.c.h.bf16 %v913_v21 }
  0x23   : > { %v323_v34 = vmul.f32 %v1005_v2, %v782_v22  ;;  %v324_v35 = vmul.f32 %v1005_v2, %v783_v23  ;;  %v331_v36 = vmul.f32 %v1005_v2, %v798_v24  ;;  %v332_v37 = vmul.f32 %v1005_v2, %v799_v25 }
  0x24   : > { %v339_v38 = vmul.f32 %v1005_v2, %v814_v28  ;;  %v340_v39 = vmul.f32 %v1005_v2, %v815_v29  ;;  %v347_v40 = vmul.f32 %v1005_v2, %v830_v32  ;;  %v348_v41 = vmul.f32 %v1005_v2, %v831_v33 }
  0x25   : > { %v359_v42 = vadd.f32 %v1013_v8, %v323_v34  ;;  %v360_v43 = vadd.f32 %v1013_v8, %v324_v35  ;;  %v367_v44 = vadd.f32 %v1013_v8, %v331_v36  ;;  %v368_v45 = vadd.f32 %v1013_v8, %v332_v37 }
  0x26   : > { %v375_v46 = vadd.f32 %v1013_v8, %v339_v38  ;;  %v376_v47 = vadd.f32 %v1013_v8, %v340_v39  ;;  %v383_v48 = vadd.f32 %v1013_v8, %v347_v40  ;;  %v384_v49 = vadd.f32 %v1013_v8, %v348_v41  ;;  %v918_v39 = vld [vmem:[%s1113_s8 + $0x20] sm:$0xff]  }
  0x27   : > { %v391_v50 = vmax.f32 %v359_v42, 0.0  ;;  %v392_v51 = vmax.f32 %v360_v43, 0.0  ;;  %v399_v52 = vmax.f32 %v367_v44, 0.0  ;;  %v400_v53 = vmax.f32 %v368_v45, 0.0 }
  0x28   : > { %v407_v54 = vmax.f32 %v375_v46, 0.0  ;;  %v408_v55 = vmax.f32 %v376_v47, 0.0  ;;  %v415_v57 = vmax.f32 %v383_v48, 0.0  ;;  %v416_v58 = vmax.f32 %v384_v49, 0.0  ;;  %v922_v46 = vld [vmem:[%s1113_s8 + $0x40] sm:$0xff]  }
  0x29   : > { %755 = vmatmul.msk.bf16.gmra.mxu0 %vm500_vm1, %v420_v26  ;;  %v421_v62 = vpack.c.bf16 %v392_v51, %v391_v50  ;;  %v425_v63 = vpack.c.bf16 %v400_v53, %v399_v52  ;;  %v786_v0 = vunpack.c.l.bf16 %v902_v56  ;;  %v787_v1 = vunpack.c.h.bf16 %v902_v56  ;;  %v926_v47 = vld [vmem:[%s1113_s8 + $0x60] sm:$0xff]  }
  0x2a   : > { %759 = vmatmul.msk.bf16.gmra.mxu1 %vm500_vm1, %v424_v27  ;;  %v429_v3 = vpack.c.bf16 %v408_v55, %v407_v54  ;;  %v802_v4 = vunpack.c.l.bf16 %v906_v59  ;;  %v803_v5 = vunpack.c.h.bf16 %v906_v59  ;;  %v818_v6 = vunpack.c.l.bf16 %v910_v60 }
  0x2b   : > { %763 = vmatmul.msk.bf16.gmra.mxu2 %vm500_vm1, %v428_v30  ;;  %v433_v7 = vpack.c.bf16 %v416_v58, %v415_v57  ;;  %v819_v9 = vunpack.c.h.bf16 %v910_v60  ;;  %v834_v10 = vunpack.c.l.bf16 %v914_v61  ;;  %v835_v11 = vunpack.c.h.bf16 %v914_v61  ;;  %v915_v60 = vld [vmem:[%s1113_s8 + $0x8] sm:$0xff]  }
  0x2c   : > { %767 = vmatmul.msk.bf16.gmra.mxu3 %vm500_vm1, %v432_v31  ;;  %v325_v12 = vmul.f32 %v1005_v2, %v786_v0  ;;  %v326_v13 = vmul.f32 %v1005_v2, %v787_v1  ;;  %v333_v14 = vmul.f32 %v1005_v2, %v802_v4  ;;  %v334_v15 = vmul.f32 %v1005_v2, %v803_v5  ;;  %v919_v61 = vld [vmem:[%s1113_s8 + $0x28] sm:$0xff]  }
  0x2d   : > { %v341_v16 = vmul.f32 %v1005_v2, %v818_v6  ;;  %v342_v17 = vmul.f32 %v1005_v2, %v819_v9  ;;  %v349_v18 = vmul.f32 %v1005_v2, %v834_v10  ;;  %v350_v19 = vmul.f32 %v1005_v2, %v835_v11 }
  0x2e   : > { %v361_v20 = vadd.f32 %v1013_v8, %v325_v12  ;;  %v362_v21 = vadd.f32 %v1013_v8, %v326_v13  ;;  %v369_v22 = vadd.f32 %v1013_v8, %v333_v14  ;;  %v370_v23 = vadd.f32 %v1013_v8, %v334_v15  ;;  %v923_v12 = vld [vmem:[%s1113_s8 + $0x48] sm:$0xff]  }
  0x2f   : > { %v377_v24 = vadd.f32 %v1013_v8, %v341_v16  ;;  %v378_v25 = vadd.f32 %v1013_v8, %v342_v17  ;;  %v385_v26 = vadd.f32 %v1013_v8, %v349_v18  ;;  %v386_v27 = vadd.f32 %v1013_v8, %v350_v19  ;;  %v837_v8 = vld [vmem:[%s1113_s8] sm:$0xff]   ;;  %v927_v13 = vld [vmem:[%s1113_s8 + $0x68] sm:$0xff]  }
  0x30   : > { %v393_v28 = vmax.f32 %v361_v20, 0.0  ;;  %v394_v29 = vmax.f32 %v362_v21, 0.0  ;;  %v401_v2 = vmax.f32 %v369_v22, 0.0  ;;  %v402_v30 = vmax.f32 %v370_v23, 0.0 }
  0x31   : > { %v409_v31 = vmax.f32 %v377_v24, 0.0  ;;  %v410_v32 = vmax.f32 %v378_v25, 0.0  ;;  %v417_v33 = vmax.f32 %v385_v26, 0.0  ;;  %v418_v34 = vmax.f32 %v386_v27, 0.0  ;;  %v916_v26 = vld [vmem:[%s1113_s8 + $0x10] sm:$0xff]  }
  0x32   : > { %v422_v35 = vpack.c.bf16 %v394_v29, %v393_v28  ;;  %v426_v36 = vpack.c.bf16 %v402_v30, %v401_v2  ;;  %v838_v40 = vunpack.c.l.bf16 %v837_v8  ;;  %v854_v41 = vunpack.c.l.bf16 %v918_v39  ;;  %v920_v27 = vld [vmem:[%s1113_s8 + $0x30] sm:$0xff]  }
  0x33   : > { %v430_v37 = vpack.c.bf16 %v410_v32, %v409_v31  ;;  %v434_v38 = vpack.c.bf16 %v418_v34, %v417_v33  ;;  %v870_v48 = vunpack.c.l.bf16 %v922_v46  ;;  %v886_v49 = vunpack.c.l.bf16 %v926_v47 }
  0x34   : > { %v839_v50 = vunpack.c.h.bf16 %v837_v8  ;;  %v855_v51 = vunpack.c.h.bf16 %v918_v39  ;;  %v842_v0 = vunpack.c.l.bf16 %v915_v60  ;;  %v858_v1 = vunpack.c.l.bf16 %v919_v61  ;;  %v924_v8 = vld [vmem:[%s1113_s8 + $0x50] sm:$0xff]  }
  0x35   : > { %v874_v14 = vunpack.c.l.bf16 %v923_v12  ;;  %v890_v15 = vunpack.c.l.bf16 %v927_v13  ;;  %v843_v16 = vunpack.c.h.bf16 %v915_v60  ;;  %v859_v17 = vunpack.c.h.bf16 %v919_v61  ;;  %v928_v39 = vld [vmem:[%s1113_s8 + $0x70] sm:$0xff]  }
  0x36   : > { %v875_v28 = vunpack.c.h.bf16 %v923_v12  ;;  %v891_v29 = vunpack.c.h.bf16 %v927_v13  ;;  %v846_v2 = vunpack.c.l.bf16 %v916_v26  ;;  %v862_v30 = vunpack.c.l.bf16 %v920_v27 }
  0x39   : > { %756 = vmatmul.msk.bf16.gmra.mxu0 %vm500_vm1, %v421_v62  ;;  %v871_v62 = vunpack.c.h.bf16 %v922_v46 }
  0x3a   : > { %760 = vmatmul.msk.bf16.gmra.mxu1 %vm500_vm1, %v425_v63  ;;  %v887_v63 = vunpack.c.h.bf16 %v926_v47 }
  0x3b   : > { %764 = vmatmul.msk.bf16.gmra.mxu2 %vm500_vm1, %v429_v3 }
  0x3c   : > { %768 = vmatmul.msk.bf16.gmra.mxu3 %vm500_vm1, %v433_v7 }
  0x49   : > { %757 = vmatmul.msk.bf16.gmra.mxu0 %vm500_vm1, %v422_v35 }
  0x4a   : > { %761 = vmatmul.msk.bf16.gmra.mxu1 %vm500_vm1, %v426_v36 }
  0x4b   : > { %765 = vmatmul.msk.bf16.gmra.mxu2 %vm500_vm1, %v430_v37 }
  0x4c   : > { %769 = vmatmul.msk.bf16.gmra.mxu3 %vm500_vm1, %v434_v38 }
  0x96   : > { %v562_v42 = vpop.f32.mrf.mxu0 }
  0x97   : > { %v582_v43 = vpop.f32.mrf.mxu1  ;;  %v563_v44 = vadd.f32 %v838_v40, %v562_v42  ;;  %v878_v40 = vunpack.c.l.bf16 %v924_v8  ;;  %v847_v42 = vunpack.c.h.bf16 %v916_v26 }
  0x98   : > { %v583_v45 = vadd.f32 %v854_v41, %v582_v43  ;;  %v894_v41 = vunpack.c.l.bf16 %v928_v39  ;;  %v863_v43 = vunpack.c.h.bf16 %v920_v27 }
  0x99   : > { %643 = vst.msk [vmem:[%s1121_s12] sm:$0xff] %vm642_vm2, %v563_v44 }
  0x9a   : > { %651 = vst.msk [vmem:[%s1121_s12 + $0x40] sm:$0xff] %vm642_vm2, %v583_v45 }
  0x9e   : > { %v602_v52 = vpop.f32.mrf.mxu2  ;;  %v564_v56 = vpop.f32.mrf.mxu0 }
  0x9f   : > { %v622_v53 = vpop.f32.mrf.mxu3  ;;  %v603_v54 = vadd.f32 %v870_v48, %v602_v52  ;;  %v584_v57 = vpop.f32.mrf.mxu1  ;;  %v565_v58 = vadd.f32 %v839_v50, %v564_v56  ;;  %v917_v52 = vld [vmem:[%s1113_s8 + $0x18] sm:$0xff]  }
  0xa0   : > { %v623_v55 = vadd.f32 %v886_v49, %v622_v53  ;;  %v585_v59 = vadd.f32 %v855_v51, %v584_v57  ;;  %v921_v53 = vld [vmem:[%s1113_s8 + $0x38] sm:$0xff]   ;;  %v850_v56 = vunpack.c.l.bf16 %v917_v52 }
  0xa1   : > { %659 = vst.msk [vmem:[%s1121_s12 + $0x80] sm:$0xff] %vm642_vm2, %v603_v54  ;;  %v879_v54 = vunpack.c.h.bf16 %v924_v8  ;;  %v866_v57 = vunpack.c.l.bf16 %v921_v53 }
  0xa2   : > { %667 = vst.msk [vmem:[%s1121_s12 + $0xc0] sm:$0xff] %vm642_vm2, %v623_v55  ;;  %v895_v55 = vunpack.c.h.bf16 %v928_v39 }
  0xa3   : > { %644 = vst.msk [vmem:[%s1121_s12 + $0x8] sm:$0xff] %vm642_vm2, %v565_v58 }
  0xa4   : > { %652 = vst.msk [vmem:[%s1121_s12 + $0x48] sm:$0xff] %vm642_vm2, %v585_v59 }
  0xa6   : > { %v604_v3 = vpop.f32.mrf.mxu2  ;;  %v567_v7 = vpop.f32.mrf.mxu0 }
  0xa7   : > { %v624_v4 = vpop.f32.mrf.mxu3  ;;  %v605_v5 = vadd.f32 %v871_v62, %v604_v3  ;;  %v587_v9 = vpop.f32.mrf.mxu1  ;;  %v568_v10 = vadd.f32 %v842_v0, %v567_v7  ;;  %v925_v3 = vld [vmem:[%s1113_s8 + $0x58] sm:$0xff]   ;;  %v851_v7 = vunpack.c.h.bf16 %v917_v52 }
  0xa8   : > { %v625_v6 = vadd.f32 %v887_v63, %v624_v4  ;;  %v588_v11 = vadd.f32 %v858_v1, %v587_v9  ;;  %v929_v4 = vld [vmem:[%s1113_s8 + $0x78] sm:$0xff]   ;;  %v867_v9 = vunpack.c.h.bf16 %v921_v53 }
  0xa9   : > { %660 = vst.msk [vmem:[%s1121_s12 + $0x88] sm:$0xff] %vm642_vm2, %v605_v5  ;;  %v882_v5 = vunpack.c.l.bf16 %v925_v3 }
  0xaa   : > { %668 = vst.msk [vmem:[%s1121_s12 + $0xc8] sm:$0xff] %vm642_vm2, %v625_v6  ;;  %v898_v6 = vunpack.c.l.bf16 %v929_v4 }
  0xab   : > { %645 = vst.msk [vmem:[%s1121_s12 + $0x10] sm:$0xff] %vm642_vm2, %v568_v10 }
  0xac   : > { %653 = vst.msk [vmem:[%s1121_s12 + $0x50] sm:$0xff] %vm642_vm2, %v588_v11 }
  0xae   : > { %v607_v18 = vpop.f32.mrf.mxu2  ;;  %v569_v22 = vpop.f32.mrf.mxu0 }
  0xaf   : > { %v627_v19 = vpop.f32.mrf.mxu3  ;;  %v608_v20 = vadd.f32 %v874_v14, %v607_v18  ;;  %v589_v23 = vpop.f32.mrf.mxu1  ;;  %v570_v24 = vadd.f32 %v843_v16, %v569_v22  ;;  %v883_v18 = vunpack.c.h.bf16 %v925_v3 }
  0xb0   : > { %v628_v21 = vadd.f32 %v890_v15, %v627_v19  ;;  %v590_v25 = vadd.f32 %v859_v17, %v589_v23  ;;  %v899_v19 = vunpack.c.h.bf16 %v929_v4 }
  0xb1   : > { %661 = vst.msk [vmem:[%s1121_s12 + $0x90] sm:$0xff] %vm642_vm2, %v608_v20 }
  0xb2   : > { %669 = vst.msk [vmem:[%s1121_s12 + $0xd0] sm:$0xff] %vm642_vm2, %v628_v21 }
  0xb3   : > { %646 = vst.msk [vmem:[%s1121_s12 + $0x18] sm:$0xff] %vm642_vm2, %v570_v24 }
  0xb4   : > { %654 = vst.msk [vmem:[%s1121_s12 + $0x58] sm:$0xff] %vm642_vm2, %v590_v25 }
  0xb6   : > { %v609_v31 = vpop.f32.mrf.mxu2  ;;  %v572_v35 = vpop.f32.mrf.mxu0 }
  0xb7   : > { %v629_v32 = vpop.f32.mrf.mxu3  ;;  %v610_v33 = vadd.f32 %v875_v28, %v609_v31  ;;  %v592_v36 = vpop.f32.mrf.mxu1  ;;  %v573_v37 = vadd.f32 %v846_v2, %v572_v35 }
  0xb8   : > { %v630_v34 = vadd.f32 %v891_v29, %v629_v32  ;;  %v593_v38 = vadd.f32 %v862_v30, %v592_v36 }
  0xb9   : > { %662 = vst.msk [vmem:[%s1121_s12 + $0x98] sm:$0xff] %vm642_vm2, %v610_v33 }
  0xba   : > { %670 = vst.msk [vmem:[%s1121_s12 + $0xd8] sm:$0xff] %vm642_vm2, %v630_v34 }
  0xbb   : > { %647 = vst.msk [vmem:[%s1121_s12 + $0x20] sm:$0xff] %vm642_vm2, %v573_v37 }
  0xbc   : > { %655 = vst.msk [vmem:[%s1121_s12 + $0x60] sm:$0xff] %vm642_vm2, %v593_v38 }
  0xbe   : > { %v612_v44 = vpop.f32.mrf.mxu2  ;;  %v574_v48 = vpop.f32.mrf.mxu0 }
  0xbf   : > { %v632_v45 = vpop.f32.mrf.mxu3  ;;  %v613_v46 = vadd.f32 %v878_v40, %v612_v44  ;;  %v594_v49 = vpop.f32.mrf.mxu1  ;;  %v575_v50 = vadd.f32 %v847_v42, %v574_v48 }
  0xc0   : > { %v633_v47 = vadd.f32 %v894_v41, %v632_v45  ;;  %v595_v51 = vadd.f32 %v863_v43, %v594_v49 }
  0xc1   : > { %663 = vst.msk [vmem:[%s1121_s12 + $0xa0] sm:$0xff] %vm642_vm2, %v613_v46 }
  0xc2   : > { %671 = vst.msk [vmem:[%s1121_s12 + $0xe0] sm:$0xff] %vm642_vm2, %v633_v47 }
  0xc3   : > { %648 = vst.msk [vmem:[%s1121_s12 + $0x28] sm:$0xff] %vm642_vm2, %v575_v50 }
  0xc4   : > { %656 = vst.msk [vmem:[%s1121_s12 + $0x68] sm:$0xff] %vm642_vm2, %v595_v51 }
  0xc6   : > { %v614_v58 = vpop.f32.mrf.mxu2  ;;  %v577_v62 = vpop.f32.mrf.mxu0 }
  0xc7   : > { %v634_v59 = vpop.f32.mrf.mxu3  ;;  %v615_v60 = vadd.f32 %v879_v54, %v614_v58  ;;  %v597_v63 = vpop.f32.mrf.mxu1  ;;  %v578_v0 = vadd.f32 %v850_v56, %v577_v62 }
  0xc8   : > { %v635_v61 = vadd.f32 %v895_v55, %v634_v59  ;;  %v598_v1 = vadd.f32 %v866_v57, %v597_v63 }
  0xc9   : > { %664 = vst.msk [vmem:[%s1121_s12 + $0xa8] sm:$0xff] %vm642_vm2, %v615_v60 }
  0xca   : > { %672 = vst.msk [vmem:[%s1121_s12 + $0xe8] sm:$0xff] %vm642_vm2, %v635_v61 }
  0xcb   : > { %649 = vst.msk [vmem:[%s1121_s12 + $0x30] sm:$0xff] %vm642_vm2, %v578_v0 }
  0xcc   : > { %657 = vst.msk [vmem:[%s1121_s12 + $0x70] sm:$0xff] %vm642_vm2, %v598_v1 }
  0xce   : > { %v617_v10 = vpop.f32.mrf.mxu2  ;;  %v579_v14 = vpop.f32.mrf.mxu0 }
  0xcf   : > { %v637_v11 = vpop.f32.mrf.mxu3  ;;  %v618_v12 = vadd.f32 %v882_v5, %v617_v10  ;;  %v599_v15 = vpop.f32.mrf.mxu1  ;;  %v580_v16 = vadd.f32 %v851_v7, %v579_v14 }
  0xd0   : > { %v638_v13 = vadd.f32 %v898_v6, %v637_v11  ;;  %v600_v17 = vadd.f32 %v867_v9, %v599_v15 }
  0xd1   : > { %665 = vst.msk [vmem:[%s1121_s12 + $0xb0] sm:$0xff] %vm642_vm2, %v618_v12 }
  0xd2   : > { %673 = vst.msk [vmem:[%s1121_s12 + $0xf0] sm:$0xff] %vm642_vm2, %v638_v13 }
  0xd3   : > { %650 = vst.msk [vmem:[%s1121_s12 + $0x38] sm:$0xff] %vm642_vm2, %v580_v16 }
  0xd4   : > { %658 = vst.msk [vmem:[%s1121_s12 + $0x78] sm:$0xff] %vm642_vm2, %v600_v17 }
  0xd6   : > { %v619_v20 = vpop.f32.mrf.mxu2 }
  0xd7   : > { %v639_v21 = vpop.f32.mrf.mxu3  ;;  %v620_v22 = vadd.f32 %v883_v18, %v619_v20 }
  0xd8   : > { %v640_v23 = vadd.f32 %v899_v19, %v639_v21 }
  0xd9   : > { %666 = vst.msk [vmem:[%s1121_s12 + $0xb8] sm:$0xff] %vm642_vm2, %v620_v22 }
  0xda   : > { %674 = vst.msk [vmem:[%s1121_s12 + $0xf8] sm:$0xff] %vm642_vm2, %v640_v23 }
  0xdb PF: > { %s15_s18 = sadd.s32 1, %s949_s18  }
  0xdc   : > { %p12_p4 = scmp.ge.s32.totalorder %s15_s18, 4  }
  0xde   :  { %14 = sbr.rel (!%p12_p4) target bundleno = 1 (0x1), region = 73 }

// kernel: preact_bottleneck.5
= control target key start
LH: loop header
LB: loop body
LE: loop exit
PB: predicated region body
PF: predicated region fallthrough
CT: control target
= control target key end

     0   :  { %s1184_s21 = smov 0   ;;  %s1790_s0 = inlined_call_operand.vmem [shape: f32[512,4], index: 0, kind: input, shape index: {}]   ;;  %s1791_s1 = inlined_call_operand.vmem [shape: f32[1,4], index: 1, kind: input, shape index: {}]   ;;  %s1792_s2 = inlined_call_operand.vmem [shape: f32[1,4], index: 2, kind: input, shape index: {}]   ;;  %s1793_s3 = inlined_call_operand.vmem [shape: bf16[4,20], index: 3, kind: input, shape index: {}]   ;;  %s1794_s4 = inlined_call_operand.vmem [shape: bf16[512,4], index: 4, kind: output, shape index: {0}]   ;;  %s1795_s5 = inlined_call_operand.vmem [shape: bf16[512,16], index: 5, kind: output, shape index: {1}]   ;;  %s1796_s6 = inlined_call_operand.vmem [shape: f32[2,2,4], index: 6, kind: output, shape index: {2}]  }
   0x1 LB: > { %s1190_s22 = sadd.s32 4294967295, %s1146_s21   ;;  %p1100_p0 = scmp.ge.s32.totalorder %s1146_s21, 1  ;;  %s1146_s21 = sphi %s1184_s21, %s17_s21  }
   0x2   : > { %p218_p1 = scmp.lt.s32.totalorder %s1146_s21, 3 }
   0x4   : > { %p219_p2 = pnand %p1100_p0, %p218_p1 }
   0x5   : > { %s1101_s25 = sshll.u32 (!%p219_p2), %s1190_s22, 5  ;;  %s1148_s14 = smov (!%p219_p2), 124  }
   0x6   : > { %222 = sbr.rel (%p219_p2) target bundleno = 356 (0x164), region = 36  ;;  %p258_p3 = scmp.lt.s32.totalorder (!%p219_p2), %s1101_s25, 63 }
   0x7   : > { %p275_p4 = scmp.lt.s32.totalorder (!%p219_p2), %s1190_s22, 1 }
   0xb   : > { %v432_v0 = vld [vmem:[%s1793_s3] sm:$0x3]  ;;  %vm482_vm0 = vcmask 1041408   ;;  %s1798_s25 = smov (!%p258_p3, %s1101_s25), 63  ;;  %vm433_vm1 = vcmask 31744   ;;  %vm607_vm2 = vcmask 27648  }
   0xc   : > { %v484_v1 = vsel %vm482_vm0, %v432_v0, 0  ;;  %v1203_v2 = vld [vmem:[%s1791_s1] ss:$0 sm:$0xff]  ;;  %s1102_s28 = sshll.u32 %s1798_s25, 3  ;;  %s1104_s10 = sshll.u32 %s1798_s25, 2  ;;  %vm768_vm3 = vcmask 125952  }
   0xd   : > { %493 = vmatpush.bf16.msra.mxu0 %v484_v1  ;;  %1127 = vmatpush.bf16.msra.mxu2 %v484_v1  ;;  %s1209_s7 = scalar_lea.vmem %s1790_s0, %s1102_s28  ;;  %v1214_v3 = vld [vmem:[%s1792_s2] ss:$0 sm:$0xff]  ;;  %s1336_s13 = scalar_lea.vmem %s1794_s4, %s1104_s10  ;;  %vm971_vm4 = vcmask 1040384   ;;  %vm973_vm5 = vcmask 25600  }
   0xe   : > { %1128 = vmatpush.bf16.msra.mxu3 %v484_v1  ;;  %1126 = vmatpush.bf16.msra.mxu1 %v484_v1  ;;  %v280_v4 = vld [vmem:[%s1209_s7] sm:$0xff]  ;;  %v281_v5 = vld [vmem:[%s1209_s7 + $0x8] sm:$0xff]  ;;  %v282_v34 = vld [vmem:[%s1209_s7 + $0x10] sm:$0xff]  ;;  %s1687_s17 = scalar_lea.vmem %s1795_s5, %s1104_s10  ;;  %s1800_s22 = smov (!%p275_p4, %s1190_s22), 1 }
   0xf   : > { %v296_v6 = vld [vmem:[%s1209_s7 + $0x80] sm:$0xff]  ;;  %v316_v7 = vmul.f32 %v1203_v2, %v280_v4  ;;  %v317_v8 = vmul.f32 %v1203_v2, %v281_v5  ;;  %v297_v9 = vld [vmem:[%s1209_s7 + $0x88] sm:$0xff]  ;;  %v283_v35 = vld [vmem:[%s1209_s7 + $0x18] sm:$0xff]  ;;  %v318_v44 = vmul.f32 %v1203_v2, %v282_v34  ;;  %s1107_s18 = sshll.u32 %s1800_s22, 1 }
  0x10   : > { %v332_v10 = vmul.f32 %v1203_v2, %v296_v6  ;;  %v304_v11 = vld [vmem:[%s1209_s7 + $0xc0] sm:$0xff]  ;;  %v305_v12 = vld [vmem:[%s1209_s7 + $0xc8] sm:$0xff]  ;;  %v333_v13 = vmul.f32 %v1203_v2, %v297_v9  ;;  %v306_v38 = vld [vmem:[%s1209_s7 + $0xd0] sm:$0xff]  ;;  %v319_v45 = vmul.f32 %v1203_v2, %v283_v35  ;;  %s278_s23 = scalar_lea.vmem %s1796_s6, %s1107_s18 }
  0x11   : > { %v340_v14 = vmul.f32 %v1203_v2, %v304_v11  ;;  %v341_v15 = vmul.f32 %v1203_v2, %v305_v12  ;;  %v288_v16 = vld [vmem:[%s1209_s7 + $0x40] sm:$0xff]  ;;  %v289_v17 = vld [vmem:[%s1209_s7 + $0x48] sm:$0xff]  ;;  %v352_v18 = vadd.f32 %v1214_v3, %v316_v7  ;;  %v353_v19 = vadd.f32 %v1214_v3, %v317_v8  ;;  %v307_v39 = vld [vmem:[%s1209_s7 + $0xd8] sm:$0xff] }
  0x12   : > { %v368_v20 = vadd.f32 %v1214_v3, %v332_v10  ;;  %v324_v21 = vmul.f32 %v1203_v2, %v288_v16  ;;  %v369_v22 = vadd.f32 %v1214_v3, %v333_v13  ;;  %v325_v25 = vmul.f32 %v1203_v2, %v289_v17  ;;  %v290_v43 = vld [vmem:[%s1209_s7 + $0x50] sm:$0xff]  ;;  %v291_v46 = vld [vmem:[%s1209_s7 + $0x58] sm:$0xff]  ;;  %v284_v13 = vld [vmem:[%s1209_s7 + $0x20] sm:$0xff] }
  0x13   : > { %v376_v23 = vadd.f32 %v1214_v3, %v340_v14  ;;  %v377_v24 = vadd.f32 %v1214_v3, %v341_v15  ;;  %v384_v26 = vmax.f32 %v352_v18, 0.0  ;;  %v385_v27 = vmax.f32 %v353_v19, 0.0  ;;  %v298_v47 = vld [vmem:[%s1209_s7 + $0x90] sm:$0xff]  ;;  %v299_v48 = vld [vmem:[%s1209_s7 + $0x98] sm:$0xff]  ;;  %v285_v14 = vld [vmem:[%s1209_s7 + $0x28] sm:$0xff] }
  0x14   : > { %v400_v28 = vmax.f32 %v368_v20, 0.0  ;;  %v360_v29 = vadd.f32 %v1214_v3, %v324_v21  ;;  %v401_v30 = vmax.f32 %v369_v22, 0.0  ;;  %v361_v33 = vadd.f32 %v1214_v3, %v325_v25  ;;  %v300_v15 = vld [vmem:[%s1209_s7 + $0xa0] sm:$0xff]  ;;  %v301_v16 = vld [vmem:[%s1209_s7 + $0xa8] sm:$0xff] }
  0x15   : > { %v408_v31 = vmax.f32 %v376_v23, 0.0  ;;  %v409_v32 = vmax.f32 %v377_v24, 0.0  ;;  %v416_v36 = vpack.c.bf16 %v385_v27, %v384_v26  ;;  %v342_v50 = vmul.f32 %v1203_v2, %v306_v38  ;;  %v308_v17 = vld [vmem:[%s1209_s7 + $0xe0] sm:$0xff]  ;;  %v309_v18 = vld [vmem:[%s1209_s7 + $0xe8] sm:$0xff] }
  0x16   : > { %v392_v37 = vmax.f32 %v360_v29, 0.0  ;;  %v424_v40 = vpack.c.bf16 %v401_v30, %v400_v28  ;;  %v393_v42 = vmax.f32 %v361_v33, 0.0  ;;  %v343_v51 = vmul.f32 %v1203_v2, %v307_v39  ;;  %v292_v23 = vld [vmem:[%s1209_s7 + $0x60] sm:$0xff]  ;;  %v293_v24 = vld [vmem:[%s1209_s7 + $0x68] sm:$0xff] }
  0x17   : > { %v428_v41 = vpack.c.bf16 %v409_v32, %v408_v31  ;;  %1108 = vmatmul.msk.bf16.vlgmr.msra.gmra.mxu0 %vm433_vm1, %v416_v36  ;;  %v326_v52 = vmul.f32 %v1203_v2, %v290_v43  ;;  %v327_v53 = vmul.f32 %v1203_v2, %v291_v46  ;;  %v334_v54 = vmul.f32 %v1203_v2, %v298_v47 }
  0x18   : > { %1116 = vmatmul.msk.bf16.vlgmr.msra.gmra.mxu2 %vm433_vm1, %v424_v40  ;;  %v420_v49 = vpack.c.bf16 %v393_v42, %v392_v37  ;;  %v335_v55 = vmul.f32 %v1203_v2, %v299_v48  ;;  %v354_v56 = vadd.f32 %v1214_v3, %v318_v44  ;;  %v355_v57 = vadd.f32 %v1214_v3, %v319_v45 }
  0x19   : > { %1120 = vmatmul.msk.bf16.vlgmr.msra.gmra.mxu3 %vm433_vm1, %v428_v41  ;;  %v378_v58 = vadd.f32 %v1214_v3, %v342_v50  ;;  %v379_v59 = vadd.f32 %v1214_v3, %v343_v51  ;;  %v370_v60 = vadd.f32 %v1214_v3, %v334_v54  ;;  %v362_v62 = vadd.f32 %v1214_v3, %v326_v52  ;;  %v287_v50 = vld [vmem:[%s1209_s7 + $0x38] sm:$0xff]  ;;  %v302_v51 = vld [vmem:[%s1209_s7 + $0xb0] sm:$0xff] }
  0x1a   : > { %1112 = vmatmul.msk.bf16.vlgmr.msra.gmra.mxu1 %vm433_vm1, %v420_v49  ;;  %v371_v61 = vadd.f32 %v1214_v3, %v335_v55  ;;  %v363_v63 = vadd.f32 %v1214_v3, %v327_v53  ;;  %v386_v0 = vmax.f32 %v354_v56, 0.0  ;;  %v387_v1 = vmax.f32 %v355_v57, 0.0  ;;  %v286_v49 = vld [vmem:[%s1209_s7 + $0x30] sm:$0xff]  ;;  %v303_v52 = vld [vmem:[%s1209_s7 + $0xb8] sm:$0xff] }
  0x1b   : > { %v410_v4 = vmax.f32 %v378_v58, 0.0  ;;  %v411_v5 = vmax.f32 %v379_v59, 0.0  ;;  %v402_v6 = vmax.f32 %v370_v60, 0.0  ;;  %v394_v8 = vmax.f32 %v362_v62, 0.0  ;;  %v310_v53 = vld [vmem:[%s1209_s7 + $0xf0] sm:$0xff]  ;;  %v311_v54 = vld [vmem:[%s1209_s7 + $0xf8] sm:$0xff] }
  0x1c   : > { %v403_v7 = vmax.f32 %v371_v61, 0.0  ;;  %v395_v9 = vmax.f32 %v363_v63, 0.0  ;;  %v417_v10 = vpack.c.bf16 %v387_v1, %v386_v0  ;;  %v320_v20 = vmul.f32 %v1203_v2, %v284_v13  ;;  %v294_v59 = vld [vmem:[%s1209_s7 + $0x70] sm:$0xff]  ;;  %v295_v60 = vld [vmem:[%s1209_s7 + $0x78] sm:$0xff] }
  0x1d   : > { %v429_v11 = vpack.c.bf16 %v411_v5, %v410_v4  ;;  %v321_v21 = vmul.f32 %v1203_v2, %v285_v14  ;;  %v336_v22 = vmul.f32 %v1203_v2, %v300_v15  ;;  %v337_v25 = vmul.f32 %v1203_v2, %v301_v16 }
  0x1e   : > { %v425_v12 = vpack.c.bf16 %v403_v7, %v402_v6  ;;  %v421_v19 = vpack.c.bf16 %v395_v9, %v394_v8  ;;  %v344_v26 = vmul.f32 %v1203_v2, %v308_v17  ;;  %v345_v27 = vmul.f32 %v1203_v2, %v309_v18 }
  0x1f   : > { %v328_v28 = vmul.f32 %v1203_v2, %v292_v23  ;;  %v329_v29 = vmul.f32 %v1203_v2, %v293_v24  ;;  %v356_v30 = vadd.f32 %v1214_v3, %v320_v20  ;;  %v357_v31 = vadd.f32 %v1214_v3, %v321_v21 }
  0x20   : > { %v372_v32 = vadd.f32 %v1214_v3, %v336_v22  ;;  %v373_v33 = vadd.f32 %v1214_v3, %v337_v25  ;;  %v380_v34 = vadd.f32 %v1214_v3, %v344_v26  ;;  %v381_v35 = vadd.f32 %v1214_v3, %v345_v27 }
  0x21   : > { %v364_v36 = vadd.f32 %v1214_v3, %v328_v28  ;;  %v365_v37 = vadd.f32 %v1214_v3, %v329_v29  ;;  %v388_v38 = vmax.f32 %v356_v30, 0.0  ;;  %v389_v39 = vmax.f32 %v357_v31, 0.0 }
  0x22   : > { %v404_v40 = vmax.f32 %v372_v32, 0.0  ;;  %v405_v41 = vmax.f32 %v373_v33, 0.0  ;;  %v412_v42 = vmax.f32 %v380_v34, 0.0  ;;  %v413_v43 = vmax.f32 %v381_v35, 0.0 }
  0x23   : > { %v396_v44 = vmax.f32 %v364_v36, 0.0  ;;  %v397_v45 = vmax.f32 %v365_v37, 0.0  ;;  %v418_v46 = vpack.c.bf16 %v389_v39, %v388_v38  ;;  %v322_v56 = vmul.f32 %v1203_v2, %v286_v49 }
  0x24   : > { %v426_v47 = vpack.c.bf16 %v405_v41, %v404_v40  ;;  %v430_v48 = vpack.c.bf16 %v413_v43, %v412_v42  ;;  %v323_v57 = vmul.f32 %v1203_v2, %v287_v50  ;;  %v338_v58 = vmul.f32 %v1203_v2, %v302_v51 }
  0x25   : > { %v422_v55 = vpack.c.bf16 %v397_v45, %v396_v44  ;;  %v339_v61 = vmul.f32 %v1203_v2, %v303_v52  ;;  %v346_v62 = vmul.f32 %v1203_v2, %v310_v53  ;;  %v347_v63 = vmul.f32 %v1203_v2, %v311_v54 }
  0x26   : > { %v330_v0 = vmul.f32 %v1203_v2, %v294_v59  ;;  %v331_v1 = vmul.f32 %v1203_v2, %v295_v60  ;;  %v358_v4 = vadd.f32 %v1214_v3, %v322_v56  ;;  %v359_v5 = vadd.f32 %v1214_v3, %v323_v57 }
  0x27   : > { %1109 = vmatmul.msk.bf16.gmra.mxu0 %vm433_vm1, %v417_v10  ;;  %v374_v6 = vadd.f32 %v1214_v3, %v338_v58  ;;  %v375_v7 = vadd.f32 %v1214_v3, %v339_v61  ;;  %v382_v8 = vadd.f32 %v1214_v3, %v346_v62  ;;  %v383_v9 = vadd.f32 %v1214_v3, %v347_v63 }
  0x28   : > { %1117 = vmatmul.msk.bf16.gmra.mxu2 %vm433_vm1, %v425_v12  ;;  %v366_v10 = vadd.f32 %v1214_v3, %v330_v0  ;;  %v390_v12 = vmax.f32 %v358_v4, 0.0  ;;  %v391_v13 = vmax.f32 %v359_v5, 0.0 }
  0x29   : > { %1121 = vmatmul.msk.bf16.gmra.mxu3 %vm433_vm1, %v429_v11  ;;  %v367_v11 = vadd.f32 %v1214_v3, %v331_v1  ;;  %v406_v2 = vmax.f32 %v374_v6, 0.0  ;;  %v407_v14 = vmax.f32 %v375_v7, 0.0  ;;  %v414_v15 = vmax.f32 %v382_v8, 0.0 }
  0x2a   : > { %1113 = vmatmul.msk.bf16.gmra.mxu1 %vm433_vm1, %v421_v19  ;;  %v415_v16 = vmax.f32 %v383_v9, 0.0  ;;  %v398_v17 = vmax.f32 %v366_v10, 0.0  ;;  %v419_v19 = vpack.c.bf16 %v391_v13, %v390_v12 }
  0x2b   : > { %v399_v18 = vmax.f32 %v367_v11, 0.0  ;;  %v427_v20 = vpack.c.bf16 %v407_v14, %v406_v2 }
  0x2c   : > { %v431_v21 = vpack.c.bf16 %v415_v16, %v414_v15 }
  0x2d   : > { %v423_v22 = vpack.c.bf16 %v399_v18, %v398_v17 }
  0x37   : > { %1110 = vmatmul.msk.bf16.gmra.mxu0 %vm433_vm1, %v418_v46 }
  0x38   : > { %1118 = vmatmul.msk.bf16.gmra.mxu2 %vm433_vm1, %v426_v47 }
  0x39   : > { %1122 = vmatmul.msk.bf16.gmra.mxu3 %vm433_vm1, %v430_v48 }
  0x3a   : > { %1114 = vmatmul.msk.bf16.gmra.mxu1 %vm433_vm1, %v422_v55 }
  0x47   : > { %1111 = vmatmul.msk.bf16.gmra.mxu0 %vm433_vm1, %v419_v19 }
  0x48   : > { %1119 = vmatmul.msk.bf16.gmra.mxu2 %vm433_vm1, %v427_v20 }
  0x49   : > { %1123 = vmatmul.msk.bf16.gmra.mxu3 %vm433_vm1, %v431_v21 }
  0x4a   : > { %1115 = vmatmul.msk.bf16.gmra.mxu1 %vm433_vm1, %v423_v22 }
  0x94   : > { %v1329_v3 = vpop.f32.mrf.mxu0 }
  0x95   : > { %v575_v23 = vpack.c.bf16 %v1329_v3, %v1329_v3  ;;  %v870_v1 = vmul.f32 %v1329_v3, %v1329_v3  ;;  %v801_v8 = vsel %vm433_vm1, %v1329_v3, 0.0 }
  0x97   : > { %672 = vrot.lane.b32.xlu0 %v575_v23, %s1148_s14  ;;  %608 = vst.msk [vmem:[%s1336_s13] sm:$0xf] %vm607_vm2, %v575_v23  ;;  %v1343_v24 = vpop.f32.mrf.mxu1  ;;  %v902_v13 = vsel %vm433_vm1, %v870_v1, 0.0 }
  0x98   : > { %v583_v25 = vpack.c.bf16 %v1343_v24, %v1343_v24 }
  0x9a   : > { %688 = vrot.lane.b32.xlu2 %v583_v25, %s1148_s14  ;;  %616 = vst.msk [vmem:[%s1336_s13 + $0x20] sm:$0xf] %vm607_vm2, %v583_v25 }
  0x9b   : > { %v1350_v26 = vpop.f32.mrf.mxu2 }
  0x9c   : > { %v1352_v27 = vpop.f32.mrf.mxu3  ;;  %v1356_v29 = vpop.f32.mrf.mxu0  ;;  %v591_v31 = vpack.c.bf16 %v1350_v26, %v1350_v26 }
  0x9d   : > { %v599_v28 = vpack.c.bf16 %v1352_v27, %v1352_v27  ;;  %v576_v30 = vpack.c.bf16 %v1356_v29, %v1356_v29  ;;  %v871_v63 = vmul.f32 %v1356_v29, %v1356_v29  ;;  %v802_v4 = vsel %vm433_vm1, %v1356_v29, 0.0 }
  0x9e   : > { %704 = vrot.lane.b32.xlu1 %v591_v31, %s1148_s14  ;;  %624 = vst.msk [vmem:[%s1336_s13 + $0x40] sm:$0xf] %vm607_vm2, %v591_v31  ;;  %v803_v12 = vadd.f32 %v802_v4, %v801_v8 }
  0x9f   : > { %632 = vst.msk [vmem:[%s1336_s13 + $0x60] sm:$0xf] %vm607_vm2, %v599_v28  ;;  %720 = vrot.lane.b32.xlu0 %v599_v28, %s1148_s14  ;;  %v1367_v32 = vpop.f32.mrf.mxu1  ;;  %v903_v9 = vsel %vm433_vm1, %v871_v63, 0.0  ;;  %v878_v63 = vmul.f32 %v1343_v24, %v1343_v24 }
  0xa0   : > { %609 = vst.msk [vmem:[%s1336_s13 + $0x4] sm:$0xf] %vm607_vm2, %v576_v30  ;;  %v584_v33 = vpack.c.bf16 %v1367_v32, %v1367_v32  ;;  %v904_v18 = vadd.f32 %v903_v9, %v902_v13 }
  0xa2   : > { %617 = vst.msk [vmem:[%s1336_s13 + $0x24] sm:$0xf] %vm607_vm2, %v584_v33 }
  0xa3   : > { %v1376_v34 = vpop.f32.mrf.mxu2 }
  0xa4   : > { %v1378_v35 = vpop.f32.mrf.mxu3  ;;  %v592_v36 = vpack.c.bf16 %v1376_v34, %v1376_v34  ;;  %v500_v38 = vpop.f32.mrf.mxu0 }
  0xa5   : > { %v600_v37 = vpack.c.bf16 %v1378_v35, %v1378_v35  ;;  %v577_v39 = vpack.c.bf16 %v500_v38, %v500_v38  ;;  %v872_v5 = vmul.f32 %v500_v38, %v500_v38  ;;  %v804_v10 = vsel %vm433_vm1, %v500_v38, 0.0 }
  0xa6   : > { %625 = vst.msk [vmem:[%s1336_s13 + $0x44] sm:$0xf] %vm607_vm2, %v592_v36  ;;  %706 = vrot.lane.b32.xlu2 %v592_v36, %s1148_s14  ;;  %v805_v19 = vadd.f32 %v804_v10, %v803_v12  ;;  %v816_v10 = vsel %vm433_vm1, %v1343_v24, 0.0  ;;  %v917_v24 = vsel %vm433_vm1, %v878_v63, 0.0 }
  0xa7   : > { %633 = vst.msk [vmem:[%s1336_s13 + $0x64] sm:$0xf] %vm607_vm2, %v600_v37  ;;  %674 = vrot.lane.b32.xlu0 %v576_v30, %s1148_s14  ;;  %v1390_v40 = vpop.f32.mrf.mxu1  ;;  %722 = vrot.lane.b32.xlu1 %v600_v37, %s1148_s14  ;;  %v905_v2 = vsel %vm433_vm1, %v872_v5, 0.0 }
  0xa8   : > { %610 = vst.msk [vmem:[%s1336_s13 + $0x8] sm:$0xf] %vm607_vm2, %v577_v39  ;;  %v585_v41 = vpack.c.bf16 %v1390_v40, %v1390_v40  ;;  %v906_v29 = vadd.f32 %v905_v2, %v904_v18  ;;  %v880_v18 = vmul.f32 %v1390_v40, %v1390_v40 }
  0xaa   : > { %618 = vst.msk [vmem:[%s1336_s13 + $0x28] sm:$0xf] %vm607_vm2, %v585_v41 }
  0xab   : > { %v1401_v43 = vpop.f32.mrf.mxu2 }
  0xac   : > { %v1399_v42 = vpop.f32.mrf.mxu3  ;;  %v502_v45 = vpop.f32.mrf.mxu0  ;;  %v593_v47 = vpack.c.bf16 %v1401_v43, %v1401_v43 }
  0xad   : > { %v601_v44 = vpack.c.bf16 %v1399_v42, %v1399_v42  ;;  %v578_v46 = vpack.c.bf16 %v502_v45, %v502_v45  ;;  %v873_v11 = vmul.f32 %v502_v45, %v502_v45  ;;  %v806_v14 = vsel %vm433_vm1, %v502_v45, 0.0 }
  0xae   : > { %626 = vst.msk [vmem:[%s1336_s13 + $0x48] sm:$0xf] %vm607_vm2, %v593_v47  ;;  %v807_v30 = vadd.f32 %v806_v14, %v805_v19 }
  0xaf   : > { %634 = vst.msk [vmem:[%s1336_s13 + $0x68] sm:$0xf] %vm607_vm2, %v601_v44  ;;  %724 = vrot.lane.b32.xlu2 %v601_v44, %s1148_s14  ;;  %690 = vrot.lane.b32.xlu0 %v584_v33, %s1148_s14  ;;  %v1413_v48 = vpop.f32.mrf.mxu1  ;;  %v907_v3 = vsel %vm433_vm1, %v873_v11, 0.0  ;;  %v879_v11 = vmul.f32 %v1367_v32, %v1367_v32 }
  0xb0   : > { %611 = vst.msk [vmem:[%s1336_s13 + $0xc] sm:$0xf] %vm607_vm2, %v578_v46  ;;  %676 = vrot.lane.b32.xlu1 %v577_v39, %s1148_s14  ;;  %v586_v49 = vpack.c.bf16 %v1413_v48, %v1413_v48  ;;  %v908_v38 = vadd.f32 %v907_v3, %v906_v29  ;;  %v881_v3 = vmul.f32 %v1413_v48, %v1413_v48 }
  0xb2   : > { %619 = vst.msk [vmem:[%s1336_s13 + $0x2c] sm:$0xf] %vm607_vm2, %v586_v49 }
  0xb3   : > { %v1422_v50 = vpop.f32.mrf.mxu2 }
  0xb4   : > { %v1424_v51 = vpop.f32.mrf.mxu3  ;;  %v505_v52 = vpop.f32.mrf.mxu0  ;;  %v1428_v53 = vpack.c.bf16 %v1422_v50, %v1422_v50 }
  0xb5   : > { %v602_v54 = vpack.c.bf16 %v1424_v51, %v1424_v51  ;;  %v579_v55 = vpack.c.bf16 %v505_v52, %v505_v52  ;;  %v874_v15 = vmul.f32 %v505_v52, %v505_v52  ;;  %v808_v23 = vsel %vm433_vm1, %v505_v52, 0.0 }
  0xb6   : > { %627 = vst.msk [vmem:[%s1336_s13 + $0x4c] sm:$0xf] %vm607_vm2, %v1428_v53  ;;  %v809_v39 = vadd.f32 %v808_v23, %v807_v30 }
  0xb7   : > { %694 = vrot.lane.b32.xlu2 %v586_v49, %s1148_s14  ;;  %612 = vst.msk [vmem:[%s1336_s13 + $0x10] sm:$0xf] %vm607_vm2, %v579_v55  ;;  %708 = vrot.lane.b32.xlu0 %v593_v47, %s1148_s14  ;;  %v1439_v56 = vpop.f32.mrf.mxu1  ;;  %v909_v31 = vsel %vm433_vm1, %v874_v15, 0.0  ;;  %v818_v15 = vsel %vm433_vm1, %v1367_v32, 0.0 }
  0xb8   : > { %692 = vrot.lane.b32.xlu1 %v585_v41, %s1148_s14  ;;  %635 = vst.msk [vmem:[%s1336_s13 + $0x6c] sm:$0xf] %vm607_vm2, %v602_v54  ;;  %v587_v57 = vpack.c.bf16 %v1439_v56, %v1439_v56 }
  0xba   : > { %620 = vst.msk [vmem:[%s1336_s13 + $0x30] sm:$0xf] %vm607_vm2, %v587_v57 }
  0xbb   : > { %v1448_v58 = vpop.f32.mrf.mxu2 }
  0xbc   : > { %v1450_v59 = vpop.f32.mrf.mxu3  ;;  %v507_v60 = vpop.f32.mrf.mxu0  ;;  %v595_v61 = vpack.c.bf16 %v1448_v58, %v1448_v58 }
  0xbd   : > { %v1456_v62 = vpack.c.bf16 %v1450_v59, %v1450_v59  ;;  %v1460_v0 = vpack.c.bf16 %v507_v60, %v507_v60  ;;  %v875_v25 = vmul.f32 %v507_v60, %v507_v60  ;;  %v810_v33 = vsel %vm433_vm1, %v507_v60, 0.0 }
  0xbe   : > { %628 = vst.msk [vmem:[%s1336_s13 + $0x50] sm:$0xf] %vm607_vm2, %v595_v61  ;;  %v811_v47 = vadd.f32 %v810_v33, %v809_v39  ;;  %v822_v33 = vsel %vm433_vm1, %v1413_v48, 0.0 }
  0xbf   : > { %680 = vrot.lane.b32.xlu2 %v579_v55, %s1148_s14  ;;  %613 = vst.msk [vmem:[%s1336_s13 + $0x14] sm:$0xf] %vm607_vm2, %v1460_v0  ;;  %726 = vrot.lane.b32.xlu0 %v602_v54, %s1148_s14  ;;  %v1473_v6 = vpop.f32.mrf.mxu1  ;;  %v911_v44 = vsel %vm433_vm1, %v875_v25, 0.0 }
  0xc0   : > { %678 = vrot.lane.b32.xlu1 %v578_v46, %s1148_s14  ;;  %636 = vst.msk [vmem:[%s1336_s13 + $0x70] sm:$0xf] %vm607_vm2, %v1456_v62  ;;  %v1481_v7 = vpack.c.bf16 %v1473_v6, %v1473_v6  ;;  %v910_v46 = vadd.f32 %v909_v31, %v908_v38  ;;  %v921_v31 = vsel %vm433_vm1, %v880_v18, 0.0  ;;  %v883_v48 = vmul.f32 %v1473_v6, %v1473_v6 }
  0xc2   : > { %621 = vst.msk [vmem:[%s1336_s13 + $0x34] sm:$0xf] %vm607_vm2, %v1481_v7  ;;  %v912_v54 = vadd.f32 %v911_v44, %v910_v46  ;;  %v923_v44 = vsel %vm433_vm1, %v881_v3, 0.0  ;;  %v890_v3 = vmul.f32 %v1448_v58, %v1448_v58 }
  0xc3   : > { %v1493_v16 = vpop.f32.mrf.mxu2 }
  0xc4   : > { %v1495_v17 = vpop.f32.mrf.mxu3  ;;  %v510_v20 = vpop.f32.mrf.mxu0  ;;  %v596_v21 = vpack.c.bf16 %v1493_v16, %v1493_v16 }
  0xc5   : > { %v1501_v22 = vpack.c.bf16 %v1495_v17, %v1495_v17  ;;  %v1505_v28 = vpack.c.bf16 %v510_v20, %v510_v20  ;;  %v876_v36 = vmul.f32 %v510_v20, %v510_v20  ;;  %v812_v45 = vsel %vm433_vm1, %v510_v20, 0.0 }
  0xc6   : > { %629 = vst.msk [vmem:[%s1336_s13 + $0x54] sm:$0xf] %vm607_vm2, %v596_v21  ;;  %v813_v55 = vadd.f32 %v812_v45, %v811_v47  ;;  %v824_v45 = vsel %vm433_vm1, %v1439_v56, 0.0 }
  0xc7   : > { %712 = vrot.lane.b32.xlu2 %v595_v61, %s1148_s14  ;;  %614 = vst.msk [vmem:[%s1336_s13 + $0x18] sm:$0xf] %vm607_vm2, %v1505_v28  ;;  %696 = vrot.lane.b32.xlu0 %v587_v57, %s1148_s14  ;;  %v1516_v37 = vpop.f32.mrf.mxu1  ;;  %v913_v49 = vsel %vm433_vm1, %v876_v36, 0.0 }
  0xc8   : > { %710 = vrot.lane.b32.xlu1 %v1428_v53, %s1148_s14  ;;  %637 = vst.msk [vmem:[%s1336_s13 + $0x74] sm:$0xf] %vm607_vm2, %v1501_v22  ;;  %v589_v41 = vpack.c.bf16 %v1516_v37, %v1516_v37  ;;  %v914_v8 = vadd.f32 %v913_v49, %v912_v54  ;;  %v884_v46 = vmul.f32 %v1516_v37, %v1516_v37  ;;  %v828_v54 = vsel %vm433_vm1, %v1516_v37, 0.0 }
  0xc9   : > { %v887_v37 = vmul.f32 %v1376_v34, %v1376_v34 }
  0xca   : > { %622 = vst.msk [vmem:[%s1336_s13 + $0x38] sm:$0xf] %vm607_vm2, %v589_v41  ;;  %v929_v63 = vsel %vm433_vm1, %v884_v46, 0.0  ;;  %v894_v46 = vmul.f32 %v1352_v27, %v1352_v27 }
  0xcb   : > { %v1530_v52 = vpop.f32.mrf.mxu2 }
  0xcc   : > { %v1532_v53 = vpop.f32.mrf.mxu3  ;;  %v512_v57 = vpop.f32.mrf.mxu0  ;;  %v1536_v60 = vpack.c.bf16 %v1530_v52, %v1530_v52 }
  0xcd   : > { %v1540_v61 = vpack.c.bf16 %v1532_v53, %v1532_v53  ;;  %v1544_v1 = vpack.c.bf16 %v512_v57, %v512_v57  ;;  %v814_v4 = vsel %vm433_vm1, %v512_v57, 0.0  ;;  %v877_v5 = vmul.f32 %v512_v57, %v512_v57 }
  0xce   : > { %v815_v9 = vadd.f32 %v814_v4, %v813_v55  ;;  %630 = vst.msk [vmem:[%s1336_s13 + $0x58] sm:$0xf] %vm607_vm2, %v1536_v60 }
  0xcf   : > { %682 = vrot.lane.b32.xlu2 %v1460_v0, %s1148_s14  ;;  %615 = vst.msk [vmem:[%s1336_s13 + $0x1c] sm:$0xf] %vm607_vm2, %v1544_v1  ;;  %v915_v12 = vsel %vm433_vm1, %v877_v5, 0.0  ;;  %714 = vrot.lane.b32.xlu0 %v596_v21, %s1148_s14  ;;  %v532_v13 = vpop.f32.mrf.mxu1  ;;  %v919_v21 = vsel %vm433_vm1, %v879_v11, 0.0 }
  0xd0   : > { %v817_v2 = vadd.f32 %v816_v10, %v815_v9  ;;  %v916_v0 = vadd.f32 %v915_v12, %v914_v8  ;;  %728 = vrot.lane.b32.xlu1 %v1456_v62, %s1148_s14  ;;  %v590_v14 = vpack.c.bf16 %v532_v13, %v532_v13  ;;  %638 = vst.msk [vmem:[%s1336_s13 + $0x78] sm:$0xf] %vm607_vm2, %v1540_v61  ;;  %v820_v62 = vsel %vm433_vm1, %v1390_v40, 0.0 }
  0xd1   : > { %v882_v40 = vmul.f32 %v1439_v56, %v1439_v56  ;;  %v826_v56 = vsel %vm433_vm1, %v1473_v6, 0.0  ;;  %v885_v4 = vmul.f32 %v532_v13, %v532_v13  ;;  %v830_v9 = vsel %vm433_vm1, %v532_v13, 0.0 }
  0xd2   : > { %v819_v19 = vadd.f32 %v818_v15, %v817_v2  ;;  %v918_v20 = vadd.f32 %v917_v24, %v916_v0  ;;  %623 = vst.msk [vmem:[%s1336_s13 + $0x3c] sm:$0xf] %vm607_vm2, %v590_v14  ;;  %v832_v6 = vsel %vm433_vm1, %v1350_v26, 0.0  ;;  %v834_v24 = vsel %vm433_vm1, %v1376_v34, 0.0 }
  0xd3   : > { %v1578_v23 = vpop.f32.mrf.mxu2  ;;  %v925_v49 = vsel %vm433_vm1, %v882_v40, 0.0  ;;  %v931_v12 = vsel %vm433_vm1, %v885_v4, 0.0  ;;  %v838_v34 = vsel %vm433_vm1, %v1422_v50, 0.0  ;;  %v941_v40 = vsel %vm433_vm1, %v890_v3, 0.0 }
  0xd4   : > { %v1580_v25 = vpop.f32.mrf.mxu3  ;;  %v821_v32 = vadd.f32 %v820_v62, %v819_v19  ;;  %v920_v29 = vadd.f32 %v919_v21, %v918_v20  ;;  %v598_v30 = vpack.c.bf16 %v1578_v23, %v1578_v23  ;;  %v935_v19 = vsel %vm433_vm1, %v887_v37, 0.0 }
  0xd5   : > { %v1591_v36 = vpack.c.bf16 %v1580_v25, %v1580_v25  ;;  %v889_v20 = vmul.f32 %v1422_v50, %v1422_v50 }
  0xd6   : > { %v922_v38 = vadd.f32 %v921_v31, %v920_v29  ;;  %v823_v39 = vadd.f32 %v822_v33, %v821_v32  ;;  %631 = vst.msk [vmem:[%s1336_s13 + $0x5c] sm:$0xf] %vm607_vm2, %v598_v30  ;;  %v891_v31 = vmul.f32 %v1493_v16, %v1493_v16 }
  0xd7   : > { %700 = vrot.lane.b32.xlu2 %v589_v41, %s1148_s14  ;;  %684 = vrot.lane.b32.xlu0 %v1505_v28, %s1148_s14  ;;  %639 = vst.msk [vmem:[%s1336_s13 + $0x7c] sm:$0xf] %vm607_vm2, %v1591_v36  ;;  %v927_v28 = vsel %vm433_vm1, %v883_v48, 0.0 }
  0xd8   : > { %v825_v41 = vadd.f32 %v824_v45, %v823_v39  ;;  %v924_v47 = vadd.f32 %v923_v44, %v922_v38  ;;  %698 = vrot.lane.b32.xlu1 %v1481_v7, %s1148_s14  ;;  %v886_v7 = vmul.f32 %v1350_v26, %v1350_v26  ;;  %v888_v26 = vmul.f32 %v1401_v43, %v1401_v43 }
  0xd9   : > { %v892_v38 = vmul.f32 %v1530_v52, %v1530_v52  ;;  %v943_v44 = vsel %vm433_vm1, %v891_v31, 0.0  ;;  %v893_v45 = vmul.f32 %v1578_v23, %v1578_v23 }
  0xda   : > { %v827_v55 = vadd.f32 %v826_v56, %v825_v41  ;;  %v926_v57 = vadd.f32 %v925_v49, %v924_v47  ;;  %v933_v13 = vsel %vm433_vm1, %v886_v7, 0.0  ;;  %v937_v62 = vsel %vm433_vm1, %v888_v26, 0.0 }
  0xdb   : > { %v846_v41 = vsel %vm433_vm1, %v1578_v23, 0.0  ;;  %v848_v56 = vsel %vm433_vm1, %v1352_v27, 0.0  ;;  %v850_v23 = vsel %vm433_vm1, %v1378_v35, 0.0 }
  0xdc   : > { %v829_v5 = vadd.f32 %v828_v54, %v827_v55  ;;  %v928_v8 = vadd.f32 %v927_v28, %v926_v57  ;;  %v947_v54 = vsel %vm433_vm1, %v893_v45, 0.0  ;;  %v949_v28 = vsel %vm433_vm1, %v894_v46, 0.0 }
  0xde   : > { %v930_v10 = vadd.f32 %v929_v63, %v928_v8  ;;  %v831_v11 = vadd.f32 %v830_v9, %v829_v5  ;;  %v896_v63 = vmul.f32 %v1399_v42, %v1399_v42  ;;  %v852_v5 = vsel %vm433_vm1, %v1399_v42, 0.0 }
  0xdf   : > { %718 = vrot.lane.b32.xlu2 %v598_v30, %s1148_s14  ;;  %702 = vrot.lane.b32.xlu0 %v590_v14, %s1148_s14  ;;  %v836_v14 = vsel %vm433_vm1, %v1401_v43, 0.0  ;;  %v939_v43 = vsel %vm433_vm1, %v889_v20, 0.0  ;;  %v840_v30 = vsel %vm433_vm1, %v1448_v58, 0.0  ;;  %v901_v20 = vmul.f32 %v1580_v25, %v1580_v25 }
  0xe0   : > { %v833_v2 = vadd.f32 %v832_v6, %v831_v11  ;;  %v932_v0 = vadd.f32 %v931_v12, %v930_v10  ;;  %716 = vrot.lane.b32.xlu1 %v1536_v60, %s1148_s14  ;;  %v953_v10 = vsel %vm433_vm1, %v896_v63, 0.0  ;;  %v854_v11 = vsel %vm433_vm1, %v1424_v51, 0.0 }
  0xe1   : > { %v898_v6 = vmul.f32 %v1450_v59, %v1450_v59 }
  0xe2   : > { %v835_v15 = vadd.f32 %v834_v24, %v833_v2  ;;  %v934_v18 = vadd.f32 %v933_v13, %v932_v0  ;;  %v856_v2 = vsel %vm433_vm1, %v1450_v59, 0.0  ;;  %v899_v0 = vmul.f32 %v1495_v17, %v1495_v17 }
  0xe3   : > { %v957_v26 = vsel %vm433_vm1, %v898_v6, 0.0  ;;  %v860_v59 = vsel %vm433_vm1, %v1532_v53, 0.0 }
  0xe4   : > { %v837_v21 = vadd.f32 %v836_v14, %v835_v15  ;;  %v936_v60 = vadd.f32 %v935_v19, %v934_v18  ;;  %v900_v15 = vmul.f32 %v1532_v53, %v1532_v53  ;;  %v959_v14 = vsel %vm433_vm1, %v899_v0, 0.0 }
  0xe6   : > { %v938_v32 = vadd.f32 %v937_v62, %v936_v60  ;;  %v839_v29 = vadd.f32 %v838_v34, %v837_v21  ;;  %v862_v62 = vsel %vm433_vm1, %v1580_v25, 0.0 }
  0xe7   : > { %730 = vrot.lane.b32.xlu2 %v1501_v22, %s1148_s14  ;;  %732 = vrot.lane.b32.xlu0 %v1540_v61, %s1148_s14  ;;  %v842_v22 = vsel %vm433_vm1, %v1493_v16, 0.0  ;;  %v844_v61 = vsel %vm433_vm1, %v1530_v52, 0.0  ;;  %v945_v16 = vsel %vm433_vm1, %v892_v38, 0.0  ;;  %v895_v52 = vmul.f32 %v1378_v35, %v1378_v35 }
  0xe8   : > { %v841_v50 = vadd.f32 %v840_v30, %v839_v29  ;;  %v940_v33 = vadd.f32 %v939_v43, %v938_v32  ;;  %686 = vrot.lane.b32.xlu1 %v1544_v1, %s1148_s14  ;;  %v897_v35 = vmul.f32 %v1424_v51, %v1424_v51  ;;  %v858_v51 = vsel %vm433_vm1, %v1495_v17, 0.0 }
  0xe9   : > { %v961_v17 = vsel %vm433_vm1, %v900_v15, 0.0  ;;  %v963_v32 = vsel %vm433_vm1, %v901_v20, 0.0 }
  0xea   : > { %v843_v58 = vadd.f32 %v842_v22, %v841_v50  ;;  %v942_v39 = vadd.f32 %v941_v40, %v940_v33  ;;  %v955_v42 = vsel %vm433_vm1, %v897_v35, 0.0 }
  0xec   : > { %v845_v48 = vadd.f32 %v844_v61, %v843_v58  ;;  %v944_v1 = vadd.f32 %v943_v44, %v942_v39 }
  0xee   : > { %v847_v47 = vadd.f32 %v846_v41, %v845_v48  ;;  %v946_v49 = vadd.f32 %v945_v16, %v944_v1 }
  0xf0   : > { %v849_v55 = vadd.f32 %v848_v56, %v847_v47  ;;  %v948_v57 = vadd.f32 %v947_v54, %v946_v49  ;;  %734 = vrot.lane.b32.xlu1 %v1591_v36, %s1148_s14  ;;  %v951_v36 = vsel %vm433_vm1, %v895_v52, 0.0 }
  0xf2   : > { %v851_v4 = vadd.f32 %v850_v23, %v849_v55  ;;  %v950_v27 = vadd.f32 %v949_v28, %v948_v57 }
  0xf4   : > { %v853_v8 = vadd.f32 %v852_v5, %v851_v4  ;;  %v952_v7 = vadd.f32 %v951_v36, %v950_v27  ;;  %v689_v9 = vpop.permute.xlu2 %688 }
  0xf5   : > { %777 = vst.msk [vmem:[%s1687_s17 + $0x20] sm:$0xf] %vm768_vm3, %v689_v9 }
  0xf6   : > { %v954_v37 = vadd.f32 %v953_v10, %v952_v7  ;;  %v855_v12 = vadd.f32 %v854_v11, %v853_v8 }
  0xf8   : > { %v857_v13 = vadd.f32 %v856_v2, %v855_v12  ;;  %v956_v24 = vadd.f32 %v955_v42, %v954_v37 }
  0xfa   : > { %v859_v18 = vadd.f32 %v858_v51, %v857_v13  ;;  %v958_v19 = vadd.f32 %v957_v26, %v956_v24 }
  0xfc   : > { %v861_v21 = vadd.f32 %v860_v59, %v859_v18  ;;  %v960_v60 = vadd.f32 %v959_v14, %v958_v19 }
  0xfe   : > { %v962_v34 = vadd.f32 %v961_v17, %v960_v60  ;;  %v863_v3 = vadd.f32 %v862_v62, %v861_v21 }
 0x100   : > { %v864_v29 = vrot.slane %v863_v3, 4  ;;  %v964_v43 = vadd.f32 %v963_v32, %v962_v34  ;;  %v707_v30 = vpop.permute.xlu2 %706 }
 0x101   : > { %786 = vst.msk [vmem:[%s1687_s17 + $0x44] sm:$0xf] %vm768_vm3, %v707_v30 }
 0x102   : > { %v865_v53 = vadd.f32 %v864_v29, %v863_v3  ;;  %v965_v31 = vrot.slane %v964_v43, 4 }
 0x104   : > { %v866_v50 = vrot.slane %v865_v53, 2  ;;  %v966_v33 = vadd.f32 %v965_v31, %v964_v43 }
 0x106   : > { %v867_v40 = vadd.f32 %v866_v50, %v865_v53  ;;  %v967_v22 = vrot.slane %v966_v33, 2 }
 0x108   : > { %v868_v25 = vrot.slane %v867_v40, 1  ;;  %v968_v38 = vadd.f32 %v967_v22, %v966_v33 }
 0x109   : > { %v725_v58 = vpop.permute.xlu2 %724  ;;  %v673_v39 = vpop.permute.xlu0 %672 }
 0x10a   : > { %795 = vst.msk [vmem:[%s1687_s17 + $0x68] sm:$0xf] %vm768_vm3, %v725_v58  ;;  %v969_v44 = vrot.slane %v968_v38, 1  ;;  %v869_v61 = vadd.f32 %v868_v25, %v867_v40 }
 0x10b   : > { %769 = vst.msk [vmem:[%s1687_s17] sm:$0xf] %vm768_vm3, %v673_v39 }
 0x10c   : > { %v970_v45 = vadd.f32 %v969_v44, %v968_v38 }
 0x10e   : > { %v972_v48 = vsel %vm971_vm4, %v869_v61, %v970_v45 }
 0x10f   : > { %974 = vst.msk [vmem:[%s278_s23] sm:$0x3] %vm973_vm5, %v972_v48 }
 0x110   : > { %v705_v16 = vpop.permute.xlu1 %704 }
 0x111   : > { %v695_v1 = vpop.permute.xlu2 %694  ;;  %v721_v46 = vpop.permute.xlu0 %720  ;;  %785 = vst.msk [vmem:[%s1687_s17 + $0x40] sm:$0xf] %vm768_vm3, %v705_v16 }
 0x112   : > { %780 = vst.msk [vmem:[%s1687_s17 + $0x2c] sm:$0xf] %vm768_vm3, %v695_v1 }
 0x113   : > { %793 = vst.msk [vmem:[%s1687_s17 + $0x60] sm:$0xf] %vm768_vm3, %v721_v46 }
 0x119   : > { %v681_v41 = vpop.permute.xlu2 %680  ;;  %v675_v47 = vpop.permute.xlu0 %674 }
 0x11a   : > { %773 = vst.msk [vmem:[%s1687_s17 + $0x10] sm:$0xf] %vm768_vm3, %v681_v41  ;;  %v723_v49 = vpop.permute.xlu1 %722 }
 0x11b   : > { %770 = vst.msk [vmem:[%s1687_s17 + $0x4] sm:$0xf] %vm768_vm3, %v675_v47 }
 0x11c   : > { %794 = vst.msk [vmem:[%s1687_s17 + $0x64] sm:$0xf] %vm768_vm3, %v723_v49 }
 0x121   : > { %v713_v56 = vpop.permute.xlu2 %712  ;;  %v691_v52 = vpop.permute.xlu0 %690 }
 0x122   : > { %789 = vst.msk [vmem:[%s1687_s17 + $0x50] sm:$0xf] %vm768_vm3, %v713_v56  ;;  %v677_v54 = vpop.permute.xlu1 %676 }
 0x123   : > { %778 = vst.msk [vmem:[%s1687_s17 + $0x24] sm:$0xf] %vm768_vm3, %v691_v52 }
 0x124   : > { %771 = vst.msk [vmem:[%s1687_s17 + $0x8] sm:$0xf] %vm768_vm3, %v677_v54 }
 0x129   : > { %v683_v55 = vpop.permute.xlu2 %682  ;;  %v709_v57 = vpop.permute.xlu0 %708 }
 0x12a   : > { %774 = vst.msk [vmem:[%s1687_s17 + $0x14] sm:$0xf] %vm768_vm3, %v683_v55  ;;  %v693_v28 = vpop.permute.xlu1 %692 }
 0x12b   : > { %787 = vst.msk [vmem:[%s1687_s17 + $0x48] sm:$0xf] %vm768_vm3, %v709_v57 }
 0x12c   : > { %779 = vst.msk [vmem:[%s1687_s17 + $0x28] sm:$0xf] %vm768_vm3, %v693_v28 }
 0x131   : > { %v701_v23 = vpop.permute.xlu2 %700  ;;  %v727_v63 = vpop.permute.xlu0 %726 }
 0x132   : > { %783 = vst.msk [vmem:[%s1687_s17 + $0x38] sm:$0xf] %vm768_vm3, %v701_v23  ;;  %v679_v4 = vpop.permute.xlu1 %678 }
 0x133   : > { %796 = vst.msk [vmem:[%s1687_s17 + $0x6c] sm:$0xf] %vm768_vm3, %v727_v63 }
 0x134   : > { %772 = vst.msk [vmem:[%s1687_s17 + $0xc] sm:$0xf] %vm768_vm3, %v679_v4 }
 0x139   : > { %v719_v27 = vpop.permute.xlu2 %718  ;;  %v697_v36 = vpop.permute.xlu0 %696 }
 0x13a   : > { %792 = vst.msk [vmem:[%s1687_s17 + $0x5c] sm:$0xf] %vm768_vm3, %v719_v27  ;;  %v711_v5 = vpop.permute.xlu1 %710 }
 0x13b   : > { %781 = vst.msk [vmem:[%s1687_s17 + $0x30] sm:$0xf] %vm768_vm3, %v697_v36 }
 0x13c   : > { %788 = vst.msk [vmem:[%s1687_s17 + $0x4c] sm:$0xf] %vm768_vm3, %v711_v5 }
 0x141   : > { %v731_v35 = vpop.permute.xlu2 %730  ;;  %v715_v8 = vpop.permute.xlu0 %714 }
 0x142   : > { %798 = vst.msk [vmem:[%s1687_s17 + $0x74] sm:$0xf] %vm768_vm3, %v731_v35  ;;  %v729_v7 = vpop.permute.xlu1 %728 }
 0x143   : > { %790 = vst.msk [vmem:[%s1687_s17 + $0x54] sm:$0xf] %vm768_vm3, %v715_v8 }
 0x144   : > { %797 = vst.msk [vmem:[%s1687_s17 + $0x70] sm:$0xf] %vm768_vm3, %v729_v7 }
 0x149   : > { %v685_v9 = vpop.permute.xlu0 %684 }
 0x14a   : > { %v699_v10 = vpop.permute.xlu1 %698  ;;  %775 = vst.msk [vmem:[%s1687_s17 + $0x18] sm:$0xf] %vm768_vm3, %v685_v9 }
 0x14b   : > { %782 = vst.msk [vmem:[%s1687_s17 + $0x34] sm:$0xf] %vm768_vm3, %v699_v10 }
 0x151   : > { %v703_v11 = vpop.permute.xlu0 %702 }
 0x152   : > { %v717_v6 = vpop.permute.xlu1 %716  ;;  %784 = vst.msk [vmem:[%s1687_s17 + $0x3c] sm:$0xf] %vm768_vm3, %v703_v11 }
 0x153   : > { %791 = vst.msk [vmem:[%s1687_s17 + $0x58] sm:$0xf] %vm768_vm3, %v717_v6 }
 0x159   : > { %v733_v37 = vpop.permute.xlu0 %732 }
 0x15a   : > { %v687_v12 = vpop.permute.xlu1 %686  ;;  %799 = vst.msk [vmem:[%s1687_s17 + $0x78] sm:$0xf] %vm768_vm3, %v733_v37 }
 0x15b   : > { %776 = vst.msk [vmem:[%s1687_s17 + $0x1c] sm:$0xf] %vm768_vm3, %v687_v12 }
 0x162   : > { %v735_v42 = vpop.permute.xlu1 %734 }
 0x163   : > { %800 = vst.msk [vmem:[%s1687_s17 + $0x7c] sm:$0xf] %vm768_vm3, %v735_v42 }
 0x164 PF: > { %s17_s21 = sadd.s32 1, %s1146_s21  }
 0x165   : > { %p14_p5 = scmp.ge.s32.totalorder %s17_s21, 4  }
 0x167   :  { %16 = sbr.rel (!%p14_p5) target bundleno = 1 (0x1), region = 90 }

// kernel: preact_bottleneck.6
= control target key start
LH: loop header
LB: loop body
LE: loop exit
PB: predicated region body
PF: predicated region fallthrough
CT: control target
= control target key end

     0   :  { %s2807_s24 = smov 0   ;;  %s2809_s25 = smov 0   ;;  %s3989_s0 = inlined_call_operand.vmem [shape: bf16[2,16,16,4], index: 0, kind: input, shape index: {}, may-alias: {0,1,2}]   ;;  %s3990_s1 = inlined_call_operand.vmem [shape: bf16[2,16,16,4], index: 1, kind: input, shape index: {}, may-alias: {0,1,2}]   ;;  %s3991_s2 = inlined_call_operand.vmem [shape: bf16[2,16,16,4], index: 2, kind: input, shape index: {}, may-alias: {0,1,2}]   ;;  %s3992_s3 = inlined_call_operand.vmem [shape: f32[1,4], index: 3, kind: input, shape index: {}]   ;;  %s3993_s4 = inlined_call_operand.vmem [shape: f32[1,4], index: 4, kind: input, shape index: {}]   ;;  %s3994_s5 = inlined_call_operand.vmem [shape: bf16[36,4], index: 5, kind: input, shape index: {}]   ;;  %s3995_s6 = inlined_call_operand.vmem [shape: bf16[2,16,16,4], index: 6, kind: output, shape index: {0}]   ;;  %s3996_s7 = inlined_call_operand.vmem [shape: f32[4,2,4], index: 7, kind: output, shape index: {1}]  }
   0x1   :  { %s2811_s26 = smov 0   ;;  %s2813_s27 = smov 0  }
   0x2   :  { %s2815_s28 = smov 0  }
   0x3 LB: > { %s27_s29 = sadd.s32 1, %s2749_s26  ;;  %s30_s30 = sadd.s32 1, %s2753_s27  ;;  %s2757_s28 = sphi %s2815_s28, %s18_s28   ;;  %s2753_s27 = sphi %s2813_s27, %s4036_s27   ;;  %s2749_s26 = sphi %s2811_s26, %s4035_s26   ;;  %s2745_s25 = sphi %s2809_s25, %s4034_s25   ;;  %s2741_s24 = sphi %s2807_s24, %s4033_s24  }
   0x4   : > { %p28_p0 = scmp.ge.s32.totalorder %s27_s29, 2  ;;  %p2243_p1 = scmp.ge.s32.totalorder %s2757_s28, 1 }
   0x5   : > { %p330_p2 = scmp.lt.s32.totalorder %s2757_s28, 5 }
   0x6   : > { %s4038_s29 = smov (%p28_p0, %s27_s29), 0  ;;  %s4040_s30 = smov (!%p28_p0, %s30_s30), %s2753_s27 }
   0x7   : > { %p331_p3 = pnand %p2243_p1, %p330_p2  ;;  %p32_p4 = scmp.ge.s32.totalorder %s4040_s30, 2 }
   0x9   : > { %s4042_s30 = smov (%p32_p4, %s4040_s30), 0  ;;  %334 = sbr.rel (%p331_p3) target bundleno = 507 (0x1fb), region = 44 }
   0xe   : > { %s2842_s8 = sshll.u32 %s2741_s24, 3  ;;  %p405_p5 = scmp.lt.s32.totalorder %s2745_s25, 1  ;;  %v589_v0 = vlaneseq  ;;  %v2865_v1 = vld [vmem:[%s3992_s3] ss:$0 sm:$0xff]  ;;  %vm1030_vm0 = vcmask 1040384   ;;  %vm1214_vm1 = vcmask 1046528  }
   0xf   : > { %p407_p6 = scmp.lt.s32.totalorder %s2842_s8, 15  ;;  %s2249_s13 = sadd.s32 4294967295, %s2842_s8  ;;  %v2878_v10 = vld [vmem:[%s3993_s4] ss:$0 sm:$0xff]  ;;  %vm1297_vm4 = vcmask 1045504  }
  0x10   : > { %s406_s9 = scalar_select %p405_p5, %s2745_s25, 1  ;;  %v2872_v5 = vshrl.u32 %v589_v0, 7 }
  0x11   : > { %s408_s10 = scalar_select %p407_p6, %s2842_s8, 15 }
  0x12   : > { %s2848_s11 = sshll.u32 %s406_s9, 5  ;;  %p417_p7 = scmp.gt.s32.totalorder %s2249_s13, 0 }
  0x13   : > { %s2245_s12 = sshll.u32 %s408_s10, 1  ;;  %p2250_p8 = scmp.lt.s32.totalorder %s2249_s13, 15 }
  0x14   : > { %s2852_s14 = sadd.s32 %s2848_s11, %s2245_s12  ;;  %s433_s12 = sadd.s32 8, %s2842_s8 }
  0x15   : > { %s2247_s15 = sshll.u32 %s2852_s14, 2  ;;  %p2966_p9 = scmp.lt.s32.totalorder %s433_s12, 15 }
  0x16   : > { %s2860_s18 = scalar_lea.vmem %s3989_s0, %s2247_s15  ;;  %p557_p10 = scmp.gt.s32.totalorder %s2741_s24, 0 }
  0x17   : > { %v2336_v2 = vld [vmem:[%s2860_s18 + $0x20] sm:$0xff]   ;;  %v2337_v3 = vld [vmem:[%s2860_s18 + $0x28] sm:$0xff]   ;;  %v2870_v4 = vld [vmem:[%s2860_s18 + $0x30] sm:$0xff]   ;;  %s418_s21 = scalar_select %p417_p7, %s2249_s13, 0 }
  0x18   : > { %v2312_v6 = vunpack.c.h.bf16 %v2336_v2  ;;  %v2315_v7 = vunpack.c.l.bf16 %v2337_v3  ;;  %v2316_v8 = vunpack.c.h.bf16 %v2337_v3  ;;  %v2319_v9 = vunpack.c.l.bf16 %v2870_v4  ;;  %v2881_v11 = vld [vmem:[%s2860_s18 + $0x10] sm:$0xff]   ;;  %v2335_v12 = vld [vmem:[%s2860_s18 + $0x18] sm:$0xff]   ;;  %v2930_v41 = vld [vmem:[%s2860_s18] sm:$0xff]   ;;  %s4046_s12 = smov (!%p2966_p9, %s433_s12), 15  ;;  %s2764_s13 = smov 24  }
  0x19   : > { %v2320_v13 = vunpack.c.h.bf16 %v2870_v4  ;;  %v2304_v14 = vunpack.c.h.bf16 %v2881_v11  ;;  %v2307_v15 = vunpack.c.l.bf16 %v2335_v12  ;;  %v2308_v16 = vunpack.c.h.bf16 %v2335_v12  ;;  %s4044_s21 = smov (!%p2250_p8, %s418_s21), 15  ;;  %v2333_v50 = vld [vmem:[%s2860_s18 + $0x8] sm:$0xff]   ;;  %s4048_s12 = smov (!%p2966_p9, %s4046_s12), 15 }
  0x1a   : > { %v515_v17 = vmul.f32 %v2865_v1, %v2312_v6  ;;  %v516_v18 = vmul.f32 %v2865_v1, %v2315_v7  ;;  %v517_v19 = vmul.f32 %v2865_v1, %v2316_v8  ;;  %v518_v20 = vmul.f32 %v2865_v1, %v2319_v9  ;;  %s2255_s9 = sshll.u32 %s4044_s21, 1  ;;  %s3021_s20 = sshll.u32 %s4048_s12, 1 }
  0x1b   : > { %v2311_v21 = vunpack.c.l.bf16 %v2336_v2  ;;  %v511_v22 = vmul.f32 %v2865_v1, %v2304_v14  ;;  %v512_v23 = vmul.f32 %v2865_v1, %v2307_v15  ;;  %v513_v24 = vmul.f32 %v2865_v1, %v2308_v16  ;;  %s2933_s10 = sadd.s32 %s2255_s9, %s2848_s11  ;;  %s2759_s21 = smov 4  }
  0x1c   : > { %v2897_v25 = vadd.f32 %v2878_v10, %v515_v17  ;;  %v2900_v26 = vadd.f32 %v2878_v10, %v516_v18  ;;  %v2903_v27 = vadd.f32 %v2878_v10, %v517_v19  ;;  %v2906_v28 = vadd.f32 %v2878_v10, %v518_v20  ;;  %s2257_s8 = sshll.u32 %s2933_s10, 2  ;;  %s442_s22 = sadd.s32 %s3021_s20, %s2848_s11 }
  0x1d   : > { %v514_v29 = vmul.f32 %v2865_v1, %v2311_v21  ;;  %v2911_v30 = vadd.f32 %v2878_v10, %v511_v22  ;;  %v2914_v31 = vadd.f32 %v2878_v10, %v512_v23  ;;  %v2917_v32 = vadd.f32 %v2878_v10, %v513_v24  ;;  %s427_s19 = scalar_lea.vmem %s3990_s1, %s2257_s8  ;;  %s2761_s9 = smov 12  }
  0x1e   : > { %v3998_v33 = vmax.f32 %v2897_v25, 0.0  ;;  %v4005_v34 = vmax.f32 %v2900_v26, 0.0  ;;  %v3997_v35 = vmax.f32 %v2903_v27, 0.0  ;;  %v4003_v36 = vmax.f32 %v2906_v28, 0.0  ;;  %v2326_v24 = vld [vmem:[%s427_s19] sm:$0xff]   ;;  %s2762_s10 = smov 20   ;;  %s3902_s16 = scalar_lea.vmem %s3995_s6, %s2247_s15 }
  0x1f   : > { %v2924_v37 = vadd.f32 %v2878_v10, %v514_v29  ;;  %v4000_v38 = vmax.f32 %v2911_v30, 0.0  ;;  %v547_v39 = vmax.f32 %v2914_v31, 0.0  ;;  %v3999_v40 = vmax.f32 %v2917_v32, 0.0  ;;  %s568_s23 = scalar_select %p557_p10, 1, 0 }
  0x20   : > { %v2937_v42 = vrot.slane %v4005_v34, 7  ;;  %v2941_v43 = vrot.slane %v4003_v36, 7  ;;  %v2945_v44 = vrot.slane %v3998_v33, 7  ;;  %v2949_v45 = vrot.slane %v3997_v35, 7  ;;  %s2763_s12 = smov 16   ;;  %s2264_s8 = sshll.u32 %s442_s22, 2 }
  0x21   : > { %v4006_v46 = vmax.f32 %v2924_v37, 0.0  ;;  %v2955_v47 = vrot.slane %v547_v39, 7  ;;  %v2959_v48 = vrot.slane %v4000_v38, 7  ;;  %v2963_v49 = vrot.slane %v3999_v40, 7  ;;  %s444_s19 = scalar_lea.vmem %s3991_s2, %s2264_s8  ;;  %p573_p11 = scmp.lt.s32.totalorder %s2741_s24, 1 }
  0x22   : > { %v1131_v51 = vsel %vm1030_vm0, %v2945_v44, %v2937_v42  ;;  %v1133_v52 = vsel %vm1030_vm0, %v2937_v42, %v2949_v45  ;;  %v2979_v53 = vsel %vm1030_vm0, %v2949_v45, %v2941_v43  ;;  %v2296_v54 = vunpack.c.h.bf16 %v2930_v41  ;;  %s2269_s14 = sshll.u32 %s2745_s25, 1 }
  0x23   : > { %v1238_v55 = vrot.slane %v1131_v51, 1  ;;  %v1240_v56 = vrot.slane %v1133_v52, 1  ;;  %v1242_v57 = vrot.slane %v2979_v53, 1  ;;  %v2986_v58 = vrot.slane %v4006_v46, 7  ;;  %s584_s11 = scalar_select %p573_p11, 1, 0 }
  0x24   : > { %v2993_v59 = vsel %vm1030_vm0, %v2959_v48, %v2955_v47  ;;  %v1125_v60 = vsel %vm1030_vm0, %v2955_v47, %v2963_v49  ;;  %v2299_v61 = vunpack.c.l.bf16 %v2333_v50  ;;  %v2300_v62 = vunpack.c.h.bf16 %v2333_v50  ;;  %s461_s15 = sadd.s32 %s2741_s24, %s2269_s14 }
  0x25   : > { %v1241_v63 = vsel %vm1214_vm1, %v1238_v55, %v1240_v56  ;;  %v1243_v0 = vsel %vm1214_vm1, %v1240_v56, %v1242_v57  ;;  %v1127_v2 = vsel %vm1030_vm0, %v2963_v49, %v2986_v58  ;;  %v1230_v3 = vrot.slane %v2993_v59, 1  ;;  %p462_p12 = scmp.lt.s32.totalorder %s461_s15, 3 }
  0x26   : > { %v3009_v6 = vpack.i.bf16 %v1243_v0, %v1241_v63  ;;  %v1232_v7 = vrot.slane %v1125_v60, 1  ;;  %v1234_v8 = vrot.slane %v1127_v2, 1  ;;  %v2303_v9 = vunpack.c.l.bf16 %v2881_v11 }
  0x27   : > { %v507_v12 = vmul.f32 %v2865_v1, %v2296_v54  ;;  %v508_v14 = vmul.f32 %v2865_v1, %v2299_v61  ;;  %v509_v15 = vmul.f32 %v2865_v1, %v2300_v62  ;;  %v1129_v16 = vsel %vm1030_vm0, %v2986_v58, %v2945_v44  ;;  %s4050_s15 = smov (!%p462_p12, %s461_s15), 3 }
  0x28   : > { %2418 = vrot.lane.b32.xlu0 %v3009_v6, %s2759_s21  ;;  %v1233_v11 = vsel %vm1214_vm1, %v1230_v3, %v1232_v7  ;;  %v1235_v17 = vsel %vm1214_vm1, %v1232_v7, %v1234_v8  ;;  %v510_v18 = vmul.f32 %v2865_v1, %v2303_v9  ;;  %v1236_v19 = vrot.slane %v1129_v16, 1  ;;  %s2270_s25 = sshll.u32 %s4050_s15, 1 }
  0x29   : > { %v3032_v20 = vpack.i.bf16 %v1235_v17, %v1233_v11  ;;  %v3035_v21 = vadd.f32 %v2878_v10, %v507_v12  ;;  %v3038_v22 = vadd.f32 %v2878_v10, %v508_v14  ;;  %v3041_v23 = vadd.f32 %v2878_v10, %v509_v15 }
  0x2a   : > { %v529_v29 = vadd.f32 %v2878_v10, %v510_v18  ;;  %v1237_v50 = vsel %vm1214_vm1, %v1234_v8, %v1236_v19  ;;  %v1239_v51 = vsel %vm1214_vm1, %v1236_v19, %v1238_v55  ;;  %v2295_v52 = vunpack.c.l.bf16 %v2930_v41 }
  0x2b   : > { %2408 = vrot.lane.b32.xlu2 %v3032_v20, %s2759_s21  ;;  %v4002_v54 = vmax.f32 %v3035_v21, 0.0  ;;  %v543_v56 = vmax.f32 %v3038_v22, 0.0  ;;  %v4001_v60 = vmax.f32 %v3041_v23, 0.0  ;;  %v3054_v61 = vpack.i.bf16 %v1239_v51, %v1237_v50 }
  0x2c   : > { %v545_v62 = vmax.f32 %v529_v29, 0.0  ;;  %v506_v63 = vmul.f32 %v2865_v1, %v2295_v52  ;;  %v2327_v0 = vunpack.c.l.bf16 %v2326_v24  ;;  %v2328_v2 = vunpack.c.h.bf16 %v2326_v24 }
  0x2d   : > { %v3059_v55 = vrot.slane %v543_v56, 7  ;;  %v3063_v41 = vrot.slane %v4002_v54, 7  ;;  %v3067_v7 = vrot.slane %v4001_v60, 7  ;;  %v569_v8 = vstv %s568_s23  ;;  %s2766_s23 = smov 28  }
  0x2e   : > { %v3069_v9 = vrot.slane %v545_v62, 7  ;;  %v3072_v12 = vadd.f32 %v2878_v10, %v506_v63  ;;  %v562_v14 = vmul.f32 %v2865_v1, %v2327_v0  ;;  %v563_v15 = vmul.f32 %v2865_v1, %v2328_v2 }
  0x2f   : > { %v3079_v16 = vsel %vm1030_vm0, %v3063_v41, %v3059_v55  ;;  %v1117_v11 = vsel %vm1030_vm0, %v3059_v55, %v3067_v7  ;;  %vm3084_vm2 = vcmp.eq.s32.totalorder %v569_v8, 1  ;;  %v596_v18 = vadd.s32 48, %v2872_v5 }
  0x30   : > { %v1119_v19 = vsel %vm1030_vm0, %v3067_v7, %v3069_v9  ;;  %v1222_v24 = vrot.slane %v3079_v16, 1  ;;  %v1224_v29 = vrot.slane %v1117_v11, 1  ;;  %v1121_v50 = vsel %vm1030_vm0, %v3069_v9, %v2959_v48 }
  0x31   : > { %v1226_v51 = vrot.slane %v1119_v19, 1  ;;  %v1228_v52 = vrot.slane %v1121_v50, 1  ;;  %v541_v63 = vmax.f32 %v3072_v12, 0.0  ;;  %v564_v0 = vadd.f32 %v2878_v10, %v562_v14  ;;  %v3109_v14 = vld [vmem:[%s2860_s18 + $0x38] sm:$0xff]   ;;  %s2760_s18 = smov 8  }
  0x32   : > { %v1225_v2 = vsel %vm1214_vm1, %v1222_v24, %v1224_v29  ;;  %v565_v8 = vadd.f32 %v2878_v10, %v563_v15  ;;  %v598_v35 = vadd.s32 64, %v2872_v5  ;;  %v656_v33 = vand.u32 15, %v596_v18 }
  0x33   : > { %v1227_v16 = vsel %vm1214_vm1, %v1224_v29, %v1226_v51  ;;  %2413 = vrot.lane.b32.xlu2 %v3054_v61, %s2759_s21  ;;  %v1229_v11 = vsel %vm1214_vm1, %v1226_v51, %v1228_v52  ;;  %v1231_v19 = vsel %vm1214_vm1, %v1228_v52, %v1230_v3  ;;  %v566_v50 = vmax.f32 %v564_v0, 0.0 }
  0x34   : > { %v3111_v40 = vpack.i.bf16 %v1227_v16, %v1225_v2  ;;  %v3113_v15 = vpack.i.bf16 %v1231_v19, %v1229_v11  ;;  %v567_v38 = vmax.f32 %v565_v8, 0.0  ;;  %v3117_v18 = vrot.slane %v541_v63, 7 }
  0x35   : > { %v3121_v29 = vsel %vm3084_vm2, %v566_v50, 0.0  ;;  %v670_v51 = vand.u32 15, %v598_v35  ;;  %vm936_vm3 = vcmp.ne.s32.totalorder %v656_v33, 0  ;;  %v2323_v0 = vunpack.c.l.bf16 %v3109_v14 }
  0x36   : > { %2398 = vrot.lane.b32.xlu1 %v3111_v40, %s2759_s21  ;;  %v3127_v59 = vsel %vm3084_vm2, %v567_v38, 0.0  ;;  %v3130_v3 = vrot.slane %v3121_v29, 7  ;;  %v996_v52 = vsel %vm936_vm3, %v545_v62, 0.0  ;;  %v519_v33 = vmul.f32 %v2865_v1, %v2320_v13 }
  0x37   : > { %v3134_v2 = vrot.slane %v3127_v59, 7  ;;  %vm938_vm5 = vcmp.ne.s32.totalorder %v670_v51, 0  ;;  %v1181_v35 = vrot.slane %v996_v52, 7  ;;  %v520_v62 = vmul.f32 %v2865_v1, %v2323_v0 }
  0x38   : > { %v3141_v17 = vsel %vm1030_vm0, 0.0, %v3130_v3  ;;  %v3145_v38 = vsel %vm938_vm5, %v547_v39, 0.0  ;;  %v1113_v8 = vsel %vm1030_vm0, %v3117_v18, %v3063_v41  ;;  %v3167_v0 = vadd.f32 %v2878_v10, %v519_v33 }
  0x39   : > { %4015 = vst [vmem:[#allocation2_spill] sm:$0xff] %v3141_v17  ;;  %v1109_v4 = vsel %vm1030_vm0, %v3130_v3, %v3134_v2  ;;  %v1111_v13 = vsel %vm1030_vm0, %v3134_v2, %v3117_v18  ;;  %v1215_v16 = vrot.slane %v3141_v17, 1  ;;  %v3160_v31 = vsel %vm1030_vm0, %v3067_v7, %v1181_v35 }
  0x3a   : > { %v1216_v39 = vrot.slane %v1109_v4, 1  ;;  %v1218_v11 = vrot.slane %v1111_v13, 1  ;;  %v1184_v19 = vsel %vm1030_vm0, %v1181_v35, %v2959_v48  ;;  %v4004_v50 = vrot.slane %v3145_v38, 7 }
  0x3b   : > { %v4010_v51 = vrot.slane %v3160_v31, 2  ;;  %v1311_v52 = vrot.slane %v1184_v19, 2  ;;  %v3170_v60 = vadd.f32 %v2878_v10, %v520_v62  ;;  %v1220_v4 = vrot.slane %v1113_v8, 1 }
  0x3c   : > { %v1217_v54 = vsel %vm1214_vm1, %v1215_v16, %v1216_v39  ;;  %v1219_v36 = vsel %vm1214_vm1, %v1216_v39, %v1218_v11  ;;  %v3178_v35 = vsel %vm1030_vm0, %v2959_v48, %v4004_v50  ;;  %v4007_v62 = vmax.f32 %v3167_v0, 0.0 }
  0x3d   : > { %v2437_v13 = vpack.i.bf16 %v1219_v36, %v1217_v54  ;;  %v1312_v33 = vsel %vm1297_vm4, %v4010_v51, %v1311_v52  ;;  %v4009_v19 = vrot.slane %v3178_v35, 2  ;;  %v4008_v16 = vmax.f32 %v3170_v60, 0.0 }
  0x3e   : > { %2403 = vrot.lane.b32.xlu1 %v3113_v15, %s2759_s21  ;;  %v1221_v39 = vsel %vm1214_vm1, %v1218_v11, %v1220_v4  ;;  %v1223_v48 = vsel %vm1214_vm1, %v1220_v4, %v1222_v24  ;;  %v594_v8 = vadd.s32 32, %v2872_v5  ;;  %v3197_v54 = vrot.slane %v4007_v62, 7 }
  0x3f   : > { %2438 = vrot.lane.b32.xlu0 %v2437_v13, %s2759_s21  ;;  %v1314_v36 = vsel %vm1297_vm4, %v1311_v52, %v4009_v19  ;;  %v3199_v50 = vpack.i.bf16 %v1223_v48, %v1221_v39  ;;  %v592_v34 = vadd.s32 16, %v2872_v5  ;;  %v3206_v24 = vrot.slane %v4008_v16, 7 }
  0x40   : > { %v3202_v46 = vpack.i.bf16 %v1314_v36, %v1312_v33  ;;  %v642_v11 = vand.u32 15, %v594_v8  ;;  %v614_v4 = vand.u32 15, %v2872_v5  ;;  %v1137_v52 = vsel %vm1030_vm0, %v2941_v43, %v3197_v54 }
  0x41   : > { %v628_v13 = vand.u32 15, %v592_v34  ;;  %v600_v62 = vadd.s32 80, %v2872_v5  ;;  %v602_v39 = vadd.s32 96, %v2872_v5  ;;  %v3219_v33 = vsel %vm1030_vm0, %v3197_v54, %v3206_v24 }
  0x42   : > { %2433 = vrot.lane.b32.xlu2 %v3202_v46, %s2760_s18  ;;  %v1244_v48 = vrot.slane %v1137_v52, 1  ;;  %vm934_vm6 = vcmp.ne.s32.totalorder %v642_v11, 0  ;;  %vm930_vm7 = vcmp.ne.s32.totalorder %v614_v4, 0  ;;  %v1246_v8 = vrot.slane %v3219_v33, 1 }
  0x43   : > { %v994_v34 = vsel %vm934_vm6, %v543_v56, 0.0  ;;  %vm932_vm8 = vcmp.ne.s32.totalorder %v628_v13, 0  ;;  %v990_v36 = vsel %vm930_vm7, %v3121_v29, 0.0  ;;  %v684_v52 = vand.u32 15, %v600_v62 }
  0x44   : > { %v1245_v16 = vsel %vm1214_vm1, %v1242_v57, %v1244_v48  ;;  %v1177_v19 = vrot.slane %v994_v34, 7  ;;  %v992_v51 = vsel %vm932_vm8, %v541_v63, 0.0  ;;  %v1170_v17 = vrot.slane %v990_v36, 7 }
  0x45   : > { %v1247_v11 = vsel %vm1214_vm1, %v1244_v48, %v1246_v8  ;;  %v1173_v4 = vrot.slane %v992_v51, 7  ;;  %v698_v22 = vand.u32 15, %v602_v39  ;;  %v4016_v48 = vrot.slane %v3160_v31, 2 }
  0x46   : > { %v3233_v56 = vpack.i.bf16 %v1247_v11, %v1245_v16  ;;  %v1178_v29 = vsel %vm1030_vm0, %v3063_v41, %v1177_v19  ;;  %v1180_v53 = vsel %vm1030_vm0, %v1177_v19, %v3067_v7  ;;  %v1172_v57 = vsel %vm1030_vm0, %v1170_v17, %v3134_v2 }
  0x47   : > { %2443 = vrot.lane.b32.xlu0 %v3199_v50, %s2759_s21  ;;  %v1305_v12 = vrot.slane %v1178_v29, 2  ;;  %v1307_v63 = vrot.slane %v1180_v53, 2  ;;  %v1174_v51 = vsel %vm1030_vm0, %v3134_v2, %v1173_v4  ;;  %v1176_v62 = vsel %vm1030_vm0, %v1173_v4, %v3063_v41 }
  0x48   : > { %2423 = vrot.lane.b32.xlu1 %v3233_v56, %s2759_s21  ;;  %v1301_v16 = vrot.slane %v1174_v51, 2  ;;  %v1303_v13 = vrot.slane %v1176_v62, 2  ;;  %v1211_v7 = vsel %vm1030_vm0, 0.0, %v1170_v17  ;;  %v1299_v19 = vrot.slane %v1172_v57, 2  ;;  %s2765_s21 = smov 32  }
  0x49   : > { %v1308_v39 = vsel %vm1297_vm4, %v1305_v12, %v1307_v63  ;;  %v1310_v34 = vsel %vm1297_vm4, %v1307_v63, %v4016_v48  ;;  %v1298_v36 = vrot.slane %v1211_v7, 2  ;;  %vm940_vm9 = vcmp.ne.s32.totalorder %v684_v52, 0 }
  0x4a   : > { %v3254_v2 = vpack.i.bf16 %v1310_v34, %v1308_v39  ;;  %v1304_v41 = vsel %vm1297_vm4, %v1301_v16, %v1303_v13  ;;  %v1306_v11 = vsel %vm1297_vm4, %v1303_v13, %v1305_v12  ;;  %v1302_v4 = vsel %vm1297_vm4, %v1299_v19, %v1301_v16 }
  0x4b   : > { %v3259_v29 = vpack.i.bf16 %v1306_v11, %v1304_v41  ;;  %v1300_v17 = vsel %vm1297_vm4, %v1298_v36, %v1299_v19  ;;  %vm942_vm10 = vcmp.ne.s32.totalorder %v698_v22, 0  ;;  %v4017_v53 = vmax.f32 %v2924_v37, 0.0 }
  0x4c   : > { %v2462_v57 = vpack.i.bf16 %v1302_v4, %v1300_v17  ;;  %v4018_v63 = vmax.f32 %v2900_v26, 0.0  ;;  %v4019_v62 = vrot.slane %v3145_v38, 7  ;;  %v604_v7 = vadd.s32 112, %v2872_v5 }
  0x4d   : > { %v1000_v31 = vsel %vm940_vm9, %v4017_v53, 0.0  ;;  %v591_v19 = vadd.s32 8, %v2872_v5  ;;  %v593_v22 = vadd.s32 24, %v2872_v5  ;;  %v606_v38 = vadd.s32 128, %v2872_v5 }
  0x4e   : > { %v1002_v52 = vsel %vm942_vm10, %v4018_v63, 0.0  ;;  %v1189_v51 = vrot.slane %v1000_v31, 7  ;;  %v1188_v12 = vsel %vm1030_vm0, %v4019_v62, %v2963_v49  ;;  %2463 = vrot.lane.b32.xlu2 %v2462_v57, %s2760_s18  ;;  %v4020_v36 = vrot.slane %v3178_v35, 2 }
  0x4f   : > { %v1193_v13 = vrot.slane %v1002_v52, 7  ;;  %v1315_v16 = vrot.slane %v1188_v12, 2  ;;  %2448 = vrot.lane.b32.xlu0 %v3259_v29, %s2760_s18  ;;  %v712_v11 = vand.u32 15, %v604_v7  ;;  %v621_v17 = vand.u32 15, %v591_v19 }
  0x50   : > { %v1190_v37 = vsel %vm1030_vm0, %v2963_v49, %v1189_v51  ;;  %v1192_v26 = vsel %vm1030_vm0, %v1189_v51, %v2945_v44  ;;  %2428 = vrot.lane.b32.xlu1 %v3254_v2, %s2760_s18  ;;  %v635_v57 = vand.u32 15, %v593_v22  ;;  %v4021_v51 = vmax.f32 %v2906_v28, 0.0 }
  0x51   : > { %v1194_v39 = vsel %vm1030_vm0, %v2945_v44, %v1193_v13  ;;  %v1317_v48 = vrot.slane %v1190_v37, 2  ;;  %v1319_v34 = vrot.slane %v1192_v26, 2  ;;  %v1316_v41 = vsel %vm1297_vm4, %v4020_v36, %v1315_v16 }
  0x52   : > { %v1321_v49 = vrot.slane %v1194_v39, 2  ;;  %v1196_v4 = vsel %vm1030_vm0, %v1193_v13, %v2949_v45  ;;  %vm944_vm11 = vcmp.ne.s32.totalorder %v712_v11, 0  ;;  %vm851_vm12 = vcmp.ne.s32.totalorder %v621_v17, 15 }
  0x53   : > { %v1320_v53 = vsel %vm1297_vm4, %v1317_v48, %v1319_v34  ;;  %v1318_v31 = vsel %vm1297_vm4, %v1315_v16, %v1317_v48  ;;  %v1323_v44 = vrot.slane %v1196_v4, 2  ;;  %v1004_v62 = vsel %vm944_vm11, %v4021_v51, 0.0 }
  0x54   : > { %v1322_v63 = vsel %vm1297_vm4, %v1319_v34, %v1321_v49  ;;  %v3293_v35 = vpack.i.bf16 %v1318_v31, %v1316_v41  ;;  %vm853_vm13 = vcmp.ne.s32.totalorder %v635_v57, 15  ;;  %v1197_v13 = vrot.slane %v1004_v62, 7 }
  0x55   : > { %v3295_v52 = vpack.i.bf16 %v1322_v63, %v1320_v53  ;;  %v1324_v12 = vsel %vm1297_vm4, %v1321_v49, %v1323_v44  ;;  %v911_v7 = vsel %vm851_vm12, %v3127_v59, 0.0  ;;  %v4022_v16 = vmax.f32 %v3035_v21, 0.0 }
  0x56   : > { %v726_v37 = vand.u32 15, %v606_v38  ;;  %v3303_v26 = vrot.slane %v911_v7, 7  ;;  %v595_v39 = vadd.s32 40, %v2872_v5  ;;  %v597_v48 = vadd.s32 56, %v2872_v5 }
  0x57   : > { %v913_v19 = vsel %vm853_vm13, %v4022_v16, 0.0  ;;  %v1198_v28 = vsel %vm1030_vm0, %v2949_v45, %v1197_v13  ;;  %v1200_v34 = vsel %vm1030_vm0, %v1197_v13, %v3197_v54  ;;  %v599_v59 = vadd.s32 72, %v2872_v5  ;;  %2453 = vrot.lane.b32.xlu0 %v3293_v35, %s2760_s18 }
  0x58   : > { %v1036_v22 = vrot.slane %v913_v19, 7  ;;  %vm946_vm14 = vcmp.ne.s32.totalorder %v726_v37, 0  ;;  %v1325_v21 = vrot.slane %v1198_v28, 2  ;;  %v3317_v38 = vsel %vm1030_vm0, %v3303_v26, %v3117_v18  ;;  %2458 = vrot.lane.b32.xlu1 %v3295_v52, %s2760_s18 }
  0x59   : > { %v4023_v45 = vmax.f32 %v3170_v60, 0.0  ;;  %v1327_v4 = vrot.slane %v1200_v34, 2  ;;  %v649_v17 = vand.u32 15, %v595_v39  ;;  %v663_v31 = vand.u32 15, %v597_v48 }
  0x5a   : > { %v3321_v36 = vsel %vm1030_vm0, %v3117_v18, %v1036_v22  ;;  %v1326_v53 = vsel %vm1297_vm4, %v1323_v44, %v1325_v21  ;;  %v3335_v18 = vsel %vm1030_vm0, %v1036_v22, %v3059_v55  ;;  %v677_v60 = vand.u32 15, %v599_v59 }
  0x5b   : > { %v3325_v41 = vsel %vm946_vm14, %v4023_v45, 0.0  ;;  %v2477_v49 = vpack.i.bf16 %v3321_v36, %v3317_v38  ;;  %v3337_v57 = vpack.i.bf16 %v1326_v53, %v1324_v12  ;;  %v1328_v51 = vsel %vm1297_vm4, %v1325_v21, %v1327_v4 }
  0x5c   : > { %v1201_v11 = vrot.slane %v3325_v41, 7  ;;  %vm855_vm15 = vcmp.ne.s32.totalorder %v649_v17, 15  ;;  %v4024_v44 = vmax.f32 %v3041_v23, 0.0  ;;  %vm857_vm2 = vcmp.ne.s32.totalorder %v663_v31, 15 }
  0x5d   : > { %vm859_vm3 = vcmp.ne.s32.totalorder %v677_v60, 15  ;;  %2468 = vrot.lane.b32.xlu2 %v3337_v57, %s2760_s18  ;;  %v4025_v7 = vmax.f32 %v2911_v30, 0.0  ;;  %v601_v37 = vadd.s32 88, %v2872_v5  ;;  %v603_v48 = vadd.s32 104, %v2872_v5 }
  0x5e   : > { %v3343_v63 = vsel %vm1030_vm0, %v3197_v54, %v1201_v11  ;;  %v915_v13 = vsel %vm855_vm15, %v4024_v44, 0.0  ;;  %v4026_v54 = vmax.f32 %v2917_v32, 0.0  ;;  %v4027_v17 = vmax.f32 %v2897_v25, 0.0 }
  0x5f   : > { %v1329_v62 = vrot.slane %v3343_v63, 2  ;;  %v1040_v12 = vrot.slane %v915_v13, 7  ;;  %v917_v16 = vsel %vm857_vm2, %v4025_v7, 0.0  ;;  %v691_v30 = vand.u32 15, %v601_v37 }
  0x60   : > { %v919_v19 = vsel %vm859_vm3, %v4026_v54, 0.0  ;;  %v1044_v23 = vrot.slane %v917_v16, 7  ;;  %2478 = vrot.lane.b32.xlu1 %v2477_v49, %s2761_s9  ;;  %v605_v49 = vadd.s32 120, %v2872_v5  ;;  %v705_v31 = vand.u32 15, %v603_v48 }
  0x61   : > { %v1330_v22 = vsel %vm1297_vm4, %v1327_v4, %v1329_v62  ;;  %v1048_v39 = vrot.slane %v919_v19, 7  ;;  %v3364_v34 = vsel %vm1030_vm0, %v3059_v55, %v1040_v12  ;;  %v3378_v45 = vsel %vm1030_vm0, %v1040_v12, %v3069_v9 }
  0x62   : > { %v3360_v28 = vpack.i.bf16 %v1330_v22, %v1328_v51  ;;  %v2482_v32 = vpack.i.bf16 %v3364_v34, %v3335_v18  ;;  %v3370_v59 = vsel %vm1030_vm0, %v1044_v23, %v2955_v47  ;;  %v3389_v4 = vsel %vm1030_vm0, %v3069_v9, %v1044_v23 }
  0x63   : > { %v3374_v21 = vsel %vm1030_vm0, %v2955_v47, %v1048_v39  ;;  %vm861_vm5 = vcmp.ne.s32.totalorder %v691_v30, 15  ;;  %v3393_v47 = vsel %vm1030_vm0, %v1048_v39, %v2986_v58  ;;  %v2324_v60 = vunpack.c.h.bf16 %v3109_v14 }
  0x64   : > { %2473 = vrot.lane.b32.xlu0 %v3360_v28, %s2760_s18  ;;  %v3385_v55 = vpack.i.bf16 %v3374_v21, %v3370_v59  ;;  %v921_v53 = vsel %vm861_vm5, %v4027_v17, 0.0  ;;  %v607_v44 = vadd.s32 136, %v2872_v5  ;;  %v719_v13 = vand.u32 15, %v605_v49 }
  0x65   : > { %v1052_v51 = vrot.slane %v921_v53, 7  ;;  %vm863_vm6 = vcmp.ne.s32.totalorder %v705_v31, 15  ;;  %v521_v9 = vmul.f32 %v2865_v1, %v2324_v60  ;;  %2483 = vrot.lane.b32.xlu2 %v2482_v32, %s2761_s9  ;;  %v3404_v12 = vpack.i.bf16 %v3389_v4, %v3378_v45 }
  0x66   : > { %v4028_v7 = vmax.f32 %v2903_v27, 0.0  ;;  %v733_v16 = vand.u32 15, %v607_v44  ;;  %vm865_vm7 = vcmp.ne.s32.totalorder %v719_v13, 15  ;;  %v4029_v22 = vmax.f32 %v3167_v0, 0.0 }
  0x67   : > { %v3408_v25 = vsel %vm1030_vm0, %v2986_v58, %v1052_v51  ;;  %v3417_v37 = vadd.f32 %v2878_v10, %v521_v9  ;;  %v3428_v27 = vsel %vm1030_vm0, %v1052_v51, %v2937_v42  ;;  %vm1685_vm9 = vcmask 31744  }
  0x68   : > { %v923_v14 = vsel %vm863_vm6, %v4028_v7, 0.0  ;;  %v3414_v54 = vpack.i.bf16 %v3408_v25, %v3393_v47  ;;  %v925_v23 = vsel %vm865_vm7, %v4029_v22, 0.0  ;;  %vm867_vm8 = vcmp.ne.s32.totalorder %v733_v16, 15  ;;  %2493 = vrot.lane.b32.xlu1 %v3385_v55, %s2761_s9 }
  0x69   : > { %v1056_v19 = vrot.slane %v923_v14, 7  ;;  %v1060_v39 = vrot.slane %v925_v23, 7  ;;  %v556_v58 = vmax.f32 %v3417_v37, 0.0  ;;  %vm1702_vm12 = vcmask 64512  }
  0x6a   : > { %vm1719_vm13 = vcmask 97280   ;;  %vm1874_vm15 = vcmask 1041408   ;;  %vm1770_vm2 = vcmask 195584   ;;  %vm1787_vm3 = vcmask 228352  }
  0x6b   : > { %v3432_v48 = vsel %vm1030_vm0, %v1056_v19, %v2941_v43  ;;  %v3436_v0 = vsel %vm1030_vm0, %v2941_v43, %v1060_v39  ;;  %v3440_v30 = vsel %vm1030_vm0, %v2937_v42, %v1056_v19  ;;  %v3442_v17 = vsel %vm867_vm8, %v556_v58, 0.0 }
  0x6c   : > { %2488 = vrot.lane.b32.xlu0 %v3404_v12, %s2761_s9  ;;  %v1064_v53 = vrot.slane %v3442_v17, 7  ;;  %v3449_v49 = vpack.i.bf16 %v3436_v0, %v3432_v48  ;;  %v2502_v43 = vpack.i.bf16 %v3440_v30, %v3428_v27  ;;  %v1063_v42 = vsel %vm1030_vm0, %v1060_v39, %v3206_v24 }
  0x6d   : > { %2498 = vrot.lane.b32.xlu2 %v3414_v54, %s2761_s9  ;;  %v585_v19 = vstv %s584_s11  ;;  %v608_v39 = vadd.s32 144, %v2872_v5  ;;  %vm1804_vm5 = vcmask 261120   ;;  %vm1849_vm6 = vcmask 293888  }
  0x6e   : > { %v1065_v31 = vsel %vm1030_vm0, %v3206_v24, %v1064_v53  ;;  %vm3516_vm10 = vcmp.eq.s32.totalorder %v585_v19, 1  ;;  %vm1943_vm7 = vcmask 27648   ;;  %vm2051_vm8 = vcmask 25600  }
  0x6f   : > { %v3462_v60 = vpack.i.bf16 %v1065_v31, %v1063_v42  ;;  %v740_v42 = vand.u32 15, %v608_v39 }
  0x70   : > { %2508 = vrot.lane.b32.xlu1 %v3449_v49, %s2761_s9 }
  0x71   : > { %vm948_vm11 = vcmp.ne.s32.totalorder %v740_v42, 0 }
  0x74   : > { %2503 = vrot.lane.b32.xlu0 %v2502_v43, %s2761_s9 }
  0x75   : > { %2513 = vrot.lane.b32.xlu2 %v3462_v60, %s2761_s9 }
  0x78   : > { %2523 = vrot.lane.b32.xlu1 %v3259_v29, %s2762_s10  ;;  %v3481_v29 = vld [vmem:[%s444_s19] sm:$0xff]   ;;  %s465_s19 = scalar_lea.vmem %s3996_s7, %s2270_s25 }
  0x7c   : > { %2518 = vrot.lane.b32.xlu0 %v3199_v50, %s2763_s12  ;;  %v2331_v50 = vunpack.c.l.bf16 %v3481_v29 }
  0x7d   : > { %2528 = vrot.lane.b32.xlu2 %v2482_v32, %s2764_s13 }
  0x7e   : > { %v578_v13 = vmul.f32 %v2865_v1, %v2331_v50  ;;  %v1140_v50 = vrot.slane %v556_v58, 7 }
  0x80   : > { %2538 = vrot.lane.b32.xlu1 %v3254_v2, %s2765_s21  ;;  %v580_v14 = vadd.f32 %v2878_v10, %v578_v13 }
  0x82   : > { %v582_v23 = vmax.f32 %v580_v14, 0.0 }
  0x84   : > { %2533 = vrot.lane.b32.xlu0 %v3111_v40, %s2766_s23  ;;  %v587_v31 = vsel %vm3516_vm10, %v582_v23, 0.0 }
  0x85   : > { %2543 = vrot.lane.b32.xlu2 %v3113_v15, %s2763_s12  ;;  %v2409_v32 = vpop.permute.xlu2 %2408 }
  0x86   : > { %v2411_v51 = vunpack.i.h.bf16 %v2409_v32  ;;  %v2410_v44 = vunpack.i.l.bf16 %v2409_v32  ;;  %v1008_v32 = vsel %vm948_vm11, %v587_v31, 0.0 }
  0x88   : > { %2553 = vrot.lane.b32.xlu1 %v3054_v61, %s2763_s12  ;;  %v3494_v9 = vsel %vm1685_vm9, %v3374_v21, %v2411_v51  ;;  %v3498_v7 = vsel %vm1685_vm9, %v3370_v59, %v2410_v44  ;;  %v3523_v51 = vrot.slane %v1008_v32, 7 }
  0x8c   : > { %2548 = vrot.lane.b32.xlu0 %v3202_v46, %s2762_s10 }
  0x8d   : > { %2558 = vrot.lane.b32.xlu2 %v3385_v55, %s2764_s13  ;;  %v2414_v16 = vpop.permute.xlu2 %2413 }
  0x8e   : > { %v2416_v37 = vunpack.i.h.bf16 %v2414_v16  ;;  %v2415_v22 = vunpack.i.l.bf16 %v2414_v16 }
  0x90   : > { %2568 = vrot.lane.b32.xlu1 %v3032_v20, %s2766_s23  ;;  %v3510_v59 = vsel %vm1685_vm9, %v3408_v25, %v2416_v37  ;;  %v3514_v21 = vsel %vm1685_vm9, %v3393_v47, %v2415_v22  ;;  %v1204_v47 = vsel %vm1030_vm0, %v1201_v11, %v1140_v50  ;;  %v3530_v25 = vsel %vm1030_vm0, %v1140_v50, %v3523_v51 }
  0x91   : > { %v1479_v44 = vrot.slane %v1204_v47, 2  ;;  %v1481_v58 = vrot.slane %v3530_v25, 2  ;;  %v3555_v37 = vrot.slane %v587_v31, 7  ;;  %v1141_v22 = vsel %vm1030_vm0, %v3206_v24, %v1140_v50 }
  0x93   : > { %v1482_v11 = vsel %vm1297_vm4, %v1479_v44, %v1481_v58 }
  0x94   : > { %2563 = vrot.lane.b32.xlu0 %v3295_v52, %s2762_s10 }
  0x95   : > { %2573 = vrot.lane.b32.xlu2 %v2502_v43, %s2764_s13  ;;  %v1480_v43 = vsel %vm1297_vm4, %v1329_v62, %v1479_v44 }
  0x96   : > { %v3543_v16 = vpack.i.bf16 %v1482_v11, %v1480_v43 }
  0x98   : > { %2583 = vrot.lane.b32.xlu1 %v3009_v6, %s2766_s23 }
  0x9a   : > { %v2419_v41 = vpop.permute.xlu0 %2418 }
  0x9b   : > { %v2421_v13 = vunpack.i.h.bf16 %v2419_v41  ;;  %v2420_v14 = vunpack.i.l.bf16 %v2419_v41 }
  0x9c   : > { %2578 = vrot.lane.b32.xlu0 %v3293_v35, %s2765_s21  ;;  %v2434_v62 = vpop.permute.xlu2 %2433 }
  0x9d   : > { %2588 = vrot.lane.b32.xlu2 %v3337_v57, %s2765_s21  ;;  %v1699_v19 = vsel %vm1685_vm9, %v3440_v30, %v2421_v13  ;;  %v1698_v63 = vsel %vm1685_vm9, %v3428_v27, %v2420_v14  ;;  %v3563_v30 = vsel %vm1030_vm0, %v1140_v50, %v3555_v37  ;;  %v2435_v31 = vunpack.i.l.bf16 %v2434_v62 }
  0x9e   : > { %v1429_v27 = vrot.slane %v3563_v30, 1 }
  0xa0   : > { %2598 = vrot.lane.b32.xlu1 %v3254_v2, %s2762_s10  ;;  %v1427_v2 = vrot.slane %v1141_v22, 1 }
  0xa2   : > { %v1428_v24 = vsel %vm1214_vm1, %v1246_v8, %v1427_v2  ;;  %v1430_v39 = vsel %vm1214_vm1, %v1427_v2, %v1429_v27 }
  0xa4   : > { %2593 = vrot.lane.b32.xlu0 %v3111_v40, %s2763_s12 }
  0xa5   : > { %2603 = vrot.lane.b32.xlu2 %v3233_v56, %s2763_s12 }
  0xa8   : > { %2613 = vrot.lane.b32.xlu1 %v3360_v28, %s2762_s10  ;;  %v2399_v40 = vpop.permute.xlu1 %2398  ;;  %v3572_v23 = vpop.permute.xlu2 %2463 }
  0xa9   : > { %v2401_v22 = vunpack.i.h.bf16 %v2399_v40  ;;  %v2400_v2 = vunpack.i.l.bf16 %v2399_v40 }
  0xac   : > { %2608 = vrot.lane.b32.xlu0 %v3404_v12, %s2764_s13  ;;  %v3584_v12 = vpack.i.bf16 %v1430_v39, %v1428_v24 }
  0xad   : > { %2618 = vrot.lane.b32.xlu2 %v3113_v15, %s2766_s23  ;;  %v2436_v15 = vunpack.i.h.bf16 %v2434_v62 }
  0xb0   : > { %2628 = vrot.lane.b32.xlu1 %v3202_v46, %s2765_s21  ;;  %v2404_v42 = vpop.permute.xlu1 %2403  ;;  %v2332_v46 = vunpack.c.h.bf16 %v3481_v29 }
  0xb1   : > { %v2406_v50 = vunpack.i.h.bf16 %v2404_v42  ;;  %v2405_v32 = vunpack.i.l.bf16 %v2404_v42  ;;  %v3586_v33 = vpop.permute.xlu0 %2438 }
  0xb3   : > { %v1693_v8 = vsel %vm1685_vm9, %v3389_v4, %v2406_v50  ;;  %v1692_v47 = vsel %vm1685_vm9, %v3378_v45, %v2405_v32  ;;  %v579_v45 = vmul.f32 %v2865_v1, %v2332_v46 }
  0xb4   : > { %2623 = vrot.lane.b32.xlu0 %v3462_v60, %s2764_s13  ;;  %v3596_v60 = vsel %vm1702_vm12, %v1692_v47, %v2435_v31  ;;  %v3599_v44 = vsel %vm1702_vm12, %v1693_v8, %v2436_v15 }
  0xb5   : > { %2633 = vrot.lane.b32.xlu2 %v3584_v12, %s2766_s23  ;;  %v581_v62 = vadd.f32 %v2878_v10, %v579_v45  ;;  %v1690_v10 = vsel %vm1685_vm9, %v3335_v18, %v2400_v2 }
  0xb7   : > { %v2469_v43 = vpop.permute.xlu2 %2468 }
  0xb8   : > { %v2471_v41 = vunpack.i.h.bf16 %v2469_v43  ;;  %v2470_v11 = vunpack.i.l.bf16 %v2469_v43  ;;  %2643 = vrot.lane.b32.xlu1 %v3032_v20, %s2763_s12  ;;  %v609_v20 = vadd.s32 152, %v2872_v5  ;;  %v1691_v5 = vsel %vm1685_vm9, %v3364_v34, %v2401_v22  ;;  %v1833_v22 = vld [vmem:[%s3994_s5 + $0x10] sm:$0x3] }
  0xb9   : > { %v2444_v13 = vpop.permute.xlu0 %2443  ;;  %v1843_v2 = vunpack.c.l.b16 %v1833_v22 }
  0xba   : > { %v3607_v4 = vsel %vm1702_vm12, %v1699_v19, %v2471_v41  ;;  %v3610_v29 = vsel %vm1702_vm12, %v1698_v63, %v2470_v11  ;;  %v3612_v14 = vpop.permute.xlu1 %2423  ;;  %v2446_v1 = vunpack.i.h.bf16 %v2444_v13  ;;  %v2445_v39 = vunpack.i.l.bf16 %v2444_v13 }
  0xbb   : > { %v583_v19 = vmax.f32 %v581_v62, 0.0  ;;  %v747_v63 = vand.u32 15, %v609_v20 }
  0xbc   : > { %2638 = vrot.lane.b32.xlu0 %v3543_v16, %s2765_s21 }
  0xbd   : > { %2648 = vrot.lane.b32.xlu2 %v3293_v35, %s2762_s10  ;;  %v588_v18 = vsel %vm3516_vm10, %v583_v19, 0.0  ;;  %vm869_vm14 = vcmp.ne.s32.totalorder %v747_v63, 15  ;;  %v2426_v19 = vunpack.i.h.bf16 %v3612_v14 }
  0xbe   : > { %v929_v55 = vsel %vm869_vm14, %v588_v18, 0.0  ;;  %v1144_v20 = vrot.slane %v588_v18, 7 }
  0xbf   : > { %v2484_v24 = vpop.permute.xlu2 %2483  ;;  %v1068_v62 = vrot.slane %v929_v55, 7 }
  0xc0   : > { %2658 = vrot.lane.b32.xlu1 %v3414_v54, %s2764_s13  ;;  %v2486_v42 = vunpack.i.h.bf16 %v2484_v24  ;;  %v2485_v15 = vunpack.i.l.bf16 %v2484_v24  ;;  %v1688_v54 = vsel %vm1685_vm9, %v3317_v38, %v2445_v39  ;;  %v1846_v39 = vpack.c.b16 %v1843_v2, %v1843_v2 }
  0xc1   : > { %v2449_v35 = vpop.permute.xlu0 %2448  ;;  %v1145_v17 = vsel %vm1030_vm0, %v3555_v37, %v1144_v20 }
  0xc2   : > { %v2429_v40 = vpop.permute.xlu1 %2428  ;;  %v2451_v31 = vunpack.i.h.bf16 %v2449_v35  ;;  %v2450_v50 = vunpack.i.l.bf16 %v2449_v35  ;;  %v1876_v63 = vsel %vm1874_vm15, %v1846_v39, 0  ;;  %v2441_v39 = vunpack.i.h.bf16 %v3586_v33 }
  0xc3   : > { %v2431_v32 = vunpack.i.h.bf16 %v2429_v40  ;;  %v2430_v8 = vunpack.i.l.bf16 %v2429_v40  ;;  %1883 = vmatpush.bf16.msra.mxu0 %v1876_v63  ;;  %2340 = vmatpush.bf16.msra.mxu1 %v1876_v63 }
  0xc4   : > { %2653 = vrot.lane.b32.xlu0 %v3009_v6, %s2763_s12  ;;  %v1689_v6 = vsel %vm1685_vm9, %v3321_v36, %v2446_v1  ;;  %v1705_v34 = vsel %vm1702_vm12, %v1688_v54, %v2450_v50  ;;  %v1069_v1 = vsel %vm1030_vm0, %v3555_v37, %v1068_v62  ;;  %2341 = vmatpush.bf16.msra.mxu2 %v1876_v63 }
  0xc5   : > { %2663 = vrot.lane.b32.xlu2 %v3337_v57, %s2762_s10  ;;  %v1706_v47 = vsel %vm1702_vm12, %v1689_v6, %v2451_v31  ;;  %v3637_v46 = vsel %vm1702_vm12, %v1690_v10, %v2430_v8  ;;  %v3640_v38 = vsel %vm1702_vm12, %v1691_v5, %v2431_v32  ;;  %v3643_v36 = vsel %vm1719_vm13, %v1705_v34, %v2485_v15 }
  0xc6   : > { %v3646_v43 = vsel %vm1719_vm13, %v1706_v47, %v2486_v42  ;;  %v1580_v42 = vrot.slane %v1145_v17, 1  ;;  %2342 = vmatpush.bf16.msra.mxu3 %v1876_v63  ;;  %v2466_v17 = vunpack.i.h.bf16 %v3572_v23 }
  0xc7   : > { %v3648_v57 = vpop.permute.xlu2 %2498 }
  0xc8   : > { %2673 = vrot.lane.b32.xlu1 %v3449_v49, %s2764_s13  ;;  %v1581_v8 = vsel %vm1214_vm1, %v1429_v27, %v1580_v42 }
  0xc9   : > { %v3654_v41 = vpop.permute.xlu0 %2453 }
  0xca   : > { %v2459_v11 = vpop.permute.xlu1 %2458 }
  0xcb   : > { %v2461_v45 = vunpack.i.h.bf16 %v2459_v11  ;;  %v2460_v13 = vunpack.i.l.bf16 %v2459_v11 }
  0xcc   : > { %2668 = vrot.lane.b32.xlu0 %v3054_v61, %s2766_s23 }
  0xcd   : > { %2678 = vrot.lane.b32.xlu2 %v3295_v52, %s2765_s21  ;;  %v3663_v49 = vsel %vm1702_vm12, %v3510_v59, %v2461_v45  ;;  %v3667_v61 = vsel %vm1702_vm12, %v3514_v21, %v2460_v13  ;;  %v1067_v52 = vsel %vm1030_vm0, %v1064_v53, %v3555_v37  ;;  %v2425_v59 = vunpack.i.l.bf16 %v3612_v14 }
  0xce   : > { %v1149_v21 = vsel %vm1030_vm0, %v1144_v20, 0.0  ;;  %v1208_v53 = vsel %vm1030_vm0, %v3523_v51, %v1144_v20  ;;  %v2702_v37 = vpack.i.bf16 %v1069_v1, %v1067_v52  ;;  %v1701_v51 = vsel %vm1685_vm9, %v3436_v0, %v2426_v19 }
  0xcf   : > { %v2514_v24 = vpop.permute.xlu2 %2513  ;;  %v1582_v15 = vrot.slane %v1149_v21, 1  ;;  %v1700_v31 = vsel %vm1685_vm9, %v3432_v48, %v2425_v59  ;;  %v1633_v50 = vrot.slane %v1208_v53, 2  ;;  %v1635_v54 = vrot.slane %v1149_v21, 2 }
  0xd0   : > { %2688 = vrot.lane.b32.xlu1 %v3360_v28, %s2765_s21  ;;  %v2516_v35 = vunpack.i.h.bf16 %v2514_v24  ;;  %v2515_v5 = vunpack.i.l.bf16 %v2514_v24  ;;  %v2440_v19 = vunpack.i.l.bf16 %v3586_v33  ;;  %v1033_v33 = vsel %vm1030_vm0, %v3130_v3, %v3303_v26 }
  0xd1   : > { %v1583_v47 = vsel %vm1214_vm1, %v1580_v42, %v1582_v15  ;;  %v1634_v27 = vsel %vm1297_vm4, %v1481_v58, %v1633_v50  ;;  %v1636_v18 = vsel %vm1297_vm4, %v1633_v50, %v1635_v54  ;;  %v1687_v53 = vsel %vm1685_vm9, %v1033_v33, %v2441_v39 }
  0xd2   : > { %v3686_v14 = vpop.permute.xlu1 %2478  ;;  %v2707_v30 = vpack.i.bf16 %v1583_v47, %v1581_v8  ;;  %v2712_v62 = vpack.i.bf16 %v1636_v18, %v1634_v27  ;;  %v1704_v26 = vsel %vm1702_vm12, %v1687_v53, %v2466_v17  ;;  %vm1736_vm1 = vcmask 130048  }
  0xd3   : > { %v2480_v42 = vunpack.i.l.bf16 %v3686_v14  ;;  %vm1753_vm4 = vcmask 162816   ;;  %v2501_v33 = vunpack.i.h.bf16 %v3648_v57  ;;  %v2500_v17 = vunpack.i.l.bf16 %v3648_v57 }
  0xd4   : > { %2683 = vrot.lane.b32.xlu0 %v3233_v56, %s2766_s23  ;;  %v2292_v56 = vld [vmem:[%s3994_s5 + $0x8] sm:$0xff] }
  0xd5   : > { %2693 = vrot.lane.b32.xlu2 %v3584_v12, %s2763_s12  ;;  %1884 = vmatpush.bf16.msra.mxu0 %v2292_v56  ;;  %v2291_v12 = vld [vmem:[%s3994_s5] sm:$0xff] }
  0xd6   : > { %v2474_v10 = vpop.permute.xlu0 %2473  ;;  %2343 = vmatpush.bf16.msra.mxu1 %v2292_v56  ;;  %2344 = vmatpush.bf16.msra.mxu2 %v2292_v56 }
  0xd7   : > { %v2476_v28 = vunpack.i.h.bf16 %v2474_v10  ;;  %v2475_v40 = vunpack.i.l.bf16 %v2474_v10  ;;  %v3703_v34 = vpop.permute.xlu2 %2528  ;;  %2345 = vmatpush.bf16.msra.mxu3 %v2292_v56 }
  0xd8   : > { %2703 = vrot.lane.b32.xlu1 %v2702_v37, %s2764_s13 }
  0xd9   : > { %v1718_v6 = vsel %vm1702_vm12, %v1701_v51, %v2476_v28  ;;  %v1717_v32 = vsel %vm1702_vm12, %v1700_v31, %v2475_v40  ;;  %1885 = vmatpush.bf16.msra.mxu0 %v2291_v12  ;;  %v2531_v51 = vunpack.i.h.bf16 %v3703_v34  ;;  %v2530_v31 = vunpack.i.l.bf16 %v3703_v34 }
  0xda   : > { %v3706_v48 = vsel %vm1719_vm13, %v1717_v32, %v2515_v5  ;;  %v3709_v0 = vsel %vm1719_vm13, %v1718_v6, %v2516_v35  ;;  %v2494_v55 = vpop.permute.xlu1 %2493  ;;  %2346 = vmatpush.bf16.msra.mxu1 %v2291_v12  ;;  %2347 = vmatpush.bf16.msra.mxu2 %v2291_v12 }
  0xdb   : > { %v2496_v45 = vunpack.i.h.bf16 %v2494_v55  ;;  %v2495_v13 = vunpack.i.l.bf16 %v2494_v55  ;;  %2348 = vmatpush.bf16.msra.mxu3 %v2291_v12 }
  0xdc   : > { %2698 = vrot.lane.b32.xlu0 %v3543_v16, %s2762_s10 }
  0xdd   : > { %2708 = vrot.lane.b32.xlu2 %v2707_v30, %s2766_s23  ;;  %v3726_v16 = vsel %vm1719_vm13, %v3599_v44, %v2496_v45  ;;  %v3730_v25 = vsel %vm1719_vm13, %v3596_v60, %v2495_v13 }
  0xde   : > { %v3721_v11 = vpop.permute.xlu0 %2488 }
  0xdf   : > { %v3732_v58 = vpop.permute.xlu2 %2543  ;;  %v2491_v39 = vunpack.i.h.bf16 %v3721_v11 }
  0xe2   : > { %v2509_v20 = vpop.permute.xlu1 %2508 }
  0xe3   : > { %v2511_v2 = vunpack.i.h.bf16 %v2509_v20  ;;  %v2510_v24 = vunpack.i.l.bf16 %v2509_v20 }
  0xe4   : > { %2713 = vrot.lane.b32.xlu0 %v2712_v62, %s2765_s21 }
  0xe5   : > { %v3739_v44 = vsel %vm1719_vm13, %v3610_v29, %v2510_v24  ;;  %v3743_v60 = vsel %vm1719_vm13, %v3607_v4, %v2511_v2  ;;  %v2465_v29 = vunpack.i.l.bf16 %v3572_v23  ;;  %v4032_v4 = vld [vmem:[#allocation2_spill] sm:$0xff] }
  0xe6   : > { %v2504_v22 = vpop.permute.xlu0 %2503  ;;  %v1686_v63 = vsel %vm1685_vm9, %v4032_v4, %v2440_v19  ;;  %v2490_v19 = vunpack.i.l.bf16 %v3721_v11  ;;  %v2546_v4 = vunpack.i.h.bf16 %v3732_v58 }
  0xe7   : > { %v2506_v52 = vunpack.i.h.bf16 %v2504_v22  ;;  %v2505_v1 = vunpack.i.l.bf16 %v2504_v22  ;;  %v3763_v15 = vpop.permute.xlu2 %2558  ;;  %v1703_v3 = vsel %vm1702_vm12, %v1686_v63, %v2465_v29  ;;  %v2545_v63 = vunpack.i.l.bf16 %v3732_v58 }
  0xe8   : > { %v1720_v23 = vsel %vm1719_vm13, %v1703_v3, %v2480_v42  ;;  %v1725_v42 = vsel %vm1719_vm13, %v3640_v38, %v2491_v39  ;;  %v1724_v11 = vsel %vm1719_vm13, %v3637_v46, %v2490_v19  ;;  %v2560_v38 = vunpack.i.l.bf16 %v3763_v15 }
  0xe9   : > { %v3747_v59 = vsel %vm1719_vm13, %v3663_v49, %v2506_v52  ;;  %v3751_v21 = vsel %vm1719_vm13, %v3667_v61, %v2505_v1  ;;  %v2481_v49 = vunpack.i.h.bf16 %v3686_v14  ;;  %v2456_v52 = vunpack.i.h.bf16 %v3654_v41 }
  0xea   : > { %v2524_v61 = vpop.permute.xlu1 %2523  ;;  %v2455_v1 = vunpack.i.l.bf16 %v3654_v41  ;;  %v1742_v58 = vsel %vm1736_vm1, %v1725_v42, %v2546_v4 }
  0xeb   : > { %v1721_v56 = vsel %vm1719_vm13, %v1704_v26, %v2481_v49  ;;  %v2526_v28 = vunpack.i.h.bf16 %v2524_v61  ;;  %v2525_v40 = vunpack.i.l.bf16 %v2524_v61  ;;  %v1712_v29 = vsel %vm1702_vm12, %v3494_v9, %v2456_v52 }
  0xec   : > { %v1711_v53 = vsel %vm1702_vm12, %v3498_v7, %v2455_v1  ;;  %v1729_v7 = vsel %vm1719_vm13, %v1712_v29, %v2501_v33  ;;  %v1741_v26 = vsel %vm1736_vm1, %v1724_v11, %v2545_v63 }
  0xed   : > { %v1728_v9 = vsel %vm1719_vm13, %v1711_v53, %v2500_v17 }
  0xee   : > { %v2519_v35 = vpop.permute.xlu0 %2518 }
  0xef   : > { %v2521_v5 = vunpack.i.h.bf16 %v2519_v35  ;;  %v2520_v10 = vunpack.i.l.bf16 %v2519_v35  ;;  %v3775_v8 = vpop.permute.xlu2 %2573 }
  0xf0   : > { %v2576_v46 = vunpack.i.h.bf16 %v3775_v8 }
  0xf1   : > { %v1737_v14 = vsel %vm1736_vm1, %v1720_v23, %v2520_v10  ;;  %v1738_v37 = vsel %vm1736_vm1, %v1721_v56, %v2521_v5  ;;  %v2561_v23 = vunpack.i.h.bf16 %v3763_v15  ;;  %v2575_v56 = vunpack.i.l.bf16 %v3775_v8 }
  0xf2   : > { %v1754_v50 = vsel %vm1753_vm4, %v1737_v14, %v2525_v40  ;;  %v1755_v54 = vsel %vm1753_vm4, %v1738_v37, %v2526_v28  ;;  %v2539_v6 = vpop.permute.xlu1 %2538 }
  0xf3   : > { %v2541_v47 = vunpack.i.h.bf16 %v2539_v6  ;;  %v2540_v12 = vunpack.i.l.bf16 %v2539_v6  ;;  %v1771_v18 = vsel %vm1770_vm2, %v1754_v50, %v2530_v31  ;;  %v1772_v55 = vsel %vm1770_vm2, %v1755_v54, %v2531_v51 }
  0xf6   : > { %v2534_v32 = vpop.permute.xlu0 %2533 }
  0xf7   : > { %v2536_v30 = vunpack.i.h.bf16 %v2534_v32  ;;  %v2535_v27 = vunpack.i.l.bf16 %v2534_v32  ;;  %v2589_v24 = vpop.permute.xlu2 %2588 }
  0xf8   : > { %v2591_v6 = vunpack.i.h.bf16 %v2589_v24  ;;  %v2590_v32 = vunpack.i.l.bf16 %v2589_v24 }
  0xf9   : > { %v1788_v34 = vsel %vm1787_vm3, %v1771_v18, %v2535_v27  ;;  %v1789_v45 = vsel %vm1787_vm3, %v1772_v55, %v2536_v30 }
  0xfa   : > { %v1805_v13 = vsel %vm1804_vm5, %v1788_v34, %v2540_v12  ;;  %v1806_v62 = vsel %vm1804_vm5, %v1789_v45, %v2541_v47  ;;  %v2554_v22 = vpop.permute.xlu1 %2553 }
  0xfb   : > { %v1821_v20 = vpack.c.bf16 %v1806_v62, %v1805_v13  ;;  %v2556_v35 = vunpack.i.h.bf16 %v2554_v22  ;;  %v2555_v5 = vunpack.i.l.bf16 %v2554_v22 }
  0xfd   : > { %2279 = vmatmul.msk.bf16.vlgmr.msra.gmra.mxu0 %vm1849_vm6, %v1821_v20  ;;  %v1745_v37 = vsel %vm1736_vm1, %v1728_v9, %v2555_v5  ;;  %v1746_v51 = vsel %vm1736_vm1, %v1729_v7, %v2556_v35 }
  0xfe   : > { %v2549_v2 = vpop.permute.xlu0 %2548 }
  0xff   : > { %v2551_v61 = vunpack.i.h.bf16 %v2549_v2  ;;  %v2550_v57 = vunpack.i.l.bf16 %v2549_v2  ;;  %v3810_v14 = vpop.permute.xlu2 %2603 }
 0x101   : > { %v1758_v28 = vsel %vm1753_vm4, %v1741_v26, %v2550_v57  ;;  %v1759_v40 = vsel %vm1753_vm4, %v1742_v58, %v2551_v61 }
 0x102   : > { %v2569_v49 = vpop.permute.xlu1 %2568  ;;  %v1775_v8 = vsel %vm1770_vm2, %v1758_v28, %v2560_v38  ;;  %v1776_v47 = vsel %vm1770_vm2, %v1759_v40, %v2561_v23 }
 0x103   : > { %v2571_v31 = vunpack.i.h.bf16 %v2569_v49  ;;  %v2570_v50 = vunpack.i.l.bf16 %v2569_v49 }
 0x105   : > { %v1792_v45 = vsel %vm1787_vm3, %v1775_v8, %v2570_v50  ;;  %v1793_v13 = vsel %vm1787_vm3, %v1776_v47, %v2571_v31 }
 0x106   : > { %v2564_v41 = vpop.permute.xlu0 %2563 }
 0x107   : > { %v2566_v10 = vunpack.i.h.bf16 %v2564_v41  ;;  %v2565_v3 = vunpack.i.l.bf16 %v2564_v41  ;;  %v2619_v17 = vpop.permute.xlu2 %2618 }
 0x108   : > { %v2621_v7 = vunpack.i.h.bf16 %v2619_v17 }
 0x109   : > { %v1762_v54 = vsel %vm1753_vm4, %v1745_v37, %v2565_v3  ;;  %v1763_v15 = vsel %vm1753_vm4, %v1746_v51, %v2566_v10  ;;  %v2620_v10 = vunpack.i.l.bf16 %v2619_v17 }
 0x10a   : > { %v2584_v12 = vpop.permute.xlu1 %2583  ;;  %v1779_v62 = vsel %vm1770_vm2, %v1762_v54, %v2575_v56  ;;  %v1780_v20 = vsel %vm1770_vm2, %v1763_v15, %v2576_v46  ;;  %v2606_v56 = vunpack.i.h.bf16 %v3810_v14 }
 0x10b   : > { %v2586_v27 = vunpack.i.h.bf16 %v2584_v12  ;;  %v2585_v18 = vunpack.i.l.bf16 %v2584_v12 }
 0x10d   : > { %v1796_v22 = vsel %vm1787_vm3, %v1779_v62, %v2585_v18  ;;  %v1797_v2 = vsel %vm1787_vm3, %v1780_v20, %v2586_v27 }
 0x10e   : > { %v2579_v30 = vpop.permute.xlu0 %2578  ;;  %v1813_v39 = vsel %vm1804_vm5, %v1796_v22, %v2590_v32  ;;  %v1814_v19 = vsel %vm1804_vm5, %v1797_v2, %v2591_v6 }
 0x10f   : > { %v2581_v55 = vunpack.i.h.bf16 %v2579_v30  ;;  %v2580_v34 = vunpack.i.l.bf16 %v2579_v30  ;;  %v1825_v33 = vpack.c.bf16 %v1814_v19, %v1813_v39  ;;  %v2634_v42 = vpop.permute.xlu2 %2633 }
 0x110   : > { %v2636_v12 = vunpack.i.h.bf16 %v2634_v42  ;;  %v2635_v30 = vunpack.i.l.bf16 %v2634_v42 }
 0x111   : > { %v1809_v24 = vsel %vm1804_vm5, %v1792_v45, %v2580_v34  ;;  %v1810_v52 = vsel %vm1804_vm5, %v1793_v13, %v2581_v55  ;;  %2283 = vmatmul.msk.bf16.vlgmr.msra.gmra.mxu2 %vm1849_vm6, %v1825_v33 }
 0x112   : > { %v1823_v1 = vpack.c.bf16 %v1810_v52, %v1809_v24  ;;  %v2599_v29 = vpop.permute.xlu1 %2598 }
 0x113   : > { %v2601_v11 = vunpack.i.h.bf16 %v2599_v29  ;;  %v2600_v61 = vunpack.i.l.bf16 %v2599_v29 }
 0x114   : > { %2281 = vmatmul.msk.bf16.vlgmr.msra.gmra.mxu1 %vm1849_vm6, %v1823_v1 }
 0x116   : > { %v2594_v53 = vpop.permute.xlu0 %2593 }
 0x117   : > { %v2596_v4 = vunpack.i.h.bf16 %v2594_v53  ;;  %v2595_v63 = vunpack.i.l.bf16 %v2594_v53  ;;  %v2649_v50 = vpop.permute.xlu2 %2648 }
 0x118   : > { %v2651_v17 = vunpack.i.h.bf16 %v2649_v50  ;;  %v2650_v29 = vunpack.i.l.bf16 %v2649_v50 }
 0x119   : > { %v1739_v57 = vsel %vm1736_vm1, %v3643_v36, %v2595_v63  ;;  %v1740_v35 = vsel %vm1736_vm1, %v3646_v43, %v2596_v4  ;;  %v2605_v36 = vunpack.i.l.bf16 %v3810_v14  ;;  %v1750_v14 = vsel %vm1736_vm1, %v3743_v60, %v2606_v56 }
 0x11a   : > { %v2614_v49 = vpop.permute.xlu1 %2613  ;;  %v1756_v3 = vsel %vm1753_vm4, %v1739_v57, %v2600_v61  ;;  %v1757_v58 = vsel %vm1753_vm4, %v1740_v35, %v2601_v11 }
 0x11b   : > { %v2616_v40 = vunpack.i.h.bf16 %v2614_v49  ;;  %v2615_v37 = vunpack.i.l.bf16 %v2614_v49  ;;  %v1749_v47 = vsel %vm1736_vm1, %v3739_v44, %v2605_v36 }
 0x11d   : > { %v1766_v27 = vsel %vm1753_vm4, %v1749_v47, %v2615_v37  ;;  %v1767_v18 = vsel %vm1753_vm4, %v1750_v14, %v2616_v40 }
 0x11e   : > { %v2609_v41 = vpop.permute.xlu0 %2608 }
 0x11f   : > { %v2611_v5 = vunpack.i.h.bf16 %v2609_v41  ;;  %v2610_v9 = vunpack.i.l.bf16 %v2609_v41  ;;  %v2664_v52 = vpop.permute.xlu2 %2663 }
 0x121   : > { %v1773_v26 = vsel %vm1770_vm2, %v1756_v3, %v2610_v9  ;;  %v1774_v23 = vsel %vm1770_vm2, %v1757_v58, %v2611_v5 }
 0x122   : > { %v2629_v38 = vpop.permute.xlu1 %2628  ;;  %v1790_v51 = vsel %vm1787_vm3, %v1773_v26, %v2620_v10  ;;  %v1791_v31 = vsel %vm1787_vm3, %v1774_v23, %v2621_v7  ;;  %v2666_v23 = vunpack.i.h.bf16 %v2664_v52 }
 0x123   : > { %v2631_v28 = vunpack.i.h.bf16 %v2629_v38  ;;  %v2630_v43 = vunpack.i.l.bf16 %v2629_v38  ;;  %v2665_v38 = vunpack.i.l.bf16 %v2664_v52 }
 0x125   : > { %v1807_v6 = vsel %vm1804_vm5, %v1790_v51, %v2630_v43  ;;  %v1808_v32 = vsel %vm1804_vm5, %v1791_v31, %v2631_v28 }
 0x126   : > { %v2624_v46 = vpop.permute.xlu0 %2623  ;;  %v1822_v8 = vpack.c.bf16 %v1808_v32, %v1807_v6 }
 0x127   : > { %v2626_v54 = vunpack.i.h.bf16 %v2624_v46  ;;  %v2625_v15 = vunpack.i.l.bf16 %v2624_v46  ;;  %v2679_v41 = vpop.permute.xlu2 %2678 }
 0x128   : > { %2280 = vmatmul.msk.bf16.gmra.mxu0 %vm1849_vm6, %v1822_v8  ;;  %v2681_v42 = vunpack.i.h.bf16 %v2679_v41  ;;  %v2680_v11 = vunpack.i.l.bf16 %v2679_v41 }
 0x129   : > { %v1783_v55 = vsel %vm1770_vm2, %v1766_v27, %v2625_v15  ;;  %v1784_v34 = vsel %vm1770_vm2, %v1767_v18, %v2626_v54 }
 0x12a   : > { %v2644_v45 = vpop.permute.xlu1 %2643  ;;  %v1800_v44 = vsel %vm1787_vm3, %v1783_v55, %v2635_v30  ;;  %v1801_v60 = vsel %vm1787_vm3, %v1784_v34, %v2636_v12 }
 0x12b   : > { %v2646_v19 = vunpack.i.h.bf16 %v2644_v45  ;;  %v2645_v33 = vunpack.i.l.bf16 %v2644_v45 }
 0x12d   : > { %v1744_v53 = vsel %vm1736_vm1, %v3726_v16, %v2646_v19  ;;  %v1743_v4 = vsel %vm1736_vm1, %v3730_v25, %v2645_v33 }
 0x12e   : > { %v2639_v13 = vpop.permute.xlu0 %2638  ;;  %v1760_v61 = vsel %vm1753_vm4, %v1743_v4, %v2650_v29  ;;  %v1761_v57 = vsel %vm1753_vm4, %v1744_v53, %v2651_v17 }
 0x12f   : > { %v2641_v62 = vunpack.i.h.bf16 %v2639_v13  ;;  %v2640_v20 = vunpack.i.l.bf16 %v2639_v13 }
 0x131   : > { %v1817_v22 = vsel %vm1804_vm5, %v1800_v44, %v2640_v20  ;;  %v1818_v2 = vsel %vm1804_vm5, %v1801_v60, %v2641_v62 }
 0x132   : > { %v1827_v24 = vpack.c.bf16 %v1818_v2, %v1817_v22  ;;  %v2659_v1 = vpop.permute.xlu1 %2658 }
 0x133   : > { %v2661_v63 = vunpack.i.h.bf16 %v2659_v1  ;;  %v2660_v49 = vunpack.i.l.bf16 %v2659_v1 }
 0x134   : > { %2285 = vmatmul.msk.bf16.vlgmr.msra.gmra.mxu3 %vm1849_vm6, %v1827_v24 }
 0x135   : > { %v1777_v16 = vsel %vm1770_vm2, %v1760_v61, %v2660_v49  ;;  %v1778_v58 = vsel %vm1770_vm2, %v1761_v57, %v2661_v63 }
 0x136   : > { %v2654_v39 = vpop.permute.xlu0 %2653 }
 0x137   : > { %v2656_v9 = vunpack.i.h.bf16 %v2654_v39  ;;  %v2655_v7 = vunpack.i.l.bf16 %v2654_v39 }
 0x139   : > { %v1747_v36 = vsel %vm1736_vm1, %v3751_v21, %v2655_v7  ;;  %v1748_v28 = vsel %vm1736_vm1, %v3747_v59, %v2656_v9  ;;  %v2694_v59 = vpop.permute.xlu2 %2693 }
 0x13a   : > { %v2674_v35 = vpop.permute.xlu1 %2673  ;;  %v1764_v51 = vsel %vm1753_vm4, %v1747_v36, %v2665_v38  ;;  %v1765_v31 = vsel %vm1753_vm4, %v1748_v28, %v2666_v23  ;;  %v2696_v55 = vunpack.i.h.bf16 %v2694_v59  ;;  %v2695_v34 = vunpack.i.l.bf16 %v2694_v59 }
 0x13b   : > { %v2676_v40 = vunpack.i.h.bf16 %v2674_v35  ;;  %v2675_v37 = vunpack.i.l.bf16 %v2674_v35 }
 0x13c   : > { %v1751_v44 = vsel %vm1736_vm1, %v3706_v48, %v2695_v34  ;;  %v1752_v60 = vsel %vm1736_vm1, %v3709_v0, %v2696_v55 }
 0x13d   : > { %v1781_v21 = vsel %vm1770_vm2, %v1764_v51, %v2675_v37  ;;  %v1782_v47 = vsel %vm1770_vm2, %v1765_v31, %v2676_v40 }
 0x13e   : > { %v2669_v5 = vpop.permute.xlu0 %2668 }
 0x13f   : > { %v2671_v10 = vunpack.i.h.bf16 %v2669_v5  ;;  %v2670_v3 = vunpack.i.l.bf16 %v2669_v5 }
 0x141   : > { %v1794_v25 = vsel %vm1787_vm3, %v1777_v16, %v2670_v3  ;;  %v1795_v26 = vsel %vm1787_vm3, %v1778_v58, %v2671_v10  ;;  %v2709_v24 = vpop.permute.xlu2 %2708 }
 0x142   : > { %v1811_v46 = vsel %vm1804_vm5, %v1794_v25, %v2680_v11  ;;  %v1812_v56 = vsel %vm1804_vm5, %v1795_v26, %v2681_v42  ;;  %v2689_v54 = vpop.permute.xlu1 %2688  ;;  %v2711_v39 = vunpack.i.h.bf16 %v2709_v24  ;;  %v2710_v19 = vunpack.i.l.bf16 %v2709_v24 }
 0x143   : > { %v1824_v43 = vpack.c.bf16 %v1812_v56, %v1811_v46  ;;  %v2691_v32 = vunpack.i.h.bf16 %v2689_v54  ;;  %v2690_v8 = vunpack.i.l.bf16 %v2689_v54 }
 0x145   : > { %2282 = vmatmul.msk.bf16.gmra.mxu1 %vm1849_vm6, %v1824_v43 }
 0x146   : > { %v2684_v50 = vpop.permute.xlu0 %2683 }
 0x147   : > { %v2686_v15 = vunpack.i.h.bf16 %v2684_v50  ;;  %v2685_v6 = vunpack.i.l.bf16 %v2684_v50 }
 0x149   : > { %v1798_v14 = vsel %vm1787_vm3, %v1781_v21, %v2685_v6  ;;  %v1799_v12 = vsel %vm1787_vm3, %v1782_v47, %v2686_v15 }
 0x14a   : > { %v1815_v30 = vsel %vm1804_vm5, %v1798_v14, %v2690_v8  ;;  %v1816_v27 = vsel %vm1804_vm5, %v1799_v12, %v2691_v32  ;;  %v2704_v13 = vpop.permute.xlu1 %2703 }
 0x14b   : > { %v1826_v18 = vpack.c.bf16 %v1816_v27, %v1815_v30  ;;  %v2706_v22 = vunpack.i.h.bf16 %v2704_v13  ;;  %v2705_v2 = vunpack.i.l.bf16 %v2704_v13 }
 0x14d   : > { %2284 = vmatmul.msk.bf16.gmra.mxu2 %vm1849_vm6, %v1826_v18 }
 0x14e   : > { %v2699_v45 = vpop.permute.xlu0 %2698 }
 0x14f   : > { %v2701_v62 = vunpack.i.h.bf16 %v2699_v45  ;;  %v2700_v20 = vunpack.i.l.bf16 %v2699_v45 }
 0x151   : > { %v1768_v52 = vsel %vm1753_vm4, %v1751_v44, %v2700_v20  ;;  %v1769_v1 = vsel %vm1753_vm4, %v1752_v60, %v2701_v62 }
 0x152   : > { %v1785_v33 = vsel %vm1770_vm2, %v1768_v52, %v2705_v2  ;;  %v1786_v17 = vsel %vm1770_vm2, %v1769_v1, %v2706_v22 }
 0x153   : > { %v1802_v4 = vsel %vm1787_vm3, %v1785_v33, %v2710_v19  ;;  %v1803_v0 = vsel %vm1787_vm3, %v1786_v17, %v2711_v39 }
 0x156   : > { %v2714_v29 = vpop.permute.xlu0 %2713 }
 0x157   : > { %v2716_v53 = vunpack.i.h.bf16 %v2714_v29  ;;  %v2715_v48 = vunpack.i.l.bf16 %v2714_v29 }
 0x159   : > { %v1819_v63 = vsel %vm1804_vm5, %v1802_v4, %v2715_v48  ;;  %v1820_v49 = vsel %vm1804_vm5, %v1803_v0, %v2716_v53 }
 0x15a   : > { %v1828_v41 = vpack.c.bf16 %v1820_v49, %v1819_v63 }
 0x15c   : > { %2286 = vmatmul.msk.bf16.gmra.mxu3 %vm1849_vm6, %v1828_v41 }
 0x17a   : > { %v1887_v42 = vpop.f32.mrf.mxu0 }
 0x17b   : > { %v1927_v11 = vpack.c.bf16 %v1887_v42, %v1887_v42  ;;  %v1997_v61 = vmul.f32 %v1887_v42, %v1887_v42  ;;  %v1960_v35 = vsel %vm1685_vm9, %v1887_v42, 0.0 }
 0x17d   : > { %1944 = vst.msk [vmem:[%s3902_s16] sm:$0xf] %vm1943_vm7, %v1927_v11  ;;  %v2013_v3 = vsel %vm1685_vm9, %v1997_v61, 0.0 }
 0x182   : > { %v1889_v57 = vpop.f32.mrf.mxu0 }
 0x183   : > { %v1928_v5 = vpack.c.bf16 %v1889_v57, %v1889_v57  ;;  %v1961_v9 = vsel %vm1685_vm9, %v1889_v57, 0.0  ;;  %v1998_v7 = vmul.f32 %v1889_v57, %v1889_v57 }
 0x184   : > { %v1962_v10 = vadd.f32 %v1961_v9, %v1960_v35 }
 0x185   : > { %1945 = vst.msk [vmem:[%s3902_s16 + $0x4] sm:$0xf] %vm1943_vm7, %v1928_v5  ;;  %v2014_v16 = vsel %vm1685_vm9, %v1998_v7, 0.0 }
 0x186   : > { %v2015_v58 = vadd.f32 %v2014_v16, %v2013_v3 }
 0x191   : > { %v1897_v25 = vpop.f32.mrf.mxu1 }
 0x192   : > { %v1931_v26 = vpack.c.bf16 %v1897_v25, %v1897_v25  ;;  %v2001_v15 = vmul.f32 %v1897_v25, %v1897_v25  ;;  %v1967_v59 = vsel %vm1685_vm9, %v1897_v25, 0.0 }
 0x194   : > { %1948 = vst.msk [vmem:[%s3902_s16 + $0x10] sm:$0xf] %vm1943_vm7, %v1931_v26  ;;  %v1907_v23 = vpop.f32.mrf.mxu2  ;;  %v2020_v27 = vsel %vm1685_vm9, %v2001_v15, 0.0 }
 0x195   : > { %v1935_v38 = vpack.c.bf16 %v1907_v23, %v1907_v23  ;;  %v2005_v17 = vmul.f32 %v1907_v23, %v1907_v23  ;;  %v1975_v63 = vsel %vm1685_vm9, %v1907_v23, 0.0 }
 0x197   : > { %1952 = vst.msk [vmem:[%s3902_s16 + $0x20] sm:$0xf] %vm1943_vm7, %v1935_v38  ;;  %v2028_v11 = vsel %vm1685_vm9, %v2005_v17, 0.0 }
 0x199   : > { %v1899_v46 = vpop.f32.mrf.mxu1 }
 0x19a   : > { %v1932_v56 = vpack.c.bf16 %v1899_v46, %v1899_v46  ;;  %v2002_v44 = vmul.f32 %v1899_v46, %v1899_v46  ;;  %v1969_v22 = vsel %vm1685_vm9, %v1899_v46, 0.0 }
 0x19c   : > { %1949 = vst.msk [vmem:[%s3902_s16 + $0x14] sm:$0xf] %vm1943_vm7, %v1932_v56  ;;  %v1909_v36 = vpop.f32.mrf.mxu2  ;;  %v2022_v52 = vsel %vm1685_vm9, %v2002_v44, 0.0 }
 0x19d   : > { %v1936_v28 = vpack.c.bf16 %v1909_v36, %v1909_v36  ;;  %v2006_v5 = vmul.f32 %v1909_v36, %v1909_v36  ;;  %v1977_v9 = vsel %vm1685_vm9, %v1909_v36, 0.0 }
 0x19f   : > { %1953 = vst.msk [vmem:[%s3902_s16 + $0x24] sm:$0xf] %vm1943_vm7, %v1936_v28  ;;  %v2030_v3 = vsel %vm1685_vm9, %v2006_v5, 0.0 }
 0x1a5   : > { %v1892_v43 = vpop.f32.mrf.mxu0 }
 0x1a6   : > { %v1929_v40 = vpack.c.bf16 %v1892_v43, %v1892_v43  ;;  %v1999_v37 = vmul.f32 %v1892_v43, %v1892_v43  ;;  %v1963_v51 = vsel %vm1685_vm9, %v1892_v43, 0.0 }
 0x1a7   : > { %v1964_v50 = vadd.f32 %v1963_v51, %v1962_v10 }
 0x1a8   : > { %1946 = vst.msk [vmem:[%s3902_s16 + $0x8] sm:$0xf] %vm1943_vm7, %v1929_v40  ;;  %v2016_v31 = vsel %vm1685_vm9, %v1999_v37, 0.0 }
 0x1a9   : > { %v2017_v21 = vadd.f32 %v2016_v31, %v2015_v58 }
 0x1ad   : > { %v1894_v54 = vpop.f32.mrf.mxu0 }
 0x1ae   : > { %v1930_v6 = vpack.c.bf16 %v1894_v54, %v1894_v54  ;;  %v1965_v32 = vsel %vm1685_vm9, %v1894_v54, 0.0  ;;  %v2000_v8 = vmul.f32 %v1894_v54, %v1894_v54 }
 0x1af   : > { %v1966_v47 = vadd.f32 %v1965_v32, %v1964_v50 }
 0x1b0   : > { %1947 = vst.msk [vmem:[%s3902_s16 + $0xc] sm:$0xf] %vm1943_vm7, %v1930_v6  ;;  %v2018_v14 = vsel %vm1685_vm9, %v2000_v8, 0.0 }
 0x1b1   : > { %v1968_v12 = vadd.f32 %v1967_v59, %v1966_v47  ;;  %v2019_v30 = vadd.f32 %v2018_v14, %v2017_v21 }
 0x1b3   : > { %v2021_v18 = vadd.f32 %v2020_v27, %v2019_v30  ;;  %v1970_v24 = vadd.f32 %v1969_v22, %v1968_v12 }
 0x1b5   : > { %v2023_v19 = vadd.f32 %v2022_v52, %v2021_v18 }
 0x1b7   : > { %v1917_v55 = vpop.f32.mrf.mxu3 }
 0x1b8   : > { %v1939_v34 = vpack.c.bf16 %v1917_v55, %v1917_v55  ;;  %v2009_v40 = vmul.f32 %v1917_v55, %v1917_v55  ;;  %v1983_v51 = vsel %vm1685_vm9, %v1917_v55, 0.0 }
 0x1ba   : > { %1956 = vst.msk [vmem:[%s3902_s16 + $0x30] sm:$0xf] %vm1943_vm7, %v1939_v34  ;;  %v2036_v54 = vsel %vm1685_vm9, %v2009_v40, 0.0 }
 0x1bf   : > { %v1919_v45 = vpop.f32.mrf.mxu3 }
 0x1c0   : > { %v1940_v13 = vpack.c.bf16 %v1919_v45, %v1919_v45  ;;  %v2010_v15 = vmul.f32 %v1919_v45, %v1919_v45  ;;  %v1985_v8 = vsel %vm1685_vm9, %v1919_v45, 0.0 }
 0x1c2   : > { %1957 = vst.msk [vmem:[%s3902_s16 + $0x34] sm:$0xf] %vm1943_vm7, %v1940_v13  ;;  %v1902_v62 = vpop.f32.mrf.mxu1  ;;  %v2038_v59 = vsel %vm1685_vm9, %v2010_v15, 0.0 }
 0x1c3   : > { %v1933_v20 = vpack.c.bf16 %v1902_v62, %v1902_v62  ;;  %v2003_v60 = vmul.f32 %v1902_v62, %v1902_v62  ;;  %v1971_v2 = vsel %vm1685_vm9, %v1902_v62, 0.0 }
 0x1c4   : > { %v1972_v39 = vadd.f32 %v1971_v2, %v1970_v24 }
 0x1c5   : > { %1950 = vst.msk [vmem:[%s3902_s16 + $0x18] sm:$0xf] %vm1943_vm7, %v1933_v20  ;;  %v2024_v1 = vsel %vm1685_vm9, %v2003_v60, 0.0 }
 0x1c6   : > { %v2025_v4 = vadd.f32 %v2024_v1, %v2023_v19 }
 0x1ca   : > { %v1904_v33 = vpop.f32.mrf.mxu1 }
 0x1cb   : > { %v1934_v29 = vpack.c.bf16 %v1904_v33, %v1904_v33  ;;  %v1973_v53 = vsel %vm1685_vm9, %v1904_v33, 0.0  ;;  %v2004_v48 = vmul.f32 %v1904_v33, %v1904_v33 }
 0x1cc   : > { %v1974_v0 = vadd.f32 %v1973_v53, %v1972_v39 }
 0x1cd   : > { %1951 = vst.msk [vmem:[%s3902_s16 + $0x1c] sm:$0xf] %vm1943_vm7, %v1934_v29  ;;  %v2026_v49 = vsel %vm1685_vm9, %v2004_v48, 0.0 }
 0x1ce   : > { %v1976_v41 = vadd.f32 %v1975_v63, %v1974_v0  ;;  %v2027_v42 = vadd.f32 %v2026_v49, %v2025_v4 }
 0x1d0   : > { %v2029_v61 = vadd.f32 %v2028_v11, %v2027_v42  ;;  %v1912_v57 = vpop.f32.mrf.mxu2  ;;  %v1978_v10 = vadd.f32 %v1977_v9, %v1976_v41 }
 0x1d1   : > { %v1937_v35 = vpack.c.bf16 %v1912_v57, %v1912_v57  ;;  %v2007_v7 = vmul.f32 %v1912_v57, %v1912_v57  ;;  %v1979_v16 = vsel %vm1685_vm9, %v1912_v57, 0.0 }
 0x1d2   : > { %v2031_v58 = vadd.f32 %v2030_v3, %v2029_v61  ;;  %v1980_v23 = vadd.f32 %v1979_v16, %v1978_v10 }
 0x1d3   : > { %1954 = vst.msk [vmem:[%s3902_s16 + $0x28] sm:$0xf] %vm1943_vm7, %v1937_v35  ;;  %v2032_v25 = vsel %vm1685_vm9, %v2007_v7, 0.0 }
 0x1d4   : > { %v2033_v28 = vadd.f32 %v2032_v25, %v2031_v58 }
 0x1d8   : > { %v1914_v26 = vpop.f32.mrf.mxu2 }
 0x1d9   : > { %v1938_v38 = vpack.c.bf16 %v1914_v26, %v1914_v26  ;;  %v1981_v46 = vsel %vm1685_vm9, %v1914_v26, 0.0  ;;  %v2008_v56 = vmul.f32 %v1914_v26, %v1914_v26 }
 0x1da   : > { %v1982_v36 = vadd.f32 %v1981_v46, %v1980_v23 }
 0x1db   : > { %1955 = vst.msk [vmem:[%s3902_s16 + $0x2c] sm:$0xf] %vm1943_vm7, %v1938_v38  ;;  %v2034_v43 = vsel %vm1685_vm9, %v2008_v56, 0.0 }
 0x1dc   : > { %v2035_v37 = vadd.f32 %v2034_v43, %v2033_v28  ;;  %v1984_v31 = vadd.f32 %v1983_v51, %v1982_v36 }
 0x1de   : > { %v2037_v32 = vadd.f32 %v2036_v54, %v2035_v37  ;;  %v1986_v47 = vadd.f32 %v1985_v8, %v1984_v31 }
 0x1df   : > { %v1922_v50 = vpop.f32.mrf.mxu3 }
 0x1e0   : > { %v1941_v6 = vpack.c.bf16 %v1922_v50, %v1922_v50  ;;  %v2011_v21 = vmul.f32 %v1922_v50, %v1922_v50  ;;  %v1987_v14 = vsel %vm1685_vm9, %v1922_v50, 0.0  ;;  %v2039_v12 = vadd.f32 %v2038_v59, %v2037_v32 }
 0x1e1   : > { %v1988_v27 = vadd.f32 %v1987_v14, %v1986_v47 }
 0x1e2   : > { %1958 = vst.msk [vmem:[%s3902_s16 + $0x38] sm:$0xf] %vm1943_vm7, %v1941_v6  ;;  %v2040_v30 = vsel %vm1685_vm9, %v2011_v21, 0.0 }
 0x1e3   : > { %v2041_v45 = vadd.f32 %v2040_v30, %v2039_v12 }
 0x1e7   : > { %v1924_v18 = vpop.f32.mrf.mxu3 }
 0x1e8   : > { %v1942_v55 = vpack.c.bf16 %v1924_v18, %v1924_v18  ;;  %v1989_v34 = vsel %vm1685_vm9, %v1924_v18, 0.0  ;;  %v2012_v13 = vmul.f32 %v1924_v18, %v1924_v18 }
 0x1e9   : > { %v1990_v62 = vadd.f32 %v1989_v34, %v1988_v27 }
 0x1ea   : > { %1959 = vst.msk [vmem:[%s3902_s16 + $0x3c] sm:$0xf] %vm1943_vm7, %v1942_v55  ;;  %v2042_v20 = vsel %vm1685_vm9, %v2012_v13, 0.0 }
 0x1eb   : > { %v1991_v44 = vrot.slane %v1990_v62, 4  ;;  %v2043_v60 = vadd.f32 %v2042_v20, %v2041_v45 }
 0x1ed   : > { %v1992_v22 = vadd.f32 %v1991_v44, %v1990_v62  ;;  %v2044_v2 = vrot.slane %v2043_v60, 4 }
 0x1ef   : > { %v1993_v24 = vrot.slane %v1992_v22, 2  ;;  %v2045_v52 = vadd.f32 %v2044_v2, %v2043_v60 }
 0x1f1   : > { %v1994_v1 = vadd.f32 %v1993_v24, %v1992_v22  ;;  %v2046_v39 = vrot.slane %v2045_v52, 2 }
 0x1f3   : > { %v1995_v19 = vrot.slane %v1994_v1, 1  ;;  %v2047_v33 = vadd.f32 %v2046_v39, %v2045_v52 }
 0x1f5   : > { %v2048_v17 = vrot.slane %v2047_v33, 1  ;;  %v1996_v29 = vadd.f32 %v1995_v19, %v1994_v1 }
 0x1f7   : > { %v2049_v53 = vadd.f32 %v2048_v17, %v2047_v33 }
 0x1f9   : > { %v2050_v48 = vsel %vm1030_vm0, %v1996_v29, %v2049_v53 }
 0x1fa   : > { %2052 = vst.msk [vmem:[%s465_s19] sm:$0x3] %vm2051_vm8, %v2050_v48 }
 0x1fb PF: > { %s18_s28 = sadd.s32 1, %s2757_s28   ;;  %s4033_s24 = smov %s2749_s26 }
 0x1fc   : > { %p15_p13 = scmp.ge.s32.totalorder %s18_s28, 6   ;;  %s4034_s25 = smov %s2753_s27 }
 0x1fd   : > { %s4035_s26 = smov %s4038_s29  ;;  %s4036_s27 = smov %s4042_s30 }
 0x1fe   :  { %17 = sbr.rel (!%p15_p13) target bundleno = 3 (0x3), region = 92 }

</bundles_post_ra>
